<compile_context>
chip_gen: v5e
topology: v5e:2x2
jax: 0.10.0
libtpu: 0.0.40
codegen_flags: <defaults>
</compile_context>

<pallas_src>
import numpy as np
import jax
import jax.numpy as jnp
from jax.experimental import pallas as pl
from jax.experimental.pallas import tpu as pltpu

# ---- small synthetic config ----
VOCAB = 64
EMBED = 32
HIDDEN = 32
B = 2
T = 8

# TPU-friendly padded sizes
B_PAD = 8        # f32 sublane count
EP = 128         # padded embedding width (lanes)
HP = 128         # padded hidden width per gate per direction (lanes)


# ------------------------------------------------------------------ kernel ---
def history_encoder_kernel(x_ref, h0_ref, lens_ref, w_ref, b_ref,
                           out_ref, hid_ref):
    """Bidirectional 1-layer GRU over a length-masked batch (directions fused).

    x_ref    (T*B_PAD, EP)       bf16  embedded inputs, time-major rows
    h0_ref   (B_PAD, 2*HP)       f32   initial hidden [fwd | bwd] lanes
    lens_ref (B_PAD, 1)          i32   per-batch sequence lengths (0 for pad rows)
    w_ref    (EP+2*HP, 6*HP)     bf16  rows [0:EP]=W_ih (both dirs),
                                       rows [EP:EP+HP]=W_hh fwd, [EP+HP:]=W_hh bwd
                                       (block-diagonal over the gate-major columns
                                        [r_f | r_b | z_f | z_b | n_f | n_b])
    b_ref    (2, 6*HP)           f32   row 0 = b_ih (+ folded b_hr,b_hz), row 1 = b_hn
    out_ref  (T, B_PAD, HP)      f32   fwd + bwd outputs (zero past each length)
    hid_ref  (2, B_PAD, HP)      f32   final hidden [fwd, bwd]
    """
    T_, Bn, _ = out_ref.shape
    lens = lens_ref[...]                                     # (Bn, 1) int32

    # ---- one big MXU matmul: input projections, all timesteps, both dirs ----
    gi = jnp.dot(x_ref[...], w_ref[0:EP, :],
                 preferred_element_type=jnp.float32)         # (T*Bn, 6*HP) f32
    gi = gi + b_ref[0:1, :]                                  # folded input biases

    w_hh = w_ref[EP:EP + 2 * HP, :]                          # (2HP, 6HP) bf16
    # only the n-gate keeps a recurrent bias; broadcast it ONCE
    b_hn = jnp.broadcast_to(b_ref[1:2, 4 * HP:6 * HP], (Bn, 2 * HP))
    # lane selector: first HP lanes = forward direction, last HP = backward
    lane = jax.lax.broadcasted_iota(jnp.int32, (1, 2 * HP), 1)

    h = h0_ref[...]                                          # (Bn, 2HP) f32
    out_f = [None] * T_
    out_b = [None] * T_

    # T is a compile-time constant -> loop fully unrolled, all indices static.
    for i in range(T_):
        tb = T_ - 1 - i
        g_f = gi[i * Bn:(i + 1) * Bn, :]                     # fwd gates, time i
        g_b = gi[tb * Bn:(tb + 1) * Bn, :]                   # bwd gates, time tb
        # time-align the two directions into gate-major slabs (128-lane concats)
        i_rz = jnp.concatenate([g_f[:, 0:HP],          g_b[:, HP:2 * HP],
                                g_f[:, 2 * HP:3 * HP], g_b[:, 3 * HP:4 * HP]],
                               axis=1)                       # (Bn, 4HP)
        i_n = jnp.concatenate([g_f[:, 4 * HP:5 * HP], g_b[:, 5 * HP:6 * HP]],
                              axis=1)                        # (Bn, 2HP)

        # fused recurrent matmul for BOTH directions: K = 2*HP = 256
        gh = jnp.dot(h.astype(jnp.bfloat16), w_hh,
                     preferred_element_type=jnp.float32)     # (Bn, 6HP)

        rz = jax.nn.sigmoid(i_rz + gh[:, 0:4 * HP])          # one sigmoid
        r = rz[:, 0:2 * HP]
        z = rz[:, 2 * HP:4 * HP]
        n = jnp.tanh(i_n + r * (gh[:, 4 * HP:6 * HP] + b_hn))  # one tanh
        cand = (1.0 - z) * n + z * h

        # packed-seq masking: fwd lanes gated on (i < len), bwd on (tb < len)
        t_vec = jnp.where(lane < HP, i, tb)                  # (1, 2HP) int32
        upd = t_vec < lens                                   # (Bn, 2HP) bool
        h = jnp.where(upd, cand, h)
        o = jnp.where(upd, h, 0.0)                           # zero past length
        out_f[i] = o[:, 0:HP]
        out_b[tb] = o[:, HP:2 * HP]

    # single bulk stores (sum of directions; all full (8,128) tiles)
    out_ref[...] = jnp.stack([out_f[t] + out_b[t] for t in range(T_)], axis=0)
    hid_ref[...] = jnp.stack([h[:, 0:HP], h[:, HP:2 * HP]], axis=0)


# ------------------------------------------------------------------ params ---
def make_params(key):
    ks = jax.random.split(key, 9)

    def rnd(k, shape, scale=0.1):
        return scale * jax.random.normal(k, shape, dtype=jnp.float32)

    emb = rnd(ks[0], (VOCAB, EMBED))
    # natural-size GRU weights in x @ W layout, per direction [fwd, bwd],
    # gate column blocks ordered [r | z | n] (PyTorch gate order)
    w_ih = [rnd(ks[1], (EMBED, 3 * HIDDEN)), rnd(ks[2], (EMBED, 3 * HIDDEN))]
    w_hh = [rnd(ks[3], (HIDDEN, 3 * HIDDEN)), rnd(ks[4], (HIDDEN, 3 * HIDDEN))]
    b_ih = [rnd(ks[5], (3 * HIDDEN,)), rnd(ks[6], (3 * HIDDEN,))]
    b_hh = [rnd(ks[7], (3 * HIDDEN,)), rnd(ks[8], (3 * HIDDEN,))]

    # One padded weight slab (gate-major columns, block-diagonal W_hh) and one
    # bias slab.  Zero padding guarantees padded hidden units stay exactly 0.
    w_slab = np.zeros((EP + 2 * HP, 6 * HP), np.float32)
    b_slab = np.zeros((2, 6 * HP), np.float32)
    H = HIDDEN
    for d in range(2):                       # 0 = forward, 1 = backward
        for g in range(3):                   # 0 = r, 1 = z, 2 = n
            c0 = (2 * g + d) * HP            # gate-major column block
            w_slab[:EMBED, c0:c0 + H] = np.asarray(w_ih[d][:, g * H:(g + 1) * H])
            r0 = EP + d * HP                 # block-diagonal recurrent rows
            w_slab[r0:r0 + H, c0:c0 + H] = np.asarray(w_hh[d][:, g * H:(g + 1) * H])
            if g < 2:
                # r, z: sigmoid(i + h) is symmetric in biases -> fold b_hh into b_ih
                b_slab[0, c0:c0 + H] = np.asarray(
                    b_ih[d][g * H:(g + 1) * H] + b_hh[d][g * H:(g + 1) * H])
            else:
                # n: b_in stays additive, b_hn must remain inside r*(...)
                b_slab[0, c0:c0 + H] = np.asarray(b_ih[d][g * H:(g + 1) * H])
                b_slab[1, c0:c0 + H] = np.asarray(b_hh[d][g * H:(g + 1) * H])

    return dict(emb=emb,
                w_slab=jnp.asarray(w_slab, jnp.bfloat16),
                b_slab=jnp.asarray(b_slab, jnp.float32),
                # unpacked f32 originals kept for the pure-JAX reference check
                w_ih=w_ih, w_hh=w_hh, b_ih=b_ih, b_hh=b_hh)


# ------------------------------------------------------------------ wrapper --
def history_encoder_forward(params, input_seqs, input_lens, hidden=None):
    """Mirrors HistoryEncoder.forward.

    input_seqs: (T, B) int token ids; input_lens: numpy array of lengths (B,)
    Returns (outputs, hidden, embedded) with torch shapes
      outputs  (max_len, B, H)   fwd+bwd summed, zero past each length
      hidden   (2, B, H)         [fwd_last, bwd_last]
      embedded (T, B, E)         embeddings in length-sorted batch order
    """
    Tn, Bn_in = input_seqs.shape
    lens_np = np.asarray(input_lens)

    embedded = jnp.take(params['emb'], input_seqs, axis=0)          # (T, B, E)

    # pad batch (B -> 8 sublanes) and features (E -> 128 lanes), time-major rows
    x_pad = jnp.zeros((Tn, B_PAD, EP), jnp.float32)
    x_pad = x_pad.at[:, :Bn_in, :EMBED].set(embedded)
    x2d = x_pad.reshape(Tn * B_PAD, EP).astype(jnp.bfloat16)

    h0 = jnp.zeros((B_PAD, 2 * HP), jnp.float32)
    if hidden is not None:
        h0 = h0.at[:Bn_in, 0:HIDDEN].set(hidden[0].astype(jnp.float32))
        h0 = h0.at[:Bn_in, HP:HP + HIDDEN].set(hidden[1].astype(jnp.float32))

    lens_pad = np.zeros((B_PAD, 1), np.int32)                # padded rows: len=0
    lens_pad[:Bn_in, 0] = lens_np
    lens = jnp.asarray(lens_pad)

    vmem = pl.BlockSpec(memory_space=pltpu.MemorySpace.VMEM)
    out, hid = pl.pallas_call(
        history_encoder_kernel,
        out_shape=(jax.ShapeDtypeStruct((Tn, B_PAD, HP), jnp.float32),
                   jax.ShapeDtypeStruct((2, B_PAD, HP), jnp.float32)),
        in_specs=[vmem] * 5,
        out_specs=(vmem, vmem),
    )(x2d, h0, lens, params['w_slab'], params['b_slab'])

    max_len = int(np.max(lens_np))                  # pad_packed_sequence trims
    outputs = out[:max_len, :Bn_in, :HIDDEN]        # (max_len, B, H)
    hidden_out = hid[:, :Bn_in, :HIDDEN]            # (2, B, H)

    # torch returns `embedded` in length-sorted batch order, time-major
    sort_idx = np.argsort(-lens_np)
    embedded_sorted = embedded[:, jnp.asarray(sort_idx), :]          # (T, B, E)
    return outputs, hidden_out, embedded_sorted


# ---------------------------------------------------------------- reference --
def reference_forward(params, input_seqs, input_lens, hidden=None):
    """Pure-JAX f32 reference of the same packed bidirectional GRU semantics."""
    Tn, Bn = input_seqs.shape
    H = HIDDEN
    x = jnp.take(params['emb'], input_seqs, axis=0)          # (T, B, E) f32
    lens = jnp.asarray(np.asarray(input_lens), jnp.int32).reshape(Bn, 1)

    def cell(h, x_t, d):
        gi = x_t @ params['w_ih'][d] + params['b_ih'][d]
        gh = h @ params['w_hh'][d] + params['b_hh'][d]
        r = jax.nn.sigmoid(gi[:, :H] + gh[:, :H])
        z = jax.nn.sigmoid(gi[:, H:2 * H] + gh[:, H:2 * H])
        n = jnp.tanh(gi[:, 2 * H:] + r * gh[:, 2 * H:])
        return (1.0 - z) * n + z * h

    h_f = jnp.zeros((Bn, H), jnp.float32)
    h_b = jnp.zeros((Bn, H), jnp.float32)
    if hidden is not None:
        h_f, h_b = hidden[0].astype(jnp.float32), hidden[1].astype(jnp.float32)
    out_f = [None] * Tn
    out_b = [None] * Tn
    for t in range(Tn):
        m = (t < lens).astype(jnp.float32)
        h_f = m * cell(h_f, x[t], 0) + (1.0 - m) * h_f
        out_f[t] = m * h_f
    for i in range(Tn):
        t = Tn - 1 - i
        m = (t < lens).astype(jnp.float32)
        h_b = m * cell(h_b, x[t], 1) + (1.0 - m) * h_b
        out_b[t] = m * h_b
    outputs = jnp.stack([out_f[t] + out_b[t] for t in range(Tn)], axis=0)
    hid = jnp.stack([h_f, h_b], axis=0)
    return outputs, hid


# ------------------------------------------------------------------ main -----
if __name__ == "__main__":
    key = jax.random.PRNGKey(0)
    kp, kseq = jax.random.split(key, 2)

    params = make_params(kp)
    input_seqs = jax.random.randint(kseq, (T, B), 0, VOCAB, dtype=jnp.int32)
    input_lens = np.array([T, T - 3], dtype=np.int32)   # variable lengths, max == T

    outputs, hidden, embedded = history_encoder_forward(params, input_seqs, input_lens)
    jax.block_until_ready((outputs, hidden, embedded))

    assert outputs.shape == (T, B, HIDDEN)
    assert hidden.shape == (2, B, HIDDEN)
    assert embedded.shape == (T, B, EMBED)
    assert bool(jnp.all(jnp.isfinite(outputs)))
    assert bool(jnp.all(jnp.isfinite(hidden)))
    # packed-sequence semantics: outputs past each sequence length are exactly zero
    assert float(jnp.max(jnp.abs(outputs[int(input_lens[1]):, 1, :]))) == 0.0

    # numeric check against a pure-JAX f32 reference (bf16 weights inside kernel)
    ref_out, ref_hid = reference_forward(params, input_seqs, input_lens)
    err_out = float(jnp.max(jnp.abs(outputs - ref_out)))
    err_hid = float(jnp.max(jnp.abs(hidden - ref_hid)))
    assert err_out < 3e-2 and err_hid < 3e-2, (err_out, err_hid)

    print("KERNEL_OK")
</pallas_src>

<mosaic_0001>
module attributes {stable_mosaic.version = 11 : i64} {
  func.func @history_encoder_kernel(%arg0: memref<64x128xbf16, #tpu.memory_space<vmem>>, %arg1: memref<8x256xf32, #tpu.memory_space<vmem>>, %arg2: memref<8x1xi32, #tpu.memory_space<vmem>>, %arg3: memref<384x768xbf16, #tpu.memory_space<vmem>>, %arg4: memref<2x768xf32, #tpu.memory_space<vmem>>, %arg5: memref<8x8x128xf32, #tpu.memory_space<vmem>>, %arg6: memref<2x8x128xf32, #tpu.memory_space<vmem>>) attributes {dimension_semantics = [], scalar_prefetch = 0 : i64, scratch_operands = 0 : i64, tpu.core_type = #tpu.core_type<tc>} {
    %c0 = arith.constant 0 : index
    %c0_0 = arith.constant 0 : index
    %0 = vector.load %arg2[%c0, %c0_0] : memref<8x1xi32, #tpu.memory_space<vmem>>, vector<8x1xi32>
    %c0_1 = arith.constant 0 : index
    %c0_2 = arith.constant 0 : index
    %1 = vector.load %arg0[%c0_1, %c0_2] : memref<64x128xbf16, #tpu.memory_space<vmem>>, vector<64x128xbf16>
    %c0_3 = arith.constant 0 : index
    %c0_4 = arith.constant 0 : index
    %2 = vector.load %arg3[%c0_3, %c0_4] : memref<384x768xbf16, #tpu.memory_space<vmem>>, vector<128x768xbf16>
    %cst = arith.constant dense<0.000000e+00> : vector<64x768xf32>
    %3 = tpu.matmul %1, %2, %cst {dimension_numbers = #tpu.dot_dimension_numbers<[1], [0], [0], [1], [0, 0, 1, 1], [], []>} : vector<64x128xbf16>, vector<128x768xbf16>, vector<64x768xf32> -> vector<64x768xf32>
    %c0_5 = arith.constant 0 : index
    %c0_6 = arith.constant 0 : index
    %4 = vector.load %arg4[%c0_5, %c0_6] : memref<2x768xf32, #tpu.memory_space<vmem>>, vector<1x768xf32>
    %5 = vector.broadcast %4 : vector<1x768xf32> to vector<64x768xf32>
    %6 = arith.addf %3, %5 : vector<64x768xf32>
    %c128 = arith.constant 128 : index
    %c0_7 = arith.constant 0 : index
    %7 = vector.load %arg3[%c128, %c0_7] : memref<384x768xbf16, #tpu.memory_space<vmem>>, vector<256x768xbf16>
    %c1 = arith.constant 1 : index
    %c512 = arith.constant 512 : index
    %8 = vector.load %arg4[%c1, %c512] : memref<2x768xf32, #tpu.memory_space<vmem>>, vector<1x256xf32>
    %9 = vector.shape_cast %8 : vector<1x256xf32> to vector<1x256xf32>
    %10 = vector.broadcast %9 : vector<1x256xf32> to vector<8x256xf32>
    %11 = tpu.iota {dimensions = array<i32: 1>} : vector<1x256xi32>
    %c0_8 = arith.constant 0 : index
    %c0_9 = arith.constant 0 : index
    %12 = vector.load %arg1[%c0_8, %c0_9] : memref<8x256xf32, #tpu.memory_space<vmem>>, vector<8x256xf32>
    %13 = vector.extract_strided_slice %6 {offsets = [0, 0], sizes = [8, 768], strides = [1, 1]} : vector<64x768xf32> to vector<8x768xf32>
    %14 = vector.extract_strided_slice %6 {offsets = [56, 0], sizes = [8, 768], strides = [1, 1]} : vector<64x768xf32> to vector<8x768xf32>
    %15 = vector.extract_strided_slice %13 {offsets = [0, 0], sizes = [8, 128], strides = [1, 1]} : vector<8x768xf32> to vector<8x128xf32>
    %16 = vector.extract_strided_slice %14 {offsets = [0, 128], sizes = [8, 128], strides = [1, 1]} : vector<8x768xf32> to vector<8x128xf32>
    %17 = vector.extract_strided_slice %13 {offsets = [0, 256], sizes = [8, 128], strides = [1, 1]} : vector<8x768xf32> to vector<8x128xf32>
    %18 = vector.extract_strided_slice %14 {offsets = [0, 384], sizes = [8, 128], strides = [1, 1]} : vector<8x768xf32> to vector<8x128xf32>
    %19 = tpu.concatenate %15, %16, %17, %18 in 1 : vector<8x128xf32>, vector<8x128xf32>, vector<8x128xf32>, vector<8x128xf32> -> vector<8x512xf32>
    %20 = vector.extract_strided_slice %13 {offsets = [0, 512], sizes = [8, 128], strides = [1, 1]} : vector<8x768xf32> to vector<8x128xf32>
    %21 = vector.extract_strided_slice %14 {offsets = [0, 640], sizes = [8, 128], strides = [1, 1]} : vector<8x768xf32> to vector<8x128xf32>
    %22 = tpu.concatenate %20, %21 in 1 : vector<8x128xf32>, vector<8x128xf32> -> vector<8x256xf32>
    %23 = arith.truncf %12 : vector<8x256xf32> to vector<8x256xbf16>
    %cst_10 = arith.constant dense<0.000000e+00> : vector<8x768xf32>
    %24 = tpu.matmul %23, %7, %cst_10 {dimension_numbers = #tpu.dot_dimension_numbers<[1], [0], [0], [1], [0, 0, 1, 1], [], []>} : vector<8x256xbf16>, vector<256x768xbf16>, vector<8x768xf32> -> vector<8x768xf32>
    %25 = vector.extract_strided_slice %24 {offsets = [0, 0], sizes = [8, 512], strides = [1, 1]} : vector<8x768xf32> to vector<8x512xf32>
    %26 = arith.addf %19, %25 : vector<8x512xf32>
    %27 = arith.negf %26 : vector<8x512xf32>
    %28 = math.exp %27 : vector<8x512xf32>
    %cst_11 = arith.constant 1.000000e+00 : f32
    %29 = vector.broadcast %cst_11 : f32 to vector<8x512xf32>
    %30 = arith.addf %29, %28 : vector<8x512xf32>
    %31 = arith.divf %29, %30 : vector<8x512xf32>
    %32 = vector.extract_strided_slice %31 {offsets = [0, 0], sizes = [8, 256], strides = [1, 1]} : vector<8x512xf32> to vector<8x256xf32>
    %33 = vector.extract_strided_slice %31 {offsets = [0, 256], sizes = [8, 256], strides = [1, 1]} : vector<8x512xf32> to vector<8x256xf32>
    %34 = vector.extract_strided_slice %24 {offsets = [0, 512], sizes = [8, 256], strides = [1, 1]} : vector<8x768xf32> to vector<8x256xf32>
    %35 = arith.addf %34, %10 : vector<8x256xf32>
    %36 = arith.mulf %32, %35 : vector<8x256xf32>
    %37 = arith.addf %22, %36 : vector<8x256xf32>
    %38 = math.tanh %37 : vector<8x256xf32>
    %cst_12 = arith.constant 1.000000e+00 : f32
    %39 = vector.broadcast %cst_12 : f32 to vector<8x256xf32>
    %40 = arith.subf %39, %33 : vector<8x256xf32>
    %41 = arith.mulf %40, %38 : vector<8x256xf32>
    %42 = arith.mulf %33, %12 : vector<8x256xf32>
    %43 = arith.addf %41, %42 : vector<8x256xf32>
    %c128_i32 = arith.constant 128 : i32
    %44 = vector.broadcast %c128_i32 : i32 to vector<1x256xi32>
    %45 = arith.cmpi slt, %11, %44 : vector<1x256xi32>
    %c0_i32 = arith.constant 0 : i32
    %c7_i32 = arith.constant 7 : i32
    %46 = vector.broadcast %c0_i32 : i32 to vector<1x256xi32>
    %47 = vector.broadcast %c7_i32 : i32 to vector<1x256xi32>
    %48 = arith.select %45, %46, %47 : vector<1x256xi1>, vector<1x256xi32>
    %49 = vector.broadcast %48 : vector<1x256xi32> to vector<8x256xi32>
    %50 = vector.broadcast %0 : vector<8x1xi32> to vector<8x256xi32>
    %51 = arith.cmpi slt, %49, %50 : vector<8x256xi32>
    %52 = arith.select %51, %43, %12 : vector<8x256xi1>, vector<8x256xf32>
    %cst_13 = arith.constant 0.000000e+00 : f32
    %53 = vector.broadcast %cst_13 : f32 to vector<8x256xf32>
    %54 = arith.select %51, %52, %53 : vector<8x256xi1>, vector<8x256xf32>
    %55 = vector.extract_strided_slice %54 {offsets = [0, 0], sizes = [8, 128], strides = [1, 1]} : vector<8x256xf32> to vector<8x128xf32>
    %56 = vector.extract_strided_slice %54 {offsets = [0, 128], sizes = [8, 128], strides = [1, 1]} : vector<8x256xf32> to vector<8x128xf32>
    %57 = vector.extract_strided_slice %6 {offsets = [8, 0], sizes = [8, 768], strides = [1, 1]} : vector<64x768xf32> to vector<8x768xf32>
    %58 = vector.extract_strided_slice %6 {offsets = [48, 0], sizes = [8, 768], strides = [1, 1]} : vector<64x768xf32> to vector<8x768xf32>
    %59 = vector.extract_strided_slice %57 {offsets = [0, 0], sizes = [8, 128], strides = [1, 1]} : vector<8x768xf32> to vector<8x128xf32>
    %60 = vector.extract_strided_slice %58 {offsets = [0, 128], sizes = [8, 128], strides = [1, 1]} : vector<8x768xf32> to vector<8x128xf32>
    %61 = vector.extract_strided_slice %57 {offsets = [0, 256], sizes = [8, 128], strides = [1, 1]} : vector<8x768xf32> to vector<8x128xf32>
    %62 = vector.extract_strided_slice %58 {offsets = [0, 384], sizes = [8, 128], strides = [1, 1]} : vector<8x768xf32> to vector<8x128xf32>
    %63 = tpu.concatenate %59, %60, %61, %62 in 1 : vector<8x128xf32>, vector<8x128xf32>, vector<8x128xf32>, vector<8x128xf32> -> vector<8x512xf32>
    %64 = vector.extract_strided_slice %57 {offsets = [0, 512], sizes = [8, 128], strides = [1, 1]} : vector<8x768xf32> to vector<8x128xf32>
    %65 = vector.extract_strided_slice %58 {offsets = [0, 640], sizes = [8, 128], strides = [1, 1]} : vector<8x768xf32> to vector<8x128xf32>
    %66 = tpu.concatenate %64, %65 in 1 : vector<8x128xf32>, vector<8x128xf32> -> vector<8x256xf32>
    %67 = arith.truncf %52 : vector<8x256xf32> to vector<8x256xbf16>
    %cst_14 = arith.constant dense<0.000000e+00> : vector<8x768xf32>
    %68 = tpu.matmul %67, %7, %cst_14 {dimension_numbers = #tpu.dot_dimension_numbers<[1], [0], [0], [1], [0, 0, 1, 1], [], []>} : vector<8x256xbf16>, vector<256x768xbf16>, vector<8x768xf32> -> vector<8x768xf32>
    %69 = vector.extract_strided_slice %68 {offsets = [0, 0], sizes = [8, 512], strides = [1, 1]} : vector<8x768xf32> to vector<8x512xf32>
    %70 = arith.addf %63, %69 : vector<8x512xf32>
    %71 = arith.negf %70 : vector<8x512xf32>
    %72 = math.exp %71 : vector<8x512xf32>
    %cst_15 = arith.constant 1.000000e+00 : f32
    %73 = vector.broadcast %cst_15 : f32 to vector<8x512xf32>
    %74 = arith.addf %73, %72 : vector<8x512xf32>
    %75 = arith.divf %73, %74 : vector<8x512xf32>
    %76 = vector.extract_strided_slice %75 {offsets = [0, 0], sizes = [8, 256], strides = [1, 1]} : vector<8x512xf32> to vector<8x256xf32>
    %77 = vector.extract_strided_slice %75 {offsets = [0, 256], sizes = [8, 256], strides = [1, 1]} : vector<8x512xf32> to vector<8x256xf32>
    %78 = vector.extract_strided_slice %68 {offsets = [0, 512], sizes = [8, 256], strides = [1, 1]} : vector<8x768xf32> to vector<8x256xf32>
    %79 = arith.addf %78, %10 : vector<8x256xf32>
    %80 = arith.mulf %76, %79 : vector<8x256xf32>
    %81 = arith.addf %66, %80 : vector<8x256xf32>
    %82 = math.tanh %81 : vector<8x256xf32>
    %cst_16 = arith.constant 1.000000e+00 : f32
    %83 = vector.broadcast %cst_16 : f32 to vector<8x256xf32>
    %84 = arith.subf %83, %77 : vector<8x256xf32>
    %85 = arith.mulf %84, %82 : vector<8x256xf32>
    %86 = arith.mulf %77, %52 : vector<8x256xf32>
    %87 = arith.addf %85, %86 : vector<8x256xf32>
    %c128_i32_17 = arith.constant 128 : i32
    %88 = vector.broadcast %c128_i32_17 : i32 to vector<1x256xi32>
    %89 = arith.cmpi slt, %11, %88 : vector<1x256xi32>
    %c1_i32 = arith.constant 1 : i32
    %c6_i32 = arith.constant 6 : i32
    %90 = vector.broadcast %c1_i32 : i32 to vector<1x256xi32>
    %91 = vector.broadcast %c6_i32 : i32 to vector<1x256xi32>
    %92 = arith.select %89, %90, %91 : vector<1x256xi1>, vector<1x256xi32>
    %93 = vector.broadcast %92 : vector<1x256xi32> to vector<8x256xi32>
    %94 = vector.broadcast %0 : vector<8x1xi32> to vector<8x256xi32>
    %95 = arith.cmpi slt, %93, %94 : vector<8x256xi32>
    %96 = arith.select %95, %87, %52 : vector<8x256xi1>, vector<8x256xf32>
    %cst_18 = arith.constant 0.000000e+00 : f32
    %97 = vector.broadcast %cst_18 : f32 to vector<8x256xf32>
    %98 = arith.select %95, %96, %97 : vector<8x256xi1>, vector<8x256xf32>
    %99 = vector.extract_strided_slice %98 {offsets = [0, 0], sizes = [8, 128], strides = [1, 1]} : vector<8x256xf32> to vector<8x128xf32>
    %100 = vector.extract_strided_slice %98 {offsets = [0, 128], sizes = [8, 128], strides = [1, 1]} : vector<8x256xf32> to vector<8x128xf32>
    %101 = vector.extract_strided_slice %6 {offsets = [16, 0], sizes = [8, 768], strides = [1, 1]} : vector<64x768xf32> to vector<8x768xf32>
    %102 = vector.extract_strided_slice %6 {offsets = [40, 0], sizes = [8, 768], strides = [1, 1]} : vector<64x768xf32> to vector<8x768xf32>
    %103 = vector.extract_strided_slice %101 {offsets = [0, 0], sizes = [8, 128], strides = [1, 1]} : vector<8x768xf32> to vector<8x128xf32>
    %104 = vector.extract_strided_slice %102 {offsets = [0, 128], sizes = [8, 128], strides = [1, 1]} : vector<8x768xf32> to vector<8x128xf32>
    %105 = vector.extract_strided_slice %101 {offsets = [0, 256], sizes = [8, 128], strides = [1, 1]} : vector<8x768xf32> to vector<8x128xf32>
    %106 = vector.extract_strided_slice %102 {offsets = [0, 384], sizes = [8, 128], strides = [1, 1]} : vector<8x768xf32> to vector<8x128xf32>
    %107 = tpu.concatenate %103, %104, %105, %106 in 1 : vector<8x128xf32>, vector<8x128xf32>, vector<8x128xf32>, vector<8x128xf32> -> vector<8x512xf32>
    %108 = vector.extract_strided_slice %101 {offsets = [0, 512], sizes = [8, 128], strides = [1, 1]} : vector<8x768xf32> to vector<8x128xf32>
    %109 = vector.extract_strided_slice %102 {offsets = [0, 640], sizes = [8, 128], strides = [1, 1]} : vector<8x768xf32> to vector<8x128xf32>
    %110 = tpu.concatenate %108, %109 in 1 : vector<8x128xf32>, vector<8x128xf32> -> vector<8x256xf32>
    %111 = arith.truncf %96 : vector<8x256xf32> to vector<8x256xbf16>
    %cst_19 = arith.constant dense<0.000000e+00> : vector<8x768xf32>
    %112 = tpu.matmul %111, %7, %cst_19 {dimension_numbers = #tpu.dot_dimension_numbers<[1], [0], [0], [1], [0, 0, 1, 1], [], []>} : vector<8x256xbf16>, vector<256x768xbf16>, vector<8x768xf32> -> vector<8x768xf32>
    %113 = vector.extract_strided_slice %112 {offsets = [0, 0], sizes = [8, 512], strides = [1, 1]} : vector<8x768xf32> to vector<8x512xf32>
    %114 = arith.addf %107, %113 : vector<8x512xf32>
    %115 = arith.negf %114 : vector<8x512xf32>
    %116 = math.exp %115 : vector<8x512xf32>
    %cst_20 = arith.constant 1.000000e+00 : f32
    %117 = vector.broadcast %cst_20 : f32 to vector<8x512xf32>
    %118 = arith.addf %117, %116 : vector<8x512xf32>
    %119 = arith.divf %117, %118 : vector<8x512xf32>
    %120 = vector.extract_strided_slice %119 {offsets = [0, 0], sizes = [8, 256], strides = [1, 1]} : vector<8x512xf32> to vector<8x256xf32>
    %121 = vector.extract_strided_slice %119 {offsets = [0, 256], sizes = [8, 256], strides = [1, 1]} : vector<8x512xf32> to vector<8x256xf32>
    %122 = vector.extract_strided_slice %112 {offsets = [0, 512], sizes = [8, 256], strides = [1, 1]} : vector<8x768xf32> to vector<8x256xf32>
    %123 = arith.addf %122, %10 : vector<8x256xf32>
    %124 = arith.mulf %120, %123 : vector<8x256xf32>
    %125 = arith.addf %110, %124 : vector<8x256xf32>
    %126 = math.tanh %125 : vector<8x256xf32>
    %cst_21 = arith.constant 1.000000e+00 : f32
    %127 = vector.broadcast %cst_21 : f32 to vector<8x256xf32>
    %128 = arith.subf %127, %121 : vector<8x256xf32>
    %129 = arith.mulf %128, %126 : vector<8x256xf32>
    %130 = arith.mulf %121, %96 : vector<8x256xf32>
    %131 = arith.addf %129, %130 : vector<8x256xf32>
    %c128_i32_22 = arith.constant 128 : i32
    %132 = vector.broadcast %c128_i32_22 : i32 to vector<1x256xi32>
    %133 = arith.cmpi slt, %11, %132 : vector<1x256xi32>
    %c2_i32 = arith.constant 2 : i32
    %c5_i32 = arith.constant 5 : i32
    %134 = vector.broadcast %c2_i32 : i32 to vector<1x256xi32>
    %135 = vector.broadcast %c5_i32 : i32 to vector<1x256xi32>
    %136 = arith.select %133, %134, %135 : vector<1x256xi1>, vector<1x256xi32>
    %137 = vector.broadcast %136 : vector<1x256xi32> to vector<8x256xi32>
    %138 = vector.broadcast %0 : vector<8x1xi32> to vector<8x256xi32>
    %139 = arith.cmpi slt, %137, %138 : vector<8x256xi32>
    %140 = arith.select %139, %131, %96 : vector<8x256xi1>, vector<8x256xf32>
    %cst_23 = arith.constant 0.000000e+00 : f32
    %141 = vector.broadcast %cst_23 : f32 to vector<8x256xf32>
    %142 = arith.select %139, %140, %141 : vector<8x256xi1>, vector<8x256xf32>
    %143 = vector.extract_strided_slice %142 {offsets = [0, 0], sizes = [8, 128], strides = [1, 1]} : vector<8x256xf32> to vector<8x128xf32>
    %144 = vector.extract_strided_slice %142 {offsets = [0, 128], sizes = [8, 128], strides = [1, 1]} : vector<8x256xf32> to vector<8x128xf32>
    %145 = vector.extract_strided_slice %6 {offsets = [24, 0], sizes = [8, 768], strides = [1, 1]} : vector<64x768xf32> to vector<8x768xf32>
    %146 = vector.extract_strided_slice %6 {offsets = [32, 0], sizes = [8, 768], strides = [1, 1]} : vector<64x768xf32> to vector<8x768xf32>
    %147 = vector.extract_strided_slice %145 {offsets = [0, 0], sizes = [8, 128], strides = [1, 1]} : vector<8x768xf32> to vector<8x128xf32>
    %148 = vector.extract_strided_slice %146 {offsets = [0, 128], sizes = [8, 128], strides = [1, 1]} : vector<8x768xf32> to vector<8x128xf32>
    %149 = vector.extract_strided_slice %145 {offsets = [0, 256], sizes = [8, 128], strides = [1, 1]} : vector<8x768xf32> to vector<8x128xf32>
    %150 = vector.extract_strided_slice %146 {offsets = [0, 384], sizes = [8, 128], strides = [1, 1]} : vector<8x768xf32> to vector<8x128xf32>
    %151 = tpu.concatenate %147, %148, %149, %150 in 1 : vector<8x128xf32>, vector<8x128xf32>, vector<8x128xf32>, vector<8x128xf32> -> vector<8x512xf32>
    %152 = vector.extract_strided_slice %145 {offsets = [0, 512], sizes = [8, 128], strides = [1, 1]} : vector<8x768xf32> to vector<8x128xf32>
    %153 = vector.extract_strided_slice %146 {offsets = [0, 640], sizes = [8, 128], strides = [1, 1]} : vector<8x768xf32> to vector<8x128xf32>
    %154 = tpu.concatenate %152, %153 in 1 : vector<8x128xf32>, vector<8x128xf32> -> vector<8x256xf32>
    %155 = arith.truncf %140 : vector<8x256xf32> to vector<8x256xbf16>
    %cst_24 = arith.constant dense<0.000000e+00> : vector<8x768xf32>
    %156 = tpu.matmul %155, %7, %cst_24 {dimension_numbers = #tpu.dot_dimension_numbers<[1], [0], [0], [1], [0, 0, 1, 1], [], []>} : vector<8x256xbf16>, vector<256x768xbf16>, vector<8x768xf32> -> vector<8x768xf32>
    %157 = vector.extract_strided_slice %156 {offsets = [0, 0], sizes = [8, 512], strides = [1, 1]} : vector<8x768xf32> to vector<8x512xf32>
    %158 = arith.addf %151, %157 : vector<8x512xf32>
    %159 = arith.negf %158 : vector<8x512xf32>
    %160 = math.exp %159 : vector<8x512xf32>
    %cst_25 = arith.constant 1.000000e+00 : f32
    %161 = vector.broadcast %cst_25 : f32 to vector<8x512xf32>
    %162 = arith.addf %161, %160 : vector<8x512xf32>
    %163 = arith.divf %161, %162 : vector<8x512xf32>
    %164 = vector.extract_strided_slice %163 {offsets = [0, 0], sizes = [8, 256], strides = [1, 1]} : vector<8x512xf32> to vector<8x256xf32>
    %165 = vector.extract_strided_slice %163 {offsets = [0, 256], sizes = [8, 256], strides = [1, 1]} : vector<8x512xf32> to vector<8x256xf32>
    %166 = vector.extract_strided_slice %156 {offsets = [0, 512], sizes = [8, 256], strides = [1, 1]} : vector<8x768xf32> to vector<8x256xf32>
    %167 = arith.addf %166, %10 : vector<8x256xf32>
    %168 = arith.mulf %164, %167 : vector<8x256xf32>
    %169 = arith.addf %154, %168 : vector<8x256xf32>
    %170 = math.tanh %169 : vector<8x256xf32>
    %cst_26 = arith.constant 1.000000e+00 : f32
    %171 = vector.broadcast %cst_26 : f32 to vector<8x256xf32>
    %172 = arith.subf %171, %165 : vector<8x256xf32>
    %173 = arith.mulf %172, %170 : vector<8x256xf32>
    %174 = arith.mulf %165, %140 : vector<8x256xf32>
    %175 = arith.addf %173, %174 : vector<8x256xf32>
    %c128_i32_27 = arith.constant 128 : i32
    %176 = vector.broadcast %c128_i32_27 : i32 to vector<1x256xi32>
    %177 = arith.cmpi slt, %11, %176 : vector<1x256xi32>
    %c3_i32 = arith.constant 3 : i32
    %c4_i32 = arith.constant 4 : i32
    %178 = vector.broadcast %c3_i32 : i32 to vector<1x256xi32>
    %179 = vector.broadcast %c4_i32 : i32 to vector<1x256xi32>
    %180 = arith.select %177, %178, %179 : vector<1x256xi1>, vector<1x256xi32>
    %181 = vector.broadcast %180 : vector<1x256xi32> to vector<8x256xi32>
    %182 = vector.broadcast %0 : vector<8x1xi32> to vector<8x256xi32>
    %183 = arith.cmpi slt, %181, %182 : vector<8x256xi32>
    %184 = arith.select %183, %175, %140 : vector<8x256xi1>, vector<8x256xf32>
    %cst_28 = arith.constant 0.000000e+00 : f32
    %185 = vector.broadcast %cst_28 : f32 to vector<8x256xf32>
    %186 = arith.select %183, %184, %185 : vector<8x256xi1>, vector<8x256xf32>
    %187 = vector.extract_strided_slice %186 {offsets = [0, 0], sizes = [8, 128], strides = [1, 1]} : vector<8x256xf32> to vector<8x128xf32>
    %188 = vector.extract_strided_slice %186 {offsets = [0, 128], sizes = [8, 128], strides = [1, 1]} : vector<8x256xf32> to vector<8x128xf32>
    %189 = vector.extract_strided_slice %6 {offsets = [32, 0], sizes = [8, 768], strides = [1, 1]} : vector<64x768xf32> to vector<8x768xf32>
    %190 = vector.extract_strided_slice %6 {offsets = [24, 0], sizes = [8, 768], strides = [1, 1]} : vector<64x768xf32> to vector<8x768xf32>
    %191 = vector.extract_strided_slice %189 {offsets = [0, 0], sizes = [8, 128], strides = [1, 1]} : vector<8x768xf32> to vector<8x128xf32>
    %192 = vector.extract_strided_slice %190 {offsets = [0, 128], sizes = [8, 128], strides = [1, 1]} : vector<8x768xf32> to vector<8x128xf32>
    %193 = vector.extract_strided_slice %189 {offsets = [0, 256], sizes = [8, 128], strides = [1, 1]} : vector<8x768xf32> to vector<8x128xf32>
    %194 = vector.extract_strided_slice %190 {offsets = [0, 384], sizes = [8, 128], strides = [1, 1]} : vector<8x768xf32> to vector<8x128xf32>
    %195 = tpu.concatenate %191, %192, %193, %194 in 1 : vector<8x128xf32>, vector<8x128xf32>, vector<8x128xf32>, vector<8x128xf32> -> vector<8x512xf32>
    %196 = vector.extract_strided_slice %189 {offsets = [0, 512], sizes = [8, 128], strides = [1, 1]} : vector<8x768xf32> to vector<8x128xf32>
    %197 = vector.extract_strided_slice %190 {offsets = [0, 640], sizes = [8, 128], strides = [1, 1]} : vector<8x768xf32> to vector<8x128xf32>
    %198 = tpu.concatenate %196, %197 in 1 : vector<8x128xf32>, vector<8x128xf32> -> vector<8x256xf32>
    %199 = arith.truncf %184 : vector<8x256xf32> to vector<8x256xbf16>
    %cst_29 = arith.constant dense<0.000000e+00> : vector<8x768xf32>
    %200 = tpu.matmul %199, %7, %cst_29 {dimension_numbers = #tpu.dot_dimension_numbers<[1], [0], [0], [1], [0, 0, 1, 1], [], []>} : vector<8x256xbf16>, vector<256x768xbf16>, vector<8x768xf32> -> vector<8x768xf32>
    %201 = vector.extract_strided_slice %200 {offsets = [0, 0], sizes = [8, 512], strides = [1, 1]} : vector<8x768xf32> to vector<8x512xf32>
    %202 = arith.addf %195, %201 : vector<8x512xf32>
    %203 = arith.negf %202 : vector<8x512xf32>
    %204 = math.exp %203 : vector<8x512xf32>
    %cst_30 = arith.constant 1.000000e+00 : f32
    %205 = vector.broadcast %cst_30 : f32 to vector<8x512xf32>
    %206 = arith.addf %205, %204 : vector<8x512xf32>
    %207 = arith.divf %205, %206 : vector<8x512xf32>
    %208 = vector.extract_strided_slice %207 {offsets = [0, 0], sizes = [8, 256], strides = [1, 1]} : vector<8x512xf32> to vector<8x256xf32>
    %209 = vector.extract_strided_slice %207 {offsets = [0, 256], sizes = [8, 256], strides = [1, 1]} : vector<8x512xf32> to vector<8x256xf32>
    %210 = vector.extract_strided_slice %200 {offsets = [0, 512], sizes = [8, 256], strides = [1, 1]} : vector<8x768xf32> to vector<8x256xf32>
    %211 = arith.addf %210, %10 : vector<8x256xf32>
    %212 = arith.mulf %208, %211 : vector<8x256xf32>
    %213 = arith.addf %198, %212 : vector<8x256xf32>
    %214 = math.tanh %213 : vector<8x256xf32>
    %cst_31 = arith.constant 1.000000e+00 : f32
    %215 = vector.broadcast %cst_31 : f32 to vector<8x256xf32>
    %216 = arith.subf %215, %209 : vector<8x256xf32>
    %217 = arith.mulf %216, %214 : vector<8x256xf32>
    %218 = arith.mulf %209, %184 : vector<8x256xf32>
    %219 = arith.addf %217, %218 : vector<8x256xf32>
    %c128_i32_32 = arith.constant 128 : i32
    %220 = vector.broadcast %c128_i32_32 : i32 to vector<1x256xi32>
    %221 = arith.cmpi slt, %11, %220 : vector<1x256xi32>
    %c4_i32_33 = arith.constant 4 : i32
    %c3_i32_34 = arith.constant 3 : i32
    %222 = vector.broadcast %c4_i32_33 : i32 to vector<1x256xi32>
    %223 = vector.broadcast %c3_i32_34 : i32 to vector<1x256xi32>
    %224 = arith.select %221, %222, %223 : vector<1x256xi1>, vector<1x256xi32>
    %225 = vector.broadcast %224 : vector<1x256xi32> to vector<8x256xi32>
    %226 = vector.broadcast %0 : vector<8x1xi32> to vector<8x256xi32>
    %227 = arith.cmpi slt, %225, %226 : vector<8x256xi32>
    %228 = arith.select %227, %219, %184 : vector<8x256xi1>, vector<8x256xf32>
    %cst_35 = arith.constant 0.000000e+00 : f32
    %229 = vector.broadcast %cst_35 : f32 to vector<8x256xf32>
    %230 = arith.select %227, %228, %229 : vector<8x256xi1>, vector<8x256xf32>
    %231 = vector.extract_strided_slice %230 {offsets = [0, 0], sizes = [8, 128], strides = [1, 1]} : vector<8x256xf32> to vector<8x128xf32>
    %232 = vector.extract_strided_slice %230 {offsets = [0, 128], sizes = [8, 128], strides = [1, 1]} : vector<8x256xf32> to vector<8x128xf32>
    %233 = vector.extract_strided_slice %6 {offsets = [40, 0], sizes = [8, 768], strides = [1, 1]} : vector<64x768xf32> to vector<8x768xf32>
    %234 = vector.extract_strided_slice %6 {offsets = [16, 0], sizes = [8, 768], strides = [1, 1]} : vector<64x768xf32> to vector<8x768xf32>
    %235 = vector.extract_strided_slice %233 {offsets = [0, 0], sizes = [8, 128], strides = [1, 1]} : vector<8x768xf32> to vector<8x128xf32>
    %236 = vector.extract_strided_slice %234 {offsets = [0, 128], sizes = [8, 128], strides = [1, 1]} : vector<8x768xf32> to vector<8x128xf32>
    %237 = vector.extract_strided_slice %233 {offsets = [0, 256], sizes = [8, 128], strides = [1, 1]} : vector<8x768xf32> to vector<8x128xf32>
    %238 = vector.extract_strided_slice %234 {offsets = [0, 384], sizes = [8, 128], strides = [1, 1]} : vector<8x768xf32> to vector<8x128xf32>
    %239 = tpu.concatenate %235, %236, %237, %238 in 1 : vector<8x128xf32>, vector<8x128xf32>, vector<8x128xf32>, vector<8x128xf32> -> vector<8x512xf32>
    %240 = vector.extract_strided_slice %233 {offsets = [0, 512], sizes = [8, 128], strides = [1, 1]} : vector<8x768xf32> to vector<8x128xf32>
    %241 = vector.extract_strided_slice %234 {offsets = [0, 640], sizes = [8, 128], strides = [1, 1]} : vector<8x768xf32> to vector<8x128xf32>
    %242 = tpu.concatenate %240, %241 in 1 : vector<8x128xf32>, vector<8x128xf32> -> vector<8x256xf32>
    %243 = arith.truncf %228 : vector<8x256xf32> to vector<8x256xbf16>
    %cst_36 = arith.constant dense<0.000000e+00> : vector<8x768xf32>
    %244 = tpu.matmul %243, %7, %cst_36 {dimension_numbers = #tpu.dot_dimension_numbers<[1], [0], [0], [1], [0, 0, 1, 1], [], []>} : vector<8x256xbf16>, vector<256x768xbf16>, vector<8x768xf32> -> vector<8x768xf32>
    %245 = vector.extract_strided_slice %244 {offsets = [0, 0], sizes = [8, 512], strides = [1, 1]} : vector<8x768xf32> to vector<8x512xf32>
    %246 = arith.addf %239, %245 : vector<8x512xf32>
    %247 = arith.negf %246 : vector<8x512xf32>
    %248 = math.exp %247 : vector<8x512xf32>
    %cst_37 = arith.constant 1.000000e+00 : f32
    %249 = vector.broadcast %cst_37 : f32 to vector<8x512xf32>
    %250 = arith.addf %249, %248 : vector<8x512xf32>
    %251 = arith.divf %249, %250 : vector<8x512xf32>
    %252 = vector.extract_strided_slice %251 {offsets = [0, 0], sizes = [8, 256], strides = [1, 1]} : vector<8x512xf32> to vector<8x256xf32>
    %253 = vector.extract_strided_slice %251 {offsets = [0, 256], sizes = [8, 256], strides = [1, 1]} : vector<8x512xf32> to vector<8x256xf32>
    %254 = vector.extract_strided_slice %244 {offsets = [0, 512], sizes = [8, 256], strides = [1, 1]} : vector<8x768xf32> to vector<8x256xf32>
    %255 = arith.addf %254, %10 : vector<8x256xf32>
    %256 = arith.mulf %252, %255 : vector<8x256xf32>
    %257 = arith.addf %242, %256 : vector<8x256xf32>
    %258 = math.tanh %257 : vector<8x256xf32>
    %cst_38 = arith.constant 1.000000e+00 : f32
    %259 = vector.broadcast %cst_38 : f32 to vector<8x256xf32>
    %260 = arith.subf %259, %253 : vector<8x256xf32>
    %261 = arith.mulf %260, %258 : vector<8x256xf32>
    %262 = arith.mulf %253, %228 : vector<8x256xf32>
    %263 = arith.addf %261, %262 : vector<8x256xf32>
    %c128_i32_39 = arith.constant 128 : i32
    %264 = vector.broadcast %c128_i32_39 : i32 to vector<1x256xi32>
    %265 = arith.cmpi slt, %11, %264 : vector<1x256xi32>
    %c5_i32_40 = arith.constant 5 : i32
    %c2_i32_41 = arith.constant 2 : i32
    %266 = vector.broadcast %c5_i32_40 : i32 to vector<1x256xi32>
    %267 = vector.broadcast %c2_i32_41 : i32 to vector<1x256xi32>
    %268 = arith.select %265, %266, %267 : vector<1x256xi1>, vector<1x256xi32>
    %269 = vector.broadcast %268 : vector<1x256xi32> to vector<8x256xi32>
    %270 = vector.broadcast %0 : vector<8x1xi32> to vector<8x256xi32>
    %271 = arith.cmpi slt, %269, %270 : vector<8x256xi32>
    %272 = arith.select %271, %263, %228 : vector<8x256xi1>, vector<8x256xf32>
    %cst_42 = arith.constant 0.000000e+00 : f32
    %273 = vector.broadcast %cst_42 : f32 to vector<8x256xf32>
    %274 = arith.select %271, %272, %273 : vector<8x256xi1>, vector<8x256xf32>
    %275 = vector.extract_strided_slice %274 {offsets = [0, 0], sizes = [8, 128], strides = [1, 1]} : vector<8x256xf32> to vector<8x128xf32>
    %276 = vector.extract_strided_slice %274 {offsets = [0, 128], sizes = [8, 128], strides = [1, 1]} : vector<8x256xf32> to vector<8x128xf32>
    %277 = vector.extract_strided_slice %6 {offsets = [48, 0], sizes = [8, 768], strides = [1, 1]} : vector<64x768xf32> to vector<8x768xf32>
    %278 = vector.extract_strided_slice %6 {offsets = [8, 0], sizes = [8, 768], strides = [1, 1]} : vector<64x768xf32> to vector<8x768xf32>
    %279 = vector.extract_strided_slice %277 {offsets = [0, 0], sizes = [8, 128], strides = [1, 1]} : vector<8x768xf32> to vector<8x128xf32>
    %280 = vector.extract_strided_slice %278 {offsets = [0, 128], sizes = [8, 128], strides = [1, 1]} : vector<8x768xf32> to vector<8x128xf32>
    %281 = vector.extract_strided_slice %277 {offsets = [0, 256], sizes = [8, 128], strides = [1, 1]} : vector<8x768xf32> to vector<8x128xf32>
    %282 = vector.extract_strided_slice %278 {offsets = [0, 384], sizes = [8, 128], strides = [1, 1]} : vector<8x768xf32> to vector<8x128xf32>
    %283 = tpu.concatenate %279, %280, %281, %282 in 1 : vector<8x128xf32>, vector<8x128xf32>, vector<8x128xf32>, vector<8x128xf32> -> vector<8x512xf32>
    %284 = vector.extract_strided_slice %277 {offsets = [0, 512], sizes = [8, 128], strides = [1, 1]} : vector<8x768xf32> to vector<8x128xf32>
    %285 = vector.extract_strided_slice %278 {offsets = [0, 640], sizes = [8, 128], strides = [1, 1]} : vector<8x768xf32> to vector<8x128xf32>
    %286 = tpu.concatenate %284, %285 in 1 : vector<8x128xf32>, vector<8x128xf32> -> vector<8x256xf32>
    %287 = arith.truncf %272 : vector<8x256xf32> to vector<8x256xbf16>
    %cst_43 = arith.constant dense<0.000000e+00> : vector<8x768xf32>
    %288 = tpu.matmul %287, %7, %cst_43 {dimension_numbers = #tpu.dot_dimension_numbers<[1], [0], [0], [1], [0, 0, 1, 1], [], []>} : vector<8x256xbf16>, vector<256x768xbf16>, vector<8x768xf32> -> vector<8x768xf32>
    %289 = vector.extract_strided_slice %288 {offsets = [0, 0], sizes = [8, 512], strides = [1, 1]} : vector<8x768xf32> to vector<8x512xf32>
    %290 = arith.addf %283, %289 : vector<8x512xf32>
    %291 = arith.negf %290 : vector<8x512xf32>
    %292 = math.exp %291 : vector<8x512xf32>
    %cst_44 = arith.constant 1.000000e+00 : f32
    %293 = vector.broadcast %cst_44 : f32 to vector<8x512xf32>
    %294 = arith.addf %293, %292 : vector<8x512xf32>
    %295 = arith.divf %293, %294 : vector<8x512xf32>
    %296 = vector.extract_strided_slice %295 {offsets = [0, 0], sizes = [8, 256], strides = [1, 1]} : vector<8x512xf32> to vector<8x256xf32>
    %297 = vector.extract_strided_slice %295 {offsets = [0, 256], sizes = [8, 256], strides = [1, 1]} : vector<8x512xf32> to vector<8x256xf32>
    %298 = vector.extract_strided_slice %288 {offsets = [0, 512], sizes = [8, 256], strides = [1, 1]} : vector<8x768xf32> to vector<8x256xf32>
    %299 = arith.addf %298, %10 : vector<8x256xf32>
    %300 = arith.mulf %296, %299 : vector<8x256xf32>
    %301 = arith.addf %286, %300 : vector<8x256xf32>
    %302 = math.tanh %301 : vector<8x256xf32>
    %cst_45 = arith.constant 1.000000e+00 : f32
    %303 = vector.broadcast %cst_45 : f32 to vector<8x256xf32>
    %304 = arith.subf %303, %297 : vector<8x256xf32>
    %305 = arith.mulf %304, %302 : vector<8x256xf32>
    %306 = arith.mulf %297, %272 : vector<8x256xf32>
    %307 = arith.addf %305, %306 : vector<8x256xf32>
    %c128_i32_46 = arith.constant 128 : i32
    %308 = vector.broadcast %c128_i32_46 : i32 to vector<1x256xi32>
    %309 = arith.cmpi slt, %11, %308 : vector<1x256xi32>
    %c6_i32_47 = arith.constant 6 : i32
    %c1_i32_48 = arith.constant 1 : i32
    %310 = vector.broadcast %c6_i32_47 : i32 to vector<1x256xi32>
    %311 = vector.broadcast %c1_i32_48 : i32 to vector<1x256xi32>
    %312 = arith.select %309, %310, %311 : vector<1x256xi1>, vector<1x256xi32>
    %313 = vector.broadcast %312 : vector<1x256xi32> to vector<8x256xi32>
    %314 = vector.broadcast %0 : vector<8x1xi32> to vector<8x256xi32>
    %315 = arith.cmpi slt, %313, %314 : vector<8x256xi32>
    %316 = arith.select %315, %307, %272 : vector<8x256xi1>, vector<8x256xf32>
    %cst_49 = arith.constant 0.000000e+00 : f32
    %317 = vector.broadcast %cst_49 : f32 to vector<8x256xf32>
    %318 = arith.select %315, %316, %317 : vector<8x256xi1>, vector<8x256xf32>
    %319 = vector.extract_strided_slice %318 {offsets = [0, 0], sizes = [8, 128], strides = [1, 1]} : vector<8x256xf32> to vector<8x128xf32>
    %320 = vector.extract_strided_slice %318 {offsets = [0, 128], sizes = [8, 128], strides = [1, 1]} : vector<8x256xf32> to vector<8x128xf32>
    %321 = vector.extract_strided_slice %6 {offsets = [56, 0], sizes = [8, 768], strides = [1, 1]} : vector<64x768xf32> to vector<8x768xf32>
    %322 = vector.extract_strided_slice %6 {offsets = [0, 0], sizes = [8, 768], strides = [1, 1]} : vector<64x768xf32> to vector<8x768xf32>
    %323 = vector.extract_strided_slice %321 {offsets = [0, 0], sizes = [8, 128], strides = [1, 1]} : vector<8x768xf32> to vector<8x128xf32>
    %324 = vector.extract_strided_slice %322 {offsets = [0, 128], sizes = [8, 128], strides = [1, 1]} : vector<8x768xf32> to vector<8x128xf32>
    %325 = vector.extract_strided_slice %321 {offsets = [0, 256], sizes = [8, 128], strides = [1, 1]} : vector<8x768xf32> to vector<8x128xf32>
    %326 = vector.extract_strided_slice %322 {offsets = [0, 384], sizes = [8, 128], strides = [1, 1]} : vector<8x768xf32> to vector<8x128xf32>
    %327 = tpu.concatenate %323, %324, %325, %326 in 1 : vector<8x128xf32>, vector<8x128xf32>, vector<8x128xf32>, vector<8x128xf32> -> vector<8x512xf32>
    %328 = vector.extract_strided_slice %321 {offsets = [0, 512], sizes = [8, 128], strides = [1, 1]} : vector<8x768xf32> to vector<8x128xf32>
    %329 = vector.extract_strided_slice %322 {offsets = [0, 640], sizes = [8, 128], strides = [1, 1]} : vector<8x768xf32> to vector<8x128xf32>
    %330 = tpu.concatenate %328, %329 in 1 : vector<8x128xf32>, vector<8x128xf32> -> vector<8x256xf32>
    %331 = arith.truncf %316 : vector<8x256xf32> to vector<8x256xbf16>
    %cst_50 = arith.constant dense<0.000000e+00> : vector<8x768xf32>
    %332 = tpu.matmul %331, %7, %cst_50 {dimension_numbers = #tpu.dot_dimension_numbers<[1], [0], [0], [1], [0, 0, 1, 1], [], []>} : vector<8x256xbf16>, vector<256x768xbf16>, vector<8x768xf32> -> vector<8x768xf32>
    %333 = vector.extract_strided_slice %332 {offsets = [0, 0], sizes = [8, 512], strides = [1, 1]} : vector<8x768xf32> to vector<8x512xf32>
    %334 = arith.addf %327, %333 : vector<8x512xf32>
    %335 = arith.negf %334 : vector<8x512xf32>
    %336 = math.exp %335 : vector<8x512xf32>
    %cst_51 = arith.constant 1.000000e+00 : f32
    %337 = vector.broadcast %cst_51 : f32 to vector<8x512xf32>
    %338 = arith.addf %337, %336 : vector<8x512xf32>
    %339 = arith.divf %337, %338 : vector<8x512xf32>
    %340 = vector.extract_strided_slice %339 {offsets = [0, 0], sizes = [8, 256], strides = [1, 1]} : vector<8x512xf32> to vector<8x256xf32>
    %341 = vector.extract_strided_slice %339 {offsets = [0, 256], sizes = [8, 256], strides = [1, 1]} : vector<8x512xf32> to vector<8x256xf32>
    %342 = vector.extract_strided_slice %332 {offsets = [0, 512], sizes = [8, 256], strides = [1, 1]} : vector<8x768xf32> to vector<8x256xf32>
    %343 = arith.addf %342, %10 : vector<8x256xf32>
    %344 = arith.mulf %340, %343 : vector<8x256xf32>
    %345 = arith.addf %330, %344 : vector<8x256xf32>
    %346 = math.tanh %345 : vector<8x256xf32>
    %cst_52 = arith.constant 1.000000e+00 : f32
    %347 = vector.broadcast %cst_52 : f32 to vector<8x256xf32>
    %348 = arith.subf %347, %341 : vector<8x256xf32>
    %349 = arith.mulf %348, %346 : vector<8x256xf32>
    %350 = arith.mulf %341, %316 : vector<8x256xf32>
    %351 = arith.addf %349, %350 : vector<8x256xf32>
    %c128_i32_53 = arith.constant 128 : i32
    %352 = vector.broadcast %c128_i32_53 : i32 to vector<1x256xi32>
    %353 = arith.cmpi slt, %11, %352 : vector<1x256xi32>
    %c7_i32_54 = arith.constant 7 : i32
    %c0_i32_55 = arith.constant 0 : i32
    %354 = vector.broadcast %c7_i32_54 : i32 to vector<1x256xi32>
    %355 = vector.broadcast %c0_i32_55 : i32 to vector<1x256xi32>
    %356 = arith.select %353, %354, %355 : vector<1x256xi1>, vector<1x256xi32>
    %357 = vector.broadcast %356 : vector<1x256xi32> to vector<8x256xi32>
    %358 = vector.broadcast %0 : vector<8x1xi32> to vector<8x256xi32>
    %359 = arith.cmpi slt, %357, %358 : vector<8x256xi32>
    %360 = arith.select %359, %351, %316 : vector<8x256xi1>, vector<8x256xf32>
    %cst_56 = arith.constant 0.000000e+00 : f32
    %361 = vector.broadcast %cst_56 : f32 to vector<8x256xf32>
    %362 = arith.select %359, %360, %361 : vector<8x256xi1>, vector<8x256xf32>
    %363 = vector.extract_strided_slice %362 {offsets = [0, 0], sizes = [8, 128], strides = [1, 1]} : vector<8x256xf32> to vector<8x128xf32>
    %364 = vector.extract_strided_slice %362 {offsets = [0, 128], sizes = [8, 128], strides = [1, 1]} : vector<8x256xf32> to vector<8x128xf32>
    %365 = arith.addf %55, %364 : vector<8x128xf32>
    %366 = arith.addf %99, %320 : vector<8x128xf32>
    %367 = arith.addf %143, %276 : vector<8x128xf32>
    %368 = arith.addf %187, %232 : vector<8x128xf32>
    %369 = arith.addf %231, %188 : vector<8x128xf32>
    %370 = arith.addf %275, %144 : vector<8x128xf32>
    %371 = arith.addf %319, %100 : vector<8x128xf32>
    %372 = arith.addf %363, %56 : vector<8x128xf32>
    %373 = vector.shape_cast %365 : vector<8x128xf32> to vector<1x8x128xf32>
    %374 = vector.shape_cast %366 : vector<8x128xf32> to vector<1x8x128xf32>
    %375 = vector.shape_cast %367 : vector<8x128xf32> to vector<1x8x128xf32>
    %376 = vector.shape_cast %368 : vector<8x128xf32> to vector<1x8x128xf32>
    %377 = vector.shape_cast %369 : vector<8x128xf32> to vector<1x8x128xf32>
    %378 = vector.shape_cast %370 : vector<8x128xf32> to vector<1x8x128xf32>
    %379 = vector.shape_cast %371 : vector<8x128xf32> to vector<1x8x128xf32>
    %380 = vector.shape_cast %372 : vector<8x128xf32> to vector<1x8x128xf32>
    %381 = tpu.concatenate %373, %374, %375, %376, %377, %378, %379, %380 in 0 : vector<1x8x128xf32>, vector<1x8x128xf32>, vector<1x8x128xf32>, vector<1x8x128xf32>, vector<1x8x128xf32>, vector<1x8x128xf32>, vector<1x8x128xf32>, vector<1x8x128xf32> -> vector<8x8x128xf32>
    %c0_57 = arith.constant 0 : index
    %c0_58 = arith.constant 0 : index
    %c0_59 = arith.constant 0 : index
    %382 = vector.load %arg5[%c0_57, %c0_58, %c0_59] : memref<8x8x128xf32, #tpu.memory_space<vmem>>, vector<8x8x128xf32>
    tpu.vector_store %arg5[%c0_57, %c0_58, %c0_59], %381 {strides = array<i32>} : memref<8x8x128xf32, #tpu.memory_space<vmem>>, vector<8x8x128xf32>,
    %383 = vector.extract_strided_slice %360 {offsets = [0, 0], sizes = [8, 128], strides = [1, 1]} : vector<8x256xf32> to vector<8x128xf32>
    %384 = vector.extract_strided_slice %360 {offsets = [0, 128], sizes = [8, 128], strides = [1, 1]} : vector<8x256xf32> to vector<8x128xf32>
    %385 = vector.shape_cast %383 : vector<8x128xf32> to vector<1x8x128xf32>
    %386 = vector.shape_cast %384 : vector<8x128xf32> to vector<1x8x128xf32>
    %387 = tpu.concatenate %385, %386 in 0 : vector<1x8x128xf32>, vector<1x8x128xf32> -> vector<2x8x128xf32>
    %c0_60 = arith.constant 0 : index
    %c0_61 = arith.constant 0 : index
    %c0_62 = arith.constant 0 : index
    %388 = vector.load %arg6[%c0_60, %c0_61, %c0_62] : memref<2x8x128xf32, #tpu.memory_space<vmem>>, vector<2x8x128xf32>
    tpu.vector_store %arg6[%c0_60, %c0_61, %c0_62], %387 {strides = array<i32>} : memref<2x8x128xf32, #tpu.memory_space<vmem>>, vector<2x8x128xf32>,
    return
  }
}

</mosaic_0001>

<bundles_post_ra>
// kernel: tpu_custom_call.1
= control target key start
LH: loop header
LB: loop body
LE: loop exit
PB: predicated region body
PF: predicated region fallthrough
CT: control target
= control target key end

     0   :  { %12 = vsyncpa [#allocation3], 0  ;;  %s5971_s0 = inlined_call_operand.hbm [shape: bf16[64,128], index: 0, kind: input, shape index: {}]   ;;  %s5972_s1 = inlined_call_operand.hbm [shape: f32[8,256], index: 1, kind: input, shape index: {}]   ;;  %s5973_s2 = inlined_call_operand.vmem [shape: s32[8,1], index: 2, kind: input, shape index: {}]   ;;  %s5974_s3 = inlined_call_operand.hbm [shape: bf16[384,768], index: 3, kind: input, shape index: {}]   ;;  %s5975_s4 = inlined_call_operand.hbm [shape: f32[2,768], index: 4, kind: input, shape index: {}]   ;;  %s5976_s5 = inlined_call_operand.hbm [shape: f32[8,8,128], index: 5, kind: output, shape index: {0}]   ;;  %s5977_s6 = inlined_call_operand.hbm [shape: f32[2,8,128], index: 6, kind: output, shape index: {1}]  }
   0x1   :  { %13 = vsyncpa [#allocation6], 0 }
   0x2   :  { %14 = vsyncpa [#allocation9], 0 }
   0x3   :  { %15 = vsyncpa [#allocation4], 0  ;;  %s35_s23 = sshll.u32 %s5972_s1, 4  ;;  %s36_s23 = int_to_ptr.hbm [resolvable:$true] %s35_s23 }
   0x4   :  { %16 = vsyncpa [#allocation12], 0  ;;  %s4456_s24 = smov [#allocation5]   ;;  %s21_s28 = sshll.u32 %s5971_s0, 4  ;;  %s22_s28 = int_to_ptr.hbm [resolvable:$true] %s21_s28 }
   0x5   :  { %s37_s25 = sshll.u32 %s4456_s24, 4  ;;  %s4457_s29 = smov [#allocation2]   ;;  %s38_s25 = int_to_ptr.vmem [resolvable:$true] %s37_s25 }
   0x6   :  { %40 = dma.hbm_to_vmem [thread:$0]  %s36_s23, 256, %s38_s25, [#allocation6]  }
   0x7   :  { %s23_s30 = sshll.u32 %s4457_s29, 4  ;;  %s4458_s7 = smov 64   ;;  %s24_s30 = int_to_ptr.vmem [resolvable:$true] %s23_s30 }
   0x8   :  { %s4459_s8 = smov 4   ;;  %s47_s1 = sshll.u32 %s5974_s3, 4  ;;  %s48_s1 = int_to_ptr.hbm [resolvable:$true] %s47_s1 }
   0x9   :  { %29 = dma.hbm_to_vmem [thread:$0]  %s22_s28, 512, %s24_s30, [#allocation3], %s4458_s7, %s4458_s7, %s4459_s8  }
   0xa   :  { %s4460_s11 = smov [#allocation7]   ;;  %s61_s0 = sshll.u32 %s5975_s4, 4  ;;  %s62_s0 = int_to_ptr.hbm [resolvable:$true] %s61_s0 }
   0xb   :  { %s49_s12 = sshll.u32 %s4460_s11, 4  ;;  %s4461_s15 = smov 384   ;;  %s50_s12 = int_to_ptr.vmem [resolvable:$true] %s49_s12 }
   0xc   :  { %s4462_s16 = smov 24   ;;  %s4463_s17 = smov [#allocation8]  }
   0xd   :  { %55 = dma.hbm_to_vmem [thread:$0]  %s48_s1, 18432, %s50_s12, [#allocation6], %s4461_s15, %s4461_s15, %s4462_s16  }
   0xe   :  { %s63_s18 = sshll.u32 %s4463_s17, 4  ;;  %s64_s18 = int_to_ptr.vmem [resolvable:$true] %s63_s18 }
   0xf   :  { %66 = dma.hbm_to_vmem [thread:$0]  %s62_s0, 192, %s64_s18, [#allocation9]  }
  0x10   :  { %4446 = dma.done.wait [#allocation3], 512  }
  0x11   :  { %4447 = vsyncadd [#allocation3], 4294966784 }
  0x12   :  { %4448 = dma.done.wait [#allocation6], 18688  }
  0x13   :  { %4449 = vsyncadd [#allocation6], 4294948608 }
  0x14   :  { %4450 = dma.done.wait [#allocation9], 192  }
  0x15   :  { %4451 = vsyncadd [#allocation9], 4294967104  ;;  %v3524_v0 = vld [vmem:[#allocation7 + $0x150] sm:$0xf]  ;;  %v4027_v1 = vld [vmem:[#allocation7 + $0x164] sm:$0xf0] }
  0x16   :  { %v4024_v2 = vld [vmem:[#allocation7 + $0x154] sm:$0xf]  ;;  %v3525_v3 = vor.u32 %v4027_v1, %v3524_v0  ;;  %v3526_v4 = vld [vmem:[#allocation7 + $0x168] sm:$0xf0]  ;;  %v3532_v5 = vld [vmem:[#allocation7 + $0x158] sm:$0xf] }
  0x17   :  { %v4028_v6 = vld [vmem:[#allocation7 + $0x16c] sm:$0xf0]  ;;  %v3529_v7 = vor.u32 %v4024_v2, %v3526_v4  ;;  %v4025_v9 = vld [vmem:[#allocation7 + $0x15c] sm:$0xf]  ;;  %v3534_v10 = vld [vmem:[#allocation7 + $0x170] sm:$0xf0] }
  0x18   :  { %v3533_v8 = vor.u32 %v4028_v6, %v3532_v5  ;;  %v3500_v11 = vld [vmem:[#allocation7 + $0x120] sm:$0xf]  ;;  %418 = vmatpush.bf16.msra.mxu0 %v3525_v3  ;;  %v3537_v12 = vor.u32 %v4025_v9, %v3534_v10  ;;  %v4021_v13 = vld [vmem:[#allocation7 + $0x134] sm:$0xf0]  ;;  %v4018_v14 = vld [vmem:[#allocation7 + $0x124] sm:$0xf] }
  0x19   :  { %v3502_v15 = vld [vmem:[#allocation7 + $0x138] sm:$0xf0]  ;;  %447 = vmatpush.bf16.msra.mxu1 %v3529_v7  ;;  %v3501_v16 = vor.u32 %v4021_v13, %v3500_v11  ;;  %v3508_v18 = vld [vmem:[#allocation7 + $0x128] sm:$0xf]  ;;  %v4022_v19 = vld [vmem:[#allocation7 + $0x13c] sm:$0xf0] }
  0x1a   :  { %476 = vmatpush.bf16.msra.mxu2 %v3533_v8  ;;  %v3505_v17 = vor.u32 %v4018_v14, %v3502_v15  ;;  %v4019_v20 = vld [vmem:[#allocation7 + $0x12c] sm:$0xf]  ;;  %505 = vmatpush.bf16.msra.mxu3 %v3537_v12  ;;  %v3509_v21 = vor.u32 %v4022_v19, %v3508_v18  ;;  %v3510_v22 = vld [vmem:[#allocation7 + $0x140] sm:$0xf0]  ;;  %v3476_v23 = vld [vmem:[#allocation7 + $0xf0] sm:$0xf] }
  0x1b   :  { %v4015_v24 = vld [vmem:[#allocation7 + $0x104] sm:$0xf0]  ;;  %v3513_v25 = vor.u32 %v4019_v20, %v3510_v22  ;;  %v4012_v26 = vld [vmem:[#allocation7 + $0xf4] sm:$0xf]  ;;  %v3478_v27 = vld [vmem:[#allocation7 + $0x108] sm:$0xf0] }
  0x1c   :  { %v3484_v28 = vld [vmem:[#allocation7 + $0xf8] sm:$0xf]  ;;  %419 = vmatpush.bf16.msra.mxu0 %v3501_v16  ;;  %v3477_v29 = vor.u32 %v4015_v24, %v3476_v23  ;;  %v4016_v30 = vld [vmem:[#allocation7 + $0x10c] sm:$0xf0]  ;;  %v4013_v31 = vld [vmem:[#allocation7 + $0xfc] sm:$0xf]  ;;  %v3481_v33 = vor.u32 %v4012_v26, %v3478_v27 }
  0x1d   :  { %v3486_v32 = vld [vmem:[#allocation7 + $0x110] sm:$0xf0]  ;;  %448 = vmatpush.bf16.msra.mxu1 %v3505_v17  ;;  %v3485_v34 = vor.u32 %v4016_v30, %v3484_v28  ;;  %v3452_v35 = vld [vmem:[#allocation7 + $0xc0] sm:$0xf]  ;;  %v4009_v36 = vld [vmem:[#allocation7 + $0xd4] sm:$0xf0] }
  0x1e   :  { %477 = vmatpush.bf16.msra.mxu2 %v3509_v21  ;;  %v4006_v37 = vld [vmem:[#allocation7 + $0xc4] sm:$0xf]  ;;  %506 = vmatpush.bf16.msra.mxu3 %v3513_v25  ;;  %v3489_v38 = vor.u32 %v4013_v31, %v3486_v32  ;;  %v3454_v39 = vld [vmem:[#allocation7 + $0xd8] sm:$0xf0]  ;;  %v3460_v40 = vld [vmem:[#allocation7 + $0xc8] sm:$0xf]  ;;  %v3453_v44 = vor.u32 %v4009_v36, %v3452_v35 }
  0x1f   :  { %v4010_v41 = vld [vmem:[#allocation7 + $0xdc] sm:$0xf0]  ;;  %v4007_v42 = vld [vmem:[#allocation7 + $0xcc] sm:$0xf]  ;;  %v3462_v43 = vld [vmem:[#allocation7 + $0xe0] sm:$0xf0]  ;;  %v3457_v45 = vor.u32 %v4006_v37, %v3454_v39 }
  0x20   :  { %420 = vmatpush.bf16.msra.mxu0 %v3477_v29  ;;  %v3461_v46 = vor.u32 %v4010_v41, %v3460_v40  ;;  %v3428_v47 = vld [vmem:[#allocation7 + $0x90] sm:$0xf]  ;;  %v4003_v48 = vld [vmem:[#allocation7 + $0xa4] sm:$0xf0]  ;;  %v4000_v49 = vld [vmem:[#allocation7 + $0x94] sm:$0xf]  ;;  %v3465_v50 = vor.u32 %v4007_v42, %v3462_v43 }
  0x21   :  { %449 = vmatpush.bf16.msra.mxu1 %v3481_v33  ;;  %v3430_v51 = vld [vmem:[#allocation7 + $0xa8] sm:$0xf0]  ;;  %v3436_v52 = vld [vmem:[#allocation7 + $0x98] sm:$0xf]  ;;  %v4004_v53 = vld [vmem:[#allocation7 + $0xac] sm:$0xf0]  ;;  %v3429_v56 = vor.u32 %v4003_v48, %v3428_v47 }
  0x22   :  { %478 = vmatpush.bf16.msra.mxu2 %v3485_v34  ;;  %507 = vmatpush.bf16.msra.mxu3 %v3489_v38  ;;  %v4001_v54 = vld [vmem:[#allocation7 + $0x9c] sm:$0xf]  ;;  %v3438_v55 = vld [vmem:[#allocation7 + $0xb0] sm:$0xf0]  ;;  %v3433_v57 = vor.u32 %v4000_v49, %v3430_v51  ;;  %v3437_v58 = vor.u32 %v4004_v53, %v3436_v52  ;;  %v3404_v59 = vld [vmem:[#allocation7 + $0x60] sm:$0xf] }
  0x23   :  { %v3997_v60 = vld [vmem:[#allocation7 + $0x74] sm:$0xf0]  ;;  %v3994_v61 = vld [vmem:[#allocation7 + $0x64] sm:$0xf]  ;;  %v3441_v62 = vor.u32 %v4001_v54, %v3438_v55  ;;  %v3406_v63 = vld [vmem:[#allocation7 + $0x78] sm:$0xf0] }
  0x24   :  { %421 = vmatpush.bf16.msra.mxu0 %v3453_v44  ;;  %v3412_v0 = vld [vmem:[#allocation7 + $0x68] sm:$0xf]  ;;  %v3998_v1 = vld [vmem:[#allocation7 + $0x7c] sm:$0xf0]  ;;  %v3995_v2 = vld [vmem:[#allocation7 + $0x6c] sm:$0xf]  ;;  %v3405_v4 = vor.u32 %v3997_v60, %v3404_v59  ;;  %v3409_v5 = vor.u32 %v3994_v61, %v3406_v63 }
  0x25   :  { %450 = vmatpush.bf16.msra.mxu1 %v3457_v45  ;;  %v3414_v3 = vld [vmem:[#allocation7 + $0x80] sm:$0xf0]  ;;  %v3413_v6 = vor.u32 %v3998_v1, %v3412_v0  ;;  %v3380_v7 = vld [vmem:[#allocation7 + $0x30] sm:$0xf]  ;;  %v3991_v8 = vld [vmem:[#allocation7 + $0x44] sm:$0xf0] }
  0x26   :  { %479 = vmatpush.bf16.msra.mxu2 %v3461_v46  ;;  %508 = vmatpush.bf16.msra.mxu3 %v3465_v50  ;;  %v3988_v9 = vld [vmem:[#allocation7 + $0x34] sm:$0xf]  ;;  %v3417_v10 = vor.u32 %v3995_v2, %v3414_v3  ;;  %v3382_v11 = vld [vmem:[#allocation7 + $0x48] sm:$0xf0]  ;;  %v3388_v12 = vld [vmem:[#allocation7 + $0x38] sm:$0xf]  ;;  %v3381_v16 = vor.u32 %v3991_v8, %v3380_v7 }
  0x27   :  { %v3992_v13 = vld [vmem:[#allocation7 + $0x4c] sm:$0xf0]  ;;  %v3989_v14 = vld [vmem:[#allocation7 + $0x3c] sm:$0xf]  ;;  %v3390_v15 = vld [vmem:[#allocation7 + $0x50] sm:$0xf0]  ;;  %v3385_v18 = vor.u32 %v3988_v9, %v3382_v11 }
  0x28   :  { %422 = vmatpush.bf16.msra.mxu0 %v3429_v56  ;;  %v3356_v17 = vld [vmem:[#allocation7] sm:$0xf]  ;;  %v3389_v19 = vor.u32 %v3992_v13, %v3388_v12  ;;  %v3985_v20 = vld [vmem:[#allocation7 + $0x14] sm:$0xf0]  ;;  %v3982_v21 = vld [vmem:[#allocation7 + $0x4] sm:$0xf]  ;;  %v3393_v23 = vor.u32 %v3989_v14, %v3390_v15 }
  0x29   :  { %451 = vmatpush.bf16.msra.mxu1 %v3433_v57  ;;  %v3358_v22 = vld [vmem:[#allocation7 + $0x18] sm:$0xf0]  ;;  %v3364_v24 = vld [vmem:[#allocation7 + $0x8] sm:$0xf]  ;;  %v3986_v25 = vld [vmem:[#allocation7 + $0x1c] sm:$0xf0]  ;;  %v3357_v30 = vor.u32 %v3985_v20, %v3356_v17 }
  0x2a   :  { %480 = vmatpush.bf16.msra.mxu2 %v3437_v58  ;;  %509 = vmatpush.bf16.msra.mxu3 %v3441_v62  ;;  %v3983_v26 = vld [vmem:[#allocation7 + $0xc] sm:$0xf]  ;;  %v3366_v27 = vld [vmem:[#allocation7 + $0x20] sm:$0xf0]  ;;  %v3540_v28 = vld [vmem:[#allocation7 + $0x160] sm:$0xf]  ;;  %v3361_v33 = vor.u32 %v3982_v21, %v3358_v22  ;;  %v3365_v34 = vor.u32 %v3986_v25, %v3364_v24 }
  0x2b   :  { %v4029_v29 = vld [vmem:[#allocation7 + $0x174] sm:$0xf0]  ;;  %v4026_v31 = vld [vmem:[#allocation7 + $0x164] sm:$0xf]  ;;  %v3542_v32 = vld [vmem:[#allocation7 + $0x178] sm:$0xf0]  ;;  %v3369_v36 = vor.u32 %v3983_v26, %v3366_v27 }
  0x2c   :  { %423 = vmatpush.bf16.msra.mxu0 %v3405_v4  ;;  %v4516_v35 = vld [vmem:[#allocation2] sm:$0xff]  ;;  %v3541_v37 = vor.u32 %v4029_v29, %v3540_v28  ;;  %v4075_v39 = vld [vmem:[#allocation7 + $0x2e4] sm:$0xf0]  ;;  %v3545_v41 = vor.u32 %v4026_v31, %v3542_v32  ;;  %v3518_v46 = vld [vmem:[#allocation7 + $0x148] sm:$0xf0]  ;;  %s3318_s22 = sshll.u32 %s5977_s6, 4  ;;  %s3319_s22 = int_to_ptr.hbm [resolvable:$true] %s3318_s22 }
  0x2d   :  { %452 = vmatpush.bf16.msra.mxu1 %v3409_v5  ;;  %v3716_v38 = vld [vmem:[#allocation7 + $0x2d0] sm:$0xf]  ;;  %v4123_v42 = vld [vmem:[#allocation7 + $0x464] sm:$0xf0]  ;;  %v4020_v45 = vld [vmem:[#allocation7 + $0x134] sm:$0xf] }
  0x2e   :  { %481 = vmatpush.bf16.msra.mxu2 %v3413_v6  ;;  %510 = vmatpush.bf16.msra.mxu3 %v3417_v10  ;;  %v3908_v40 = vld [vmem:[#allocation7 + $0x450] sm:$0xf]  ;;  %v4023_v44 = vld [vmem:[#allocation7 + $0x144] sm:$0xf0]  ;;  %v4518_v47 = vor.u32 %v4075_v39, %v3716_v38  ;;  %v3692_v50 = vld [vmem:[#allocation7 + $0x2a0] sm:$0xf]  ;;  %v3521_v53 = vor.u32 %v4020_v45, %v3518_v46 }
  0x2f   :  { %v3516_v43 = vld [vmem:[#allocation7 + $0x130] sm:$0xf]  ;;  %v4520_v48 = vor.u32 %v4123_v42, %v3908_v40  ;;  %v4069_v51 = vld [vmem:[#allocation7 + $0x2b4] sm:$0xf0]  ;;  %v3884_v52 = vld [vmem:[#allocation7 + $0x420] sm:$0xf] }
  0x30   :  { %424 = vmatpush.bf16.msra.mxu0 %v3381_v16  ;;  %v3517_v49 = vor.u32 %v4023_v44, %v3516_v43  ;;  %v4117_v54 = vld [vmem:[#allocation7 + $0x434] sm:$0xf0]  ;;  %v3492_v55 = vld [vmem:[#allocation7 + $0x100] sm:$0xf]  ;;  %v4014_v57 = vld [vmem:[#allocation7 + $0x104] sm:$0xf]  ;;  %v4527_v59 = vor.u32 %v4069_v51, %v3692_v50 }
  0x31   :  { %453 = vmatpush.bf16.msra.mxu1 %v3385_v18  ;;  %6173 = vst [vmem:[#allocation18_spill] sm:$0xff] %v4520_v48  ;;  %v4017_v56 = vld [vmem:[#allocation7 + $0x114] sm:$0xf0]  ;;  %v3494_v58 = vld [vmem:[#allocation7 + $0x118] sm:$0xf0]  ;;  %v4530_v60 = vor.u32 %v4117_v54, %v3884_v52  ;;  %s4466_s23 = smov [#allocation10]  }
  0x32   :  { %482 = vmatpush.bf16.msra.mxu2 %v3389_v19  ;;  %511 = vmatpush.bf16.msra.mxu3 %v3393_v23  ;;  %6174 = vst [vmem:[#allocation19_spill] sm:$0xff] %v4527_v59  ;;  %v3668_v61 = vld [vmem:[#allocation7 + $0x270] sm:$0xf]  ;;  %v4063_v62 = vld [vmem:[#allocation7 + $0x284] sm:$0xf0]  ;;  %v3493_v0 = vor.u32 %v4017_v56, %v3492_v55  ;;  %v3497_v2 = vor.u32 %v4014_v57, %v3494_v58  ;;  %v4539_v19 = vld [vmem:[#allocation2 + $0x8] sm:$0xff] }
  0x33   :  { %6175 = vst [vmem:[#allocation20_spill] sm:$0xff] %v4530_v60  ;;  %v3860_v63 = vld [vmem:[#allocation7 + $0x3f0] sm:$0xf]  ;;  %v4111_v1 = vld [vmem:[#allocation7 + $0x404] sm:$0xf0]  ;;  %v4533_v7 = vor.u32 %v4063_v62, %v3668_v61  ;;  %s3303_s24 = sshll.u32 %s4466_s23, 4  ;;  %s3304_s24 = int_to_ptr.vmem [resolvable:$true] %s3303_s24 }
  0x34   :  { %425 = vmatpush.bf16.msra.mxu0 %v3357_v30  ;;  %v3468_v3 = vld [vmem:[#allocation7 + $0xd0] sm:$0xf]  ;;  %v4011_v4 = vld [vmem:[#allocation7 + $0xe4] sm:$0xf0]  ;;  %v4008_v5 = vld [vmem:[#allocation7 + $0xd4] sm:$0xf]  ;;  %v4536_v8 = vor.u32 %v4111_v1, %v3860_v63 }
  0x35   :  { %454 = vmatpush.bf16.msra.mxu1 %v3361_v33  ;;  %v3470_v6 = vld [vmem:[#allocation7 + $0xe8] sm:$0xf0]  ;;  %6176 = vst [vmem:[#allocation21_spill] sm:$0xff] %v4533_v7  ;;  %v3644_v9 = vld [vmem:[#allocation7 + $0x240] sm:$0xf]  ;;  %v3469_v12 = vor.u32 %v4011_v4, %v3468_v3  ;;  %s3305_s27 = sshll.u32 %s5976_s5, 4  ;;  %s3306_s27 = int_to_ptr.hbm [resolvable:$true] %s3305_s27 }
  0x36   :  { %483 = vmatpush.bf16.msra.mxu2 %v3365_v34  ;;  %512 = vmatpush.bf16.msra.mxu3 %v3369_v36  ;;  %6177 = vst [vmem:[#allocation22_spill] sm:$0xff] %v4536_v8  ;;  %v4057_v10 = vld [vmem:[#allocation7 + $0x254] sm:$0xf0]  ;;  %v3836_v11 = vld [vmem:[#allocation7 + $0x3c0] sm:$0xf]  ;;  %v3473_v14 = vor.u32 %v4008_v5, %v3470_v6  ;;  %s4467_s6 = smov 128  }
  0x37   :  { %426 = vmatmul.bf16.vlgmr.msra.gmra.mxu0 %v4516_v35  ;;  %v4105_v13 = vld [vmem:[#allocation7 + $0x3d4] sm:$0xf0]  ;;  %v3444_v15 = vld [vmem:[#allocation7 + $0xa0] sm:$0xf]  ;;  %v4002_v17 = vld [vmem:[#allocation7 + $0xa4] sm:$0xf]  ;;  %v4541_v20 = vor.u32 %v4057_v10, %v3644_v9 }
  0x38   :  { %534 = vmatpush.bf16.msrb.mxu0 %v3541_v37  ;;  %455 = vmatmul.bf16.vlgmr.msra.gmra.mxu1 %v4516_v35  ;;  %v4005_v16 = vld [vmem:[#allocation7 + $0xb4] sm:$0xf0]  ;;  %v3446_v18 = vld [vmem:[#allocation7 + $0xb8] sm:$0xf0]  ;;  %v4544_v21 = vor.u32 %v4105_v13, %v3836_v11  ;;  %v3620_v22 = vld [vmem:[#allocation7 + $0x210] sm:$0xf] }
  0x39   :  { %563 = vmatpush.bf16.msrb.mxu1 %v3545_v41  ;;  %484 = vmatmul.bf16.vlgmr.msra.gmra.mxu2 %v4516_v35  ;;  %6178 = vst [vmem:[#allocation23_spill] sm:$0xff] %v4541_v20  ;;  %v4051_v23 = vld [vmem:[#allocation7 + $0x224] sm:$0xf0]  ;;  %v3812_v24 = vld [vmem:[#allocation7 + $0x390] sm:$0xf]  ;;  %v3445_v25 = vor.u32 %v4005_v16, %v3444_v15  ;;  %v3449_v27 = vor.u32 %v4002_v17, %v3446_v18  ;;  %s4468_s5 = smov 8  }
  0x3a   :  { %513 = vmatmul.bf16.vlgmr.msra.gmra.mxu3 %v4516_v35  ;;  %1182 = vmatpush.bf16.msrb.mxu2 %v4518_v47  ;;  %6179 = vst [vmem:[#allocation24_spill] sm:$0xff] %v4544_v21  ;;  %v4099_v26 = vld [vmem:[#allocation7 + $0x3a4] sm:$0xf0]  ;;  %v3420_v28 = vld [vmem:[#allocation7 + $0x70] sm:$0xf]  ;;  %v4547_v32 = vor.u32 %v4051_v23, %v3620_v22 }
  0x3b   :  { %1195 = vmatpush.bf16.msrb.mxu3 %v4520_v48  ;;  %v3999_v29 = vld [vmem:[#allocation7 + $0x84] sm:$0xf0]  ;;  %v3996_v30 = vld [vmem:[#allocation7 + $0x74] sm:$0xf]  ;;  %v3422_v31 = vld [vmem:[#allocation7 + $0x88] sm:$0xf0]  ;;  %v4550_v33 = vor.u32 %v4099_v26, %v3812_v24 }
  0x3c   :  { %535 = vmatpush.bf16.msrb.mxu0 %v3517_v49  ;;  %6180 = vst [vmem:[#allocation25_spill] sm:$0xff] %v4547_v32  ;;  %v3596_v34 = vld [vmem:[#allocation7 + $0x1e0] sm:$0xf]  ;;  %v4045_v36 = vld [vmem:[#allocation7 + $0x1f4] sm:$0xf0]  ;;  %v3421_v37 = vor.u32 %v3999_v29, %v3420_v28  ;;  %v3425_v40 = vor.u32 %v3996_v30, %v3422_v31 }
  0x3d   :  { %564 = vmatpush.bf16.msrb.mxu1 %v3521_v53  ;;  %6181 = vst [vmem:[#allocation26_spill] sm:$0xff] %v4550_v33  ;;  %v3788_v38 = vld [vmem:[#allocation7 + $0x360] sm:$0xf]  ;;  %v4093_v39 = vld [vmem:[#allocation7 + $0x374] sm:$0xf0]  ;;  %v4557_v41 = vor.u32 %v4045_v36, %v3596_v34 }
  0x3e   :  { %1183 = vmatpush.bf16.msrb.mxu2 %v4527_v59  ;;  %v3396_v42 = vld [vmem:[#allocation7 + $0x40] sm:$0xf]  ;;  %v3993_v43 = vld [vmem:[#allocation7 + $0x54] sm:$0xf0]  ;;  %v3990_v44 = vld [vmem:[#allocation7 + $0x44] sm:$0xf]  ;;  %v4560_v45 = vor.u32 %v4093_v39, %v3788_v38 }
  0x3f   :  { %1196 = vmatpush.bf16.msrb.mxu3 %v4530_v60  ;;  %6182 = vst [vmem:[#allocation27_spill] sm:$0xff] %v4557_v41  ;;  %v3572_v46 = vld [vmem:[#allocation7 + $0x1b0] sm:$0xf]  ;;  %v4039_v49 = vld [vmem:[#allocation7 + $0x1c4] sm:$0xf0]  ;;  %v3397_v50 = vor.u32 %v3993_v43, %v3396_v42 }
  0x40   :  { %536 = vmatpush.bf16.msrb.mxu0 %v3493_v0  ;;  %6183 = vst [vmem:[#allocation28_spill] sm:$0xff] %v4560_v45  ;;  %v3398_v51 = vld [vmem:[#allocation7 + $0x58] sm:$0xf0]  ;;  %v3764_v52 = vld [vmem:[#allocation7 + $0x330] sm:$0xf]  ;;  %v4563_v56 = vor.u32 %v4039_v49, %v3572_v46 }
  0x41   :  { %565 = vmatpush.bf16.msrb.mxu1 %v3497_v2  ;;  %v4087_v53 = vld [vmem:[#allocation7 + $0x344] sm:$0xf0]  ;;  %v3401_v54 = vor.u32 %v3990_v44, %v3398_v51  ;;  %v3548_v55 = vld [vmem:[#allocation7 + $0x180] sm:$0xf]  ;;  %v3372_v57 = vld [vmem:[#allocation7 + $0x10] sm:$0xf] }
  0x42   :  { %1184 = vmatpush.bf16.msrb.mxu2 %v4533_v7  ;;  %6184 = vst [vmem:[#allocation29_spill] sm:$0xff] %v4563_v56  ;;  %v3987_v58 = vld [vmem:[#allocation7 + $0x24] sm:$0xf0]  ;;  %v3984_v61 = vld [vmem:[#allocation7 + $0x14] sm:$0xf]  ;;  %v4566_v62 = vor.u32 %v4087_v53, %v3764_v52 }
  0x43   :  { %1197 = vmatpush.bf16.msrb.mxu3 %v4536_v8  ;;  %v4033_v63 = vld [vmem:[#allocation7 + $0x194] sm:$0xf0]  ;;  %v3740_v0 = vld [vmem:[#allocation7 + $0x300] sm:$0xf]  ;;  %v3373_v1 = vor.u32 %v3987_v58, %v3372_v57  ;;  %v3374_v2 = vld [vmem:[#allocation7 + $0x28] sm:$0xf0] }
  0x44   :  { %537 = vmatpush.bf16.msrb.mxu0 %v3469_v12  ;;  %6185 = vst [vmem:[#allocation30_spill] sm:$0xff] %v4566_v62  ;;  %v4081_v3 = vld [vmem:[#allocation7 + $0x314] sm:$0xf0]  ;;  %v4072_v4 = vld [vmem:[#allocation7 + $0x2d4] sm:$0xf]  ;;  %v3377_v6 = vor.u32 %v3984_v61, %v3374_v2  ;;  %v4569_v11 = vor.u32 %v4033_v63, %v3548_v55 }
  0x45   :  { %566 = vmatpush.bf16.msrb.mxu1 %v3473_v14  ;;  %v3718_v5 = vld [vmem:[#allocation7 + $0x2e8] sm:$0xf0]  ;;  %v4120_v9 = vld [vmem:[#allocation7 + $0x454] sm:$0xf]  ;;  %v4572_v12 = vor.u32 %v4081_v3, %v3740_v0  ;;  %v4576_v14 = vld [vmem:[#allocation2 + $0x10] sm:$0xff] }
  0x46   :  { %1185 = vmatpush.bf16.msrb.mxu2 %v4541_v20  ;;  %v3910_v10 = vld [vmem:[#allocation7 + $0x468] sm:$0xf0]  ;;  %6186 = vst [vmem:[#allocation31_spill] sm:$0xff] %v4569_v11  ;;  %v4574_v13 = vor.u32 %v4072_v4, %v3718_v5  ;;  %v4066_v16 = vld [vmem:[#allocation7 + $0x2a4] sm:$0xf] }
  0x47   :  { %1198 = vmatpush.bf16.msrb.mxu3 %v4544_v21  ;;  %431 = vmatmul.bf16.gmra.mxu0 %v4539_v19  ;;  %6187 = vst [vmem:[#allocation32_spill] sm:$0xff] %v4572_v12  ;;  %v4578_v15 = vor.u32 %v4120_v9, %v3910_v10  ;;  %v3694_v17 = vld [vmem:[#allocation7 + $0x2b8] sm:$0xf0]  ;;  %v4114_v18 = vld [vmem:[#allocation7 + $0x424] sm:$0xf] }
  0x48   :  { %538 = vmatpush.bf16.msrb.mxu0 %v3445_v25  ;;  %460 = vmatmul.bf16.gmra.mxu1 %v4539_v19  ;;  %6188 = vst [vmem:[#allocation33_spill] sm:$0xff] %v4574_v13  ;;  %v3886_v22 = vld [vmem:[#allocation7 + $0x438] sm:$0xf0]  ;;  %v4583_v23 = vor.u32 %v4066_v16, %v3694_v17  ;;  %v4060_v25 = vld [vmem:[#allocation7 + $0x274] sm:$0xf] }
  0x49   :  { %567 = vmatpush.bf16.msrb.mxu1 %v3449_v27  ;;  %489 = vmatmul.bf16.gmra.mxu2 %v4539_v19  ;;  %6189 = vst [vmem:[#allocation34_spill] sm:$0xff] %v4578_v15  ;;  %v4587_v24 = vor.u32 %v4114_v18, %v3886_v22  ;;  %v3670_v26 = vld [vmem:[#allocation7 + $0x288] sm:$0xf0]  ;;  %v4108_v27 = vld [vmem:[#allocation7 + $0x3f4] sm:$0xf] }
  0x4a   :  { %518 = vmatmul.bf16.gmra.mxu3 %v4539_v19  ;;  %1186 = vmatpush.bf16.msrb.mxu2 %v4547_v32  ;;  %6190 = vst [vmem:[#allocation35_spill] sm:$0xff] %v4583_v23  ;;  %v3862_v28 = vld [vmem:[#allocation7 + $0x408] sm:$0xf0]  ;;  %v3724_v29 = vld [vmem:[#allocation7 + $0x2d8] sm:$0xf]  ;;  %v4593_v34 = vor.u32 %v4060_v25, %v3670_v26 }
  0x4b   :  { %1199 = vmatpush.bf16.msrb.mxu3 %v4550_v33  ;;  %6191 = vst [vmem:[#allocation36_spill] sm:$0xff] %v4587_v24  ;;  %v4076_v30 = vld [vmem:[#allocation7 + $0x2ec] sm:$0xf0]  ;;  %v3916_v31 = vld [vmem:[#allocation7 + $0x458] sm:$0xf]  ;;  %v4598_v38 = vor.u32 %v4108_v27, %v3862_v28 }
  0x4c   :  { %539 = vmatpush.bf16.msrb.mxu0 %v3421_v37  ;;  %6192 = vst [vmem:[#allocation37_spill] sm:$0xff] %v4593_v34  ;;  %v4595_v36 = vor.u32 %v4076_v30, %v3724_v29  ;;  %v4124_v37 = vld [vmem:[#allocation7 + $0x46c] sm:$0xf0]  ;;  %v4054_v39 = vld [vmem:[#allocation7 + $0x244] sm:$0xf] }
  0x4d   :  { %568 = vmatpush.bf16.msrb.mxu1 %v3425_v40  ;;  %6194 = vst [vmem:[#allocation39_spill] sm:$0xff] %v4598_v38  ;;  %v3646_v40 = vld [vmem:[#allocation7 + $0x258] sm:$0xf0]  ;;  %v4600_v42 = vor.u32 %v4124_v37, %v3916_v31  ;;  %v4102_v43 = vld [vmem:[#allocation7 + $0x3c4] sm:$0xf] }
  0x4e   :  { %1187 = vmatpush.bf16.msrb.mxu2 %v4557_v41  ;;  %6193 = vst [vmem:[#allocation38_spill] sm:$0xff] %v4595_v36  ;;  %v3838_v44 = vld [vmem:[#allocation7 + $0x3d8] sm:$0xf0]  ;;  %v4605_v46 = vor.u32 %v4054_v39, %v3646_v40  ;;  %v3700_v49 = vld [vmem:[#allocation7 + $0x2a8] sm:$0xf] }
  0x4f   :  { %1200 = vmatpush.bf16.msrb.mxu3 %v4560_v45  ;;  %6195 = vst [vmem:[#allocation40_spill] sm:$0xff] %v4600_v42  ;;  %v3892_v51 = vld [vmem:[#allocation7 + $0x428] sm:$0xf]  ;;  %v4608_v52 = vor.u32 %v4102_v43, %v3838_v44  ;;  %v4048_v53 = vld [vmem:[#allocation7 + $0x214] sm:$0xf] }
  0x50   :  { %540 = vmatpush.bf16.msrb.mxu0 %v3397_v50  ;;  %6196 = vst [vmem:[#allocation41_spill] sm:$0xff] %v4605_v46  ;;  %v4070_v50 = vld [vmem:[#allocation7 + $0x2bc] sm:$0xf0]  ;;  %v4096_v58 = vld [vmem:[#allocation7 + $0x394] sm:$0xf] }
  0x51   :  { %569 = vmatpush.bf16.msrb.mxu1 %v3401_v54  ;;  %6197 = vst [vmem:[#allocation42_spill] sm:$0xff] %v4608_v52  ;;  %v3622_v54 = vld [vmem:[#allocation7 + $0x228] sm:$0xf0]  ;;  %v4610_v55 = vor.u32 %v4070_v50, %v3700_v49  ;;  %v4118_v57 = vld [vmem:[#allocation7 + $0x43c] sm:$0xf0] }
  0x52   :  { %1188 = vmatpush.bf16.msrb.mxu2 %v4563_v56  ;;  %v3814_v61 = vld [vmem:[#allocation7 + $0x3a8] sm:$0xf0]  ;;  %v4612_v63 = vor.u32 %v4118_v57, %v3892_v51  ;;  %v4616_v0 = vor.u32 %v4048_v53, %v3622_v54  ;;  %v4042_v3 = vld [vmem:[#allocation7 + $0x1e4] sm:$0xf]  ;;  %v3598_v4 = vld [vmem:[#allocation7 + $0x1f8] sm:$0xf0] }
  0x53   :  { %1201 = vmatpush.bf16.msrb.mxu3 %v4566_v62  ;;  %6198 = vst [vmem:[#allocation43_spill] sm:$0xff] %v4610_v55  ;;  %v4622_v2 = vor.u32 %v4096_v58, %v3814_v61  ;;  %v4090_v5 = vld [vmem:[#allocation7 + $0x364] sm:$0xf]  ;;  %v4625_v9 = vor.u32 %v4042_v3, %v3598_v4  ;;  %v4036_v16 = vld [vmem:[#allocation7 + $0x1b4] sm:$0xf]  ;;  %v4658_v4 = vld [vmem:[#allocation5 + $0x8] sm:$0xff] }
  0x54   :  { %541 = vmatpush.bf16.msrb.mxu0 %v3373_v1  ;;  %6199 = vst [vmem:[#allocation44_spill] sm:$0xff] %v4612_v63  ;;  %v4620_v1 = vld [vmem:[#allocation2 + $0x18] sm:$0xff]  ;;  %v4084_v18 = vld [vmem:[#allocation7 + $0x334] sm:$0xf]  ;;  %v3676_v25 = vld [vmem:[#allocation7 + $0x278] sm:$0xf] }
  0x55   :  { %570 = vmatpush.bf16.msrb.mxu1 %v3377_v6  ;;  %6200 = vst [vmem:[#allocation45_spill] sm:$0xff] %v4616_v0  ;;  %v3790_v6 = vld [vmem:[#allocation7 + $0x378] sm:$0xf0]  ;;  %v3574_v17 = vld [vmem:[#allocation7 + $0x1c8] sm:$0xf0]  ;;  %v698_v3 = vld [vmem:[#allocation5] sm:$0xff] }
  0x56   :  { %1189 = vmatpush.bf16.msrb.mxu2 %v4569_v11  ;;  %6201 = vst [vmem:[#allocation46_spill] sm:$0xff] %v4622_v2  ;;  %v4629_v10 = vor.u32 %v4090_v5, %v3790_v6  ;;  %v3766_v22 = vld [vmem:[#allocation7 + $0x348] sm:$0xf0]  ;;  %v4064_v26 = vld [vmem:[#allocation7 + $0x28c] sm:$0xf0]  ;;  %v4635_v28 = vor.u32 %v4036_v16, %v3574_v17 }
  0x57   :  { %1202 = vmatpush.bf16.msrb.mxu3 %v4572_v12  ;;  %436 = vmatmul.bf16.gmra.mxu0 %v4576_v14  ;;  %6202 = vst [vmem:[#allocation47_spill] sm:$0xff] %v4625_v9  ;;  %v3868_v27 = vld [vmem:[#allocation7 + $0x3f8] sm:$0xf]  ;;  %v4637_v29 = vor.u32 %v4064_v26, %v3676_v25  ;;  %v4112_v30 = vld [vmem:[#allocation7 + $0x40c] sm:$0xf0]  ;;  %v4640_v31 = vor.u32 %v4084_v18, %v3766_v22 }
  0x58   :  { %465 = vmatmul.bf16.gmra.mxu1 %v4576_v14  ;;  %1234 = vmatpush.bf16.msra.mxu0 %v4595_v36  ;;  %6203 = vst [vmem:[#allocation48_spill] sm:$0xff] %v4629_v10  ;;  %v4030_v37 = vld [vmem:[#allocation7 + $0x184] sm:$0xf]  ;;  %v3550_v39 = vld [vmem:[#allocation7 + $0x198] sm:$0xf0]  ;;  %v4642_v40 = vor.u32 %v4112_v30, %v3868_v27  ;;  %v4662_v18 = vpack.c.bf16 %v698_v3, %v698_v3 }
  0x59   :  { %494 = vmatmul.bf16.gmra.mxu2 %v4576_v14  ;;  %1247 = vmatpush.bf16.msra.mxu1 %v4600_v42  ;;  %6204 = vst [vmem:[#allocation49_spill] sm:$0xff] %v4635_v28  ;;  %v4078_v43 = vld [vmem:[#allocation7 + $0x304] sm:$0xf]  ;;  %v3742_v44 = vld [vmem:[#allocation7 + $0x318] sm:$0xf0]  ;;  %v4647_v49 = vor.u32 %v4030_v37, %v3550_v39  ;;  %v4666_v22 = vpack.c.bf16 %v4658_v4, %v4658_v4 }
  0x5a   :  { %1208 = vmatpush.bf16.msra.mxu2 %v4574_v13  ;;  %523 = vmatmul.bf16.gmra.mxu3 %v4576_v14  ;;  %6205 = vst [vmem:[#allocation50_spill] sm:$0xff] %v4637_v29  ;;  %v3652_v50 = vld [vmem:[#allocation7 + $0x248] sm:$0xf]  ;;  %v4058_v51 = vld [vmem:[#allocation7 + $0x25c] sm:$0xf0]  ;;  %v4650_v54 = vor.u32 %v4078_v43, %v3742_v44 }
  0x5b   :  { %1221 = vmatpush.bf16.msra.mxu3 %v4578_v15  ;;  %6206 = vst [vmem:[#allocation51_spill] sm:$0xff] %v4640_v31  ;;  %v3844_v53 = vld [vmem:[#allocation7 + $0x3c8] sm:$0xf]  ;;  %v4652_v57 = vor.u32 %v4058_v51, %v3652_v50  ;;  %v4106_v58 = vld [vmem:[#allocation7 + $0x3dc] sm:$0xf0] }
  0x5c   :  { %1235 = vmatpush.bf16.msra.mxu0 %v4610_v55  ;;  %6207 = vst [vmem:[#allocation52_spill] sm:$0xff] %v4642_v40  ;;  %v4654_v61 = vor.u32 %v4106_v58, %v3844_v53  ;;  %v4073_v5 = vld [vmem:[#allocation7 + $0x2dc] sm:$0xf]  ;;  %v3726_v6 = vld [vmem:[#allocation7 + $0x2f0] sm:$0xf0] }
  0x5d   :  { %1248 = vmatpush.bf16.msra.mxu1 %v4612_v63  ;;  %6208 = vst [vmem:[#allocation53_spill] sm:$0xff] %v4647_v49  ;;  %v4121_v16 = vld [vmem:[#allocation7 + $0x45c] sm:$0xf]  ;;  %v3918_v17 = vld [vmem:[#allocation7 + $0x470] sm:$0xf0]  ;;  %v4668_v25 = vor.u32 %v4073_v5, %v3726_v6 }
  0x5e   :  { %1209 = vmatpush.bf16.msra.mxu2 %v4583_v23  ;;  %6209 = vst [vmem:[#allocation54_spill] sm:$0xff] %v4650_v54  ;;  %v4670_v26 = vor.u32 %v4121_v16, %v3918_v17  ;;  %v4067_v27 = vld [vmem:[#allocation7 + $0x2ac] sm:$0xf]  ;;  %v3702_v30 = vld [vmem:[#allocation7 + $0x2c0] sm:$0xf0] }
  0x5f   :  { %1222 = vmatpush.bf16.msra.mxu3 %v4587_v24  ;;  %6210 = vst [vmem:[#allocation55_spill] sm:$0xff] %v4652_v57  ;;  %v4115_v37 = vld [vmem:[#allocation7 + $0x42c] sm:$0xf]  ;;  %v3894_v39 = vld [vmem:[#allocation7 + $0x440] sm:$0xf0]  ;;  %v4677_v51 = vor.u32 %v4067_v27, %v3702_v30 }
  0x60   :  { %1236 = vmatpush.bf16.msra.mxu0 %v4637_v29  ;;  %6211 = vst [vmem:[#allocation56_spill] sm:$0xff] %v4654_v61  ;;  %v3628_v43 = vld [vmem:[#allocation7 + $0x218] sm:$0xf]  ;;  %v4052_v44 = vld [vmem:[#allocation7 + $0x22c] sm:$0xf0]  ;;  %v4682_v3 = vor.u32 %v4115_v37, %v3894_v39 }
  0x61   :  { %1249 = vmatpush.bf16.msra.mxu1 %v4642_v40  ;;  %6212 = vst [vmem:[#allocation57_spill] sm:$0xff] %v4658_v4  ;;  %v3820_v50 = vld [vmem:[#allocation7 + $0x398] sm:$0xf]  ;;  %v4679_v53 = vor.u32 %v4052_v44, %v3628_v43  ;;  %v4100_v58 = vld [vmem:[#allocation7 + $0x3ac] sm:$0xf0] }
  0x62   :  { %1210 = vmatpush.bf16.msra.mxu2 %v4593_v34  ;;  %6213 = vst [vmem:[#allocation58_spill] sm:$0xff] %v4668_v25  ;;  %v4061_v5 = vld [vmem:[#allocation7 + $0x27c] sm:$0xf]  ;;  %v4684_v6 = vor.u32 %v4100_v58, %v3820_v50  ;;  %v3870_v17 = vld [vmem:[#allocation7 + $0x410] sm:$0xf0] }
  0x63   :  { %1223 = vmatpush.bf16.msra.mxu3 %v4598_v38  ;;  %6214 = vst [vmem:[#allocation59_spill] sm:$0xff] %v4670_v26  ;;  %v4109_v16 = vld [vmem:[#allocation7 + $0x3fc] sm:$0xf]  ;;  %v4055_v30 = vld [vmem:[#allocation7 + $0x24c] sm:$0xf] }
  0x64   :  { %1237 = vmatpush.bf16.msra.mxu0 %v4652_v57  ;;  %6215 = vst [vmem:[#allocation60_spill] sm:$0xff] %v4677_v51  ;;  %v4692_v43 = vor.u32 %v4109_v16, %v3870_v17  ;;  %v3654_v37 = vld [vmem:[#allocation7 + $0x260] sm:$0xf0]  ;;  %v4103_v39 = vld [vmem:[#allocation7 + $0x3cc] sm:$0xf] }
  0x65   :  { %1250 = vmatpush.bf16.msra.mxu1 %v4654_v61  ;;  %6216 = vst [vmem:[#allocation61_spill] sm:$0xff] %v4679_v53  ;;  %v3846_v44 = vld [vmem:[#allocation7 + $0x3e0] sm:$0xf0]  ;;  %v3604_v50 = vld [vmem:[#allocation7 + $0x1e8] sm:$0xf] }
  0x66   :  { %1211 = vmatpush.bf16.msra.mxu2 %v4605_v46  ;;  %6217 = vst [vmem:[#allocation62_spill] sm:$0xff] %v4682_v3  ;;  %v4046_v58 = vld [vmem:[#allocation7 + $0x1fc] sm:$0xf0]  ;;  %v3796_v4 = vld [vmem:[#allocation7 + $0x368] sm:$0xf]  ;;  %v4702_v16 = vor.u32 %v4103_v39, %v3846_v44 }
  0x67   :  { %1224 = vmatpush.bf16.msra.mxu3 %v4608_v52  ;;  %441 = vmatmul.bf16.gmra.mxu0 %v4620_v1  ;;  %6218 = vst [vmem:[#allocation63_spill] sm:$0xff] %v4684_v6  ;;  %v4694_v57 = vor.u32 %v4046_v58, %v3604_v50  ;;  %v3630_v17 = vld [vmem:[#allocation7 + $0x230] sm:$0xf0]  ;;  %v4097_v61 = vld [vmem:[#allocation7 + $0x39c] sm:$0xf] }
  0x68   :  { %470 = vmatmul.bf16.gmra.mxu1 %v4620_v1  ;;  %1238 = vmatpush.bf16.msra.mxu0 %v4679_v53  ;;  %6220 = vst [vmem:[#allocation65_spill] sm:$0xff] %v4692_v43  ;;  %v4094_v53 = vld [vmem:[#allocation7 + $0x37c] sm:$0xf0]  ;;  %v3822_v29 = vld [vmem:[#allocation7 + $0x3b0] sm:$0xf0] }
  0x69   :  { %499 = vmatmul.bf16.gmra.mxu2 %v4620_v1  ;;  %1251 = vmatpush.bf16.msra.mxu1 %v4684_v6  ;;  %6221 = vst [vmem:[#allocation66_spill] sm:$0xff] %v4694_v57  ;;  %v4697_v6 = vor.u32 %v4055_v30, %v3654_v37  ;;  %v3580_v50 = vld [vmem:[#allocation7 + $0x1b8] sm:$0xf]  ;;  %v4040_v58 = vld [vmem:[#allocation7 + $0x1cc] sm:$0xf0]  ;;  %v4714_v39 = vor.u32 %v4097_v61, %v3822_v29 }
  0x6a   :  { %1212 = vmatpush.bf16.msra.mxu2 %v4616_v0  ;;  %528 = vmatmul.bf16.gmra.mxu3 %v4620_v1  ;;  %6224 = vst [vmem:[#allocation69_spill] sm:$0xff] %v4702_v16  ;;  %v3772_v40 = vld [vmem:[#allocation7 + $0x338] sm:$0xf]  ;;  %v4088_v30 = vld [vmem:[#allocation7 + $0x34c] sm:$0xf0] }
  0x6b   :  { %1225 = vmatpush.bf16.msra.mxu3 %v4622_v2  ;;  %6222 = vst [vmem:[#allocation67_spill] sm:$0xff] %v4697_v6  ;;  %v4711_v37 = vor.u32 %v4088_v30, %v3772_v40  ;;  %v3606_v44 = vld [vmem:[#allocation7 + $0x200] sm:$0xf0]  ;;  %v4082_v29 = vld [vmem:[#allocation7 + $0x31c] sm:$0xf0] }
  0x6c   :  { %1239 = vmatpush.bf16.msra.mxu0 %v4694_v57  ;;  %6228 = vst [vmem:[#allocation73_spill] sm:$0xff] %v4714_v39  ;;  %v4091_v57 = vld [vmem:[#allocation7 + $0x36c] sm:$0xf]  ;;  %v3732_v61 = vld [vmem:[#allocation7 + $0x2e0] sm:$0xf] }
  0x6d   :  { %6227 = vst [vmem:[#allocation72_spill] sm:$0xff] %v4711_v37  ;;  %v4085_v55 = vld [vmem:[#allocation7 + $0x33c] sm:$0xf] }
  0x6e   :  { %1213 = vmatpush.bf16.msra.mxu2 %v4625_v9 }
  0x6f   :  { %1226 = vmatpush.bf16.msra.mxu3 %v4629_v10 }
  0x72   :  { %1214 = vmatpush.bf16.msra.mxu2 %v4635_v28 }
  0x73   :  { %1227 = vmatpush.bf16.msra.mxu3 %v4640_v31 }
  0x76   :  { %1215 = vmatpush.bf16.msra.mxu2 %v4647_v49 }
  0x77   :  { %1228 = vmatpush.bf16.msra.mxu3 %v4650_v54  ;;  %542 = vmatmul.bf16.vlgmr.msrb.gmra.mxu0 %v4516_v35 }
  0x78   :  { %571 = vmatmul.bf16.vlgmr.msrb.gmra.mxu1 %v4516_v35  ;;  %v3678_v35 = vld [vmem:[#allocation7 + $0x290] sm:$0xf0] }
  0x79   :  { %1190 = vmatmul.bf16.vlgmr.msrb.gmra.mxu2 %v4662_v18  ;;  %v4689_v27 = vor.u32 %v4061_v5, %v3678_v35  ;;  %v4049_v5 = vld [vmem:[#allocation7 + $0x21c] sm:$0xf]  ;;  %v4699_v35 = vor.u32 %v4094_v53, %v3796_v4  ;;  %v4043_v53 = vld [vmem:[#allocation7 + $0x1ec] sm:$0xf] }
  0x7a   :  { %1203 = vmatmul.bf16.vlgmr.msrb.gmra.mxu3 %v4666_v22  ;;  %1260 = vmatpush.bf16.msrb.mxu2 %v4668_v25  ;;  %v4709_v4 = vor.u32 %v4049_v5, %v3630_v17  ;;  %v3748_v5 = vld [vmem:[#allocation7 + $0x308] sm:$0xf]  ;;  %v4077_v17 = vld [vmem:[#allocation7 + $0x2f4] sm:$0xf0]  ;;  %v4725_v30 = vor.u32 %v4043_v53, %v3606_v44  ;;  %v3708_v53 = vld [vmem:[#allocation7 + $0x2b0] sm:$0xf] }
  0x7b   :  { %1273 = vmatpush.bf16.msrb.mxu3 %v4670_v26  ;;  %6219 = vst [vmem:[#allocation64_spill] sm:$0xff] %v4689_v27  ;;  %1252 = vmatpush.bf16.msra.mxu1 %v4699_v35  ;;  %v4071_v44 = vld [vmem:[#allocation7 + $0x2c4] sm:$0xf0] }
  0x7c   :  { %6223 = vst [vmem:[#allocation68_spill] sm:$0xff] %v4699_v35  ;;  %v3798_v35 = vld [vmem:[#allocation7 + $0x380] sm:$0xf0] }
  0x7d   :  { %6226 = vst [vmem:[#allocation71_spill] sm:$0xff] %v4709_v4 }
  0x7e   :  { %1261 = vmatpush.bf16.msrb.mxu2 %v4677_v51  ;;  %6230 = vst [vmem:[#allocation75_spill] sm:$0xff] %v4725_v30  ;;  %v3710_v51 = vld [vmem:[#allocation7 + $0x2c8] sm:$0xf0] }
  0x7f   :  { %1274 = vmatpush.bf16.msrb.mxu3 %v4682_v3  ;;  %1253 = vmatpush.bf16.msra.mxu1 %v4711_v37  ;;  %v4727_v37 = vor.u32 %v4082_v29, %v3748_v5  ;;  %v3900_v5 = vld [vmem:[#allocation7 + $0x430] sm:$0xf]  ;;  %v4740_v29 = vor.u32 %v4071_v44, %v3708_v53  ;;  %v3684_v53 = vld [vmem:[#allocation7 + $0x280] sm:$0xf]  ;;  %v4065_v44 = vld [vmem:[#allocation7 + $0x294] sm:$0xf0] }
  0x81   :  { %6231 = vst [vmem:[#allocation76_spill] sm:$0xff] %v4727_v37 }
  0x82   :  { %1262 = vmatpush.bf16.msrb.mxu2 %v4689_v27  ;;  %v4706_v27 = vor.u32 %v4040_v58, %v3580_v50  ;;  %v3556_v50 = vld [vmem:[#allocation7 + $0x188] sm:$0xf]  ;;  %v4034_v58 = vld [vmem:[#allocation7 + $0x19c] sm:$0xf0]  ;;  %6235 = vst [vmem:[#allocation80_spill] sm:$0xff] %v4740_v29 }
  0x83   :  { %1275 = vmatpush.bf16.msrb.mxu3 %v4692_v43  ;;  %v4721_v40 = vor.u32 %v4034_v58, %v3556_v50  ;;  %v4732_v50 = vor.u32 %v4091_v57, %v3798_v35  ;;  %v3582_v58 = vld [vmem:[#allocation7 + $0x1d0] sm:$0xf0]  ;;  %1254 = vmatpush.bf16.msra.mxu1 %v4727_v37  ;;  %v4119_v57 = vld [vmem:[#allocation7 + $0x444] sm:$0xf0]  ;;  %v4074_v37 = vld [vmem:[#allocation7 + $0x2e4] sm:$0xf] }
  0x84   :  { %6225 = vst [vmem:[#allocation70_spill] sm:$0xff] %v4706_v27  ;;  %1240 = vmatpush.bf16.msra.mxu0 %v4706_v27  ;;  %v4037_v27 = vld [vmem:[#allocation7 + $0x1bc] sm:$0xf]  ;;  %v3774_v43 = vld [vmem:[#allocation7 + $0x350] sm:$0xf0] }
  0x85   :  { %6229 = vst [vmem:[#allocation74_spill] sm:$0xff] %v4721_v40  ;;  %v4743_v35 = vor.u32 %v4037_v27, %v3582_v58  ;;  %v3926_v27 = vld [vmem:[#allocation7 + $0x478] sm:$0xf0]  ;;  %v4752_v58 = vor.u32 %v4065_v44, %v3684_v53  ;;  %v3902_v53 = vld [vmem:[#allocation7 + $0x448] sm:$0xf0] }
  0x86   :  { %1263 = vmatpush.bf16.msrb.mxu2 %v4697_v6  ;;  %v4729_v6 = vor.u32 %v4077_v17, %v3732_v61  ;;  %6233 = vst [vmem:[#allocation78_spill] sm:$0xff] %v4732_v50  ;;  %v4031_v61 = vld [vmem:[#allocation7 + $0x18c] sm:$0xf]  ;;  %v3558_v17 = vld [vmem:[#allocation7 + $0x1a0] sm:$0xf0] }
  0x87   :  { %1276 = vmatpush.bf16.msrb.mxu3 %v4702_v16  ;;  %547 = vmatmul.bf16.gmra.mxu0 %v4539_v19  ;;  %v3924_v16 = vld [vmem:[#allocation7 + $0x460] sm:$0xf]  ;;  %6236 = vst [vmem:[#allocation81_spill] sm:$0xff] %v4743_v35 }
  0x88   :  { %576 = vmatmul.bf16.gmra.mxu1 %v4539_v19  ;;  %6232 = vst [vmem:[#allocation77_spill] sm:$0xff] %v4729_v6  ;;  %v4125_v19 = vld [vmem:[#allocation7 + $0x474] sm:$0xf0]  ;;  %1241 = vmatpush.bf16.msra.mxu0 %v4721_v40  ;;  %v3750_v40 = vld [vmem:[#allocation7 + $0x320] sm:$0xf0] }
  0x89   :  { %1216 = vmatmul.bf16.vlgmr.msra.gmra.mxu2 %v4662_v18  ;;  %v4735_v63 = vor.u32 %v4125_v19, %v3924_v16  ;;  %v4079_v16 = vld [vmem:[#allocation7 + $0x30c] sm:$0xf]  ;;  %v4745_v19 = vor.u32 %v4119_v57, %v3900_v5  ;;  %6239 = vst [vmem:[#allocation84_spill] sm:$0xff] %v4752_v58  ;;  %v4113_v5 = vld [vmem:[#allocation7 + $0x414] sm:$0xf0]  ;;  %v4755_v57 = vor.u32 %v4031_v61, %v3558_v17 }
  0x8a   :  { %1229 = vmatmul.bf16.vlgmr.msra.gmra.mxu3 %v4666_v22  ;;  %1264 = vmatpush.bf16.msrb.mxu2 %v4709_v4  ;;  %v3734_v4 = vld [vmem:[#allocation7 + $0x2f8] sm:$0xf0]  ;;  %v3660_v61 = vld [vmem:[#allocation7 + $0x250] sm:$0xf]  ;;  %v4059_v17 = vld [vmem:[#allocation7 + $0x264] sm:$0xf0] }
  0x8b   :  { %1277 = vmatpush.bf16.msrb.mxu3 %v4714_v39  ;;  %6234 = vst [vmem:[#allocation79_spill] sm:$0xff] %v4735_v63  ;;  %1299 = vmatpush.bf16.msrb.mxu1 %v4735_v63  ;;  %v3876_v63 = vld [vmem:[#allocation7 + $0x400] sm:$0xf]  ;;  %v4769_v44 = vor.u32 %v4059_v17, %v3660_v61  ;;  %v3878_v61 = vld [vmem:[#allocation7 + $0x418] sm:$0xf0] }
  0x8c   :  { %1286 = vmatpush.bf16.msrb.mxu0 %v4729_v6  ;;  %6237 = vst [vmem:[#allocation82_spill] sm:$0xff] %v4745_v19  ;;  %v4748_v6 = vor.u32 %v4085_v55, %v3774_v43  ;;  %v4757_v55 = vor.u32 %v4113_v5, %v3876_v63  ;;  %v4760_v43 = vor.u32 %v4079_v16, %v3750_v40  ;;  %v3852_v63 = vld [vmem:[#allocation7 + $0x3d0] sm:$0xf]  ;;  %v4107_v40 = vld [vmem:[#allocation7 + $0x3e4] sm:$0xf0] }
  0x8d   :  { %6240 = vst [vmem:[#allocation85_spill] sm:$0xff] %v4755_v57  ;;  %v4110_v5 = vld [vmem:[#allocation7 + $0x404] sm:$0xf]  ;;  %v3636_v17 = vld [vmem:[#allocation7 + $0x220] sm:$0xf] }
  0x8e   :  { %1265 = vmatpush.bf16.msrb.mxu2 %v4725_v30  ;;  %6238 = vst [vmem:[#allocation83_spill] sm:$0xff] %v4748_v6  ;;  %v4122_v30 = vld [vmem:[#allocation7 + $0x464] sm:$0xf] }
  0x8f   :  { %1278 = vmatpush.bf16.msrb.mxu3 %v4732_v50  ;;  %1300 = vmatpush.bf16.msrb.mxu1 %v4745_v19  ;;  %6241 = vst [vmem:[#allocation86_spill] sm:$0xff] %v4757_v55  ;;  %v4068_v50 = vld [vmem:[#allocation7 + $0x2b4] sm:$0xf]  ;;  %v4764_v39 = vor.u32 %v4122_v30, %v3926_v27  ;;  %v4775_v30 = vor.u32 %v4107_v40, %v3852_v63  ;;  %v3686_v27 = vld [vmem:[#allocation7 + $0x298] sm:$0xf0] }
  0x90   :  { %1287 = vmatpush.bf16.msrb.mxu0 %v4740_v29  ;;  %6242 = vst [vmem:[#allocation87_spill] sm:$0xff] %v4760_v43  ;;  %v4762_v29 = vor.u32 %v4074_v37, %v3734_v4  ;;  %v4116_v19 = vld [vmem:[#allocation7 + $0x434] sm:$0xf]  ;;  %v4773_v4 = vor.u32 %v4068_v50, %v3710_v51  ;;  %v4062_v37 = vld [vmem:[#allocation7 + $0x284] sm:$0xf] }
  0x91   :  { %6244 = vst [vmem:[#allocation89_spill] sm:$0xff] %v4764_v39  ;;  %v4779_v16 = vor.u32 %v4116_v19, %v3902_v53  ;;  %v3828_v51 = vld [vmem:[#allocation7 + $0x3a0] sm:$0xf]  ;;  %v4101_v63 = vld [vmem:[#allocation7 + $0x3b4] sm:$0xf0]  ;;  %v4788_v19 = vor.u32 %v4062_v37, %v3686_v27 }
  0x92   :  { %1266 = vmatpush.bf16.msrb.mxu2 %v4743_v35  ;;  %6243 = vst [vmem:[#allocation88_spill] sm:$0xff] %v4762_v29  ;;  %v4791_v53 = vor.u32 %v4101_v63, %v3828_v51  ;;  %v4056_v40 = vld [vmem:[#allocation7 + $0x254] sm:$0xf]  ;;  %v3804_v37 = vld [vmem:[#allocation7 + $0x370] sm:$0xf] }
  0x93   :  { %1279 = vmatpush.bf16.msrb.mxu3 %v4748_v6  ;;  %1301 = vmatpush.bf16.msrb.mxu1 %v4757_v55  ;;  %6245 = vst [vmem:[#allocation90_spill] sm:$0xff] %v4769_v44  ;;  %v4104_v55 = vld [vmem:[#allocation7 + $0x3d4] sm:$0xf]  ;;  %v4095_v27 = vld [vmem:[#allocation7 + $0x384] sm:$0xf0] }
  0x94   :  { %1288 = vmatpush.bf16.msrb.mxu0 %v4752_v58  ;;  %6246 = vst [vmem:[#allocation91_spill] sm:$0xff] %v4773_v4  ;;  %v4053_v58 = vld [vmem:[#allocation7 + $0x234] sm:$0xf0]  ;;  %v4050_v63 = vld [vmem:[#allocation7 + $0x224] sm:$0xf] }
  0x95   :  { %6247 = vst [vmem:[#allocation92_spill] sm:$0xff] %v4775_v30  ;;  %v4785_v50 = vor.u32 %v4053_v58, %v3636_v17  ;;  %v4047_v58 = vld [vmem:[#allocation7 + $0x204] sm:$0xf0] }
  0x96   :  { %1267 = vmatpush.bf16.msrb.mxu2 %v4755_v57  ;;  %6248 = vst [vmem:[#allocation93_spill] sm:$0xff] %v4779_v16  ;;  %v3830_v57 = vld [vmem:[#allocation7 + $0x3b8] sm:$0xf0] }
  0x97   :  { %1280 = vmatpush.bf16.msrb.mxu3 %v4760_v43  ;;  %552 = vmatmul.bf16.gmra.mxu0 %v4576_v14  ;;  %6249 = vst [vmem:[#allocation94_spill] sm:$0xff] %v4785_v50 }
  0x98   :  { %581 = vmatmul.bf16.gmra.mxu1 %v4576_v14  ;;  %1289 = vmatpush.bf16.msrb.mxu0 %v4769_v44  ;;  %6250 = vst [vmem:[#allocation95_spill] sm:$0xff] %v4788_v19  ;;  %v4794_v14 = vor.u32 %v4110_v5, %v3878_v61  ;;  %v3612_v44 = vld [vmem:[#allocation7 + $0x1f0] sm:$0xf]  ;;  %v4803_v5 = vor.u32 %v4095_v27, %v3804_v37  ;;  %v3588_v61 = vld [vmem:[#allocation7 + $0x1c0] sm:$0xf] }
  0x99   :  { %1268 = vmatmul.bf16.vlgmr.msrb.gmra.mxu2 %v4662_v18  ;;  %1302 = vmatpush.bf16.msrb.mxu1 %v4775_v30  ;;  %6251 = vst [vmem:[#allocation96_spill] sm:$0xff] %v4791_v53  ;;  %v4797_v17 = vor.u32 %v4047_v58, %v3612_v44  ;;  %v3780_v44 = vld [vmem:[#allocation7 + $0x340] sm:$0xf]  ;;  %v4089_v58 = vld [vmem:[#allocation7 + $0x354] sm:$0xf0] }
  0x9a   :  { %1312 = vmatpush.bf16.msra.mxu2 %v4762_v29  ;;  %1281 = vmatmul.bf16.vlgmr.msrb.gmra.mxu3 %v4666_v22  ;;  %6252 = vst [vmem:[#allocation97_spill] sm:$0xff] %v4794_v14  ;;  %v3662_v29 = vld [vmem:[#allocation7 + $0x268] sm:$0xf0]  ;;  %v4044_v37 = vld [vmem:[#allocation7 + $0x1f4] sm:$0xf]  ;;  %v4815_v27 = vor.u32 %v4089_v58, %v3780_v44 }
  0x9b   :  { %1325 = vmatpush.bf16.msra.mxu3 %v4764_v39  ;;  %v3854_v39 = vld [vmem:[#allocation7 + $0x3e8] sm:$0xf0]  ;;  %6253 = vst [vmem:[#allocation98_spill] sm:$0xff] %v4797_v17  ;;  %v4800_v51 = vor.u32 %v4056_v40, %v3662_v29  ;;  %v3590_v58 = vld [vmem:[#allocation7 + $0x1d8] sm:$0xf0] }
  0x9c   :  { %1290 = vmatpush.bf16.msrb.mxu0 %v4785_v50  ;;  %v4806_v30 = vor.u32 %v4104_v55, %v3854_v39  ;;  %v3638_v50 = vld [vmem:[#allocation7 + $0x238] sm:$0xf0]  ;;  %6254 = vst [vmem:[#allocation99_spill] sm:$0xff] %v4815_v27  ;;  %v3614_v55 = vld [vmem:[#allocation7 + $0x208] sm:$0xf0] }
  0x9d   :  { %1303 = vmatpush.bf16.msrb.mxu1 %v4791_v53  ;;  %v4812_v40 = vor.u32 %v4050_v63, %v3638_v50  ;;  %v3806_v53 = vld [vmem:[#allocation7 + $0x388] sm:$0xf0]  ;;  %v4083_v50 = vld [vmem:[#allocation7 + $0x324] sm:$0xf0]  ;;  %v4824_v63 = vor.u32 %v4044_v37, %v3614_v55 }
  0x9e   :  { %1313 = vmatpush.bf16.msra.mxu2 %v4773_v4  ;;  %v4041_v4 = vld [vmem:[#allocation7 + $0x1d4] sm:$0xf0] }
  0x9f   :  { %1326 = vmatpush.bf16.msra.mxu3 %v4779_v16  ;;  %v4098_v16 = vld [vmem:[#allocation7 + $0x3a4] sm:$0xf]  ;;  %v4809_v29 = vor.u32 %v4041_v4, %v3588_v61  ;;  %v3756_v4 = vld [vmem:[#allocation7 + $0x310] sm:$0xf] }
  0xa0   :  { %1291 = vmatpush.bf16.msrb.mxu0 %v4797_v17  ;;  %v4818_v39 = vor.u32 %v4098_v16, %v3830_v57  ;;  %v4035_v17 = vld [vmem:[#allocation7 + $0x1a4] sm:$0xf0]  ;;  %v4827_v44 = vor.u32 %v4083_v50, %v3756_v4  ;;  %v4038_v16 = vld [vmem:[#allocation7 + $0x1c4] sm:$0xf]  ;;  %v4080_v4 = vld [vmem:[#allocation7 + $0x314] sm:$0xf] }
  0xa1   :  { %1304 = vmatpush.bf16.msrb.mxu1 %v4803_v5  ;;  %v4836_v37 = vor.u32 %v4038_v16, %v3590_v58  ;;  %v3758_v50 = vld [vmem:[#allocation7 + $0x328] sm:$0xf0]  ;;  %v4848_v16 = vld [vmem:[#allocation8] ss:$2 sm:$0x3f] }
  0xa2   :  { %1314 = vmatpush.bf16.msra.mxu2 %v4788_v19  ;;  %v4092_v19 = vld [vmem:[#allocation7 + $0x374] sm:$0xf]  ;;  %6256 = vst [vmem:[#allocation101_spill] sm:$0xff] %v4827_v44  ;;  %v4852_v58 = vperm.slane %v4848_v16, 1 }
  0xa3   :  { %1327 = vmatpush.bf16.msra.mxu3 %v4794_v14  ;;  %v3564_v14 = vld [vmem:[#allocation7 + $0x190] sm:$0xf]  ;;  %v4831_v57 = vor.u32 %v4092_v19, %v3806_v53  ;;  %v4032_v19 = vld [vmem:[#allocation7 + $0x194] sm:$0xf]  ;;  %v3566_v53 = vld [vmem:[#allocation7 + $0x1a8] sm:$0xf0] }
  0xa4   :  { %1292 = vmatpush.bf16.msrb.mxu0 %v4809_v29  ;;  %v4821_v61 = vor.u32 %v4035_v17, %v3564_v14  ;;  %v4086_v14 = vld [vmem:[#allocation7 + $0x344] sm:$0xf]  ;;  %v3782_v17 = vld [vmem:[#allocation7 + $0x358] sm:$0xf0]  ;;  %6259 = vst [vmem:[#allocation104_spill] sm:$0xff] %v4852_v58 }
  0xa5   :  { %1305 = vmatpush.bf16.msrb.mxu1 %v4815_v27  ;;  %v4840_v55 = vor.u32 %v4086_v14, %v3782_v17 }
  0xa6   :  { %1315 = vmatpush.bf16.msra.mxu2 %v4800_v51  ;;  %6255 = vst [vmem:[#allocation100_spill] sm:$0xff] %v4821_v61 }
  0xa7   :  { %1328 = vmatpush.bf16.msra.mxu3 %v4806_v30  ;;  %557 = vmatmul.bf16.gmra.mxu0 %v4620_v1  ;;  %6257 = vst [vmem:[#allocation102_spill] sm:$0xff] %v4840_v55 }
  0xa8   :  { %586 = vmatmul.bf16.gmra.mxu1 %v4620_v1  ;;  %1293 = vmatpush.bf16.msrb.mxu0 %v4821_v61  ;;  %v4843_v1 = vor.u32 %v4032_v19, %v3566_v53  ;;  %v4846_v61 = vor.u32 %v4080_v4, %v3758_v50  ;;  %v83_v53 = vld [vmem:[%s5973_s2] sm:$0xff]  ;;  %v4464_v4 = vmov 0   ;;  %v4870_v50 = vperm.slane %v4848_v16, 3  ;;  %s4465_s2 = smov [#allocation11]  }
  0xa9   :  { %1306 = vmatpush.bf16.msrb.mxu1 %v4827_v44  ;;  %4139 = vset.pattern.permute.xlu0 %v4464_v4  ;;  %s3316_s19 = sshll.u32 %s4465_s2, 4  ;;  %s3317_s19 = int_to_ptr.vmem [resolvable:$true] %s3316_s19 }
  0xaa   :  { %1316 = vmatpush.bf16.msra.mxu2 %v4812_v40  ;;  %6258 = vst [vmem:[#allocation103_spill] sm:$0xff] %v4846_v61  ;;  %1439 = vperm.xlu0 %4139, %v83_v53  }
  0xab   :  { %1329 = vmatpush.bf16.msra.mxu3 %v4818_v39  ;;  %6261 = vst [vmem:[#allocation106_spill] sm:$0xff] %v4870_v50 }
  0xae   :  { %1317 = vmatpush.bf16.msra.mxu2 %v4824_v63 }
  0xaf   :  { %1330 = vmatpush.bf16.msra.mxu3 %v4831_v57 }
  0xb2   :  { %1318 = vmatpush.bf16.msra.mxu2 %v4836_v37 }
  0xb3   :  { %1331 = vmatpush.bf16.msra.mxu3 %v4840_v55 }
  0xb4   :  { %v4856_v14 = vpop.f32.mrf.mxu0 }
  0xb5   :  { %v456_v17 = vpop.f32.mrf.mxu1 }
  0xb6   :  { %1319 = vmatpush.bf16.msra.mxu2 %v4843_v1  ;;  %v4862_v19 = vadd.f32 %v456_v17, %v4852_v58 }
  0xb7   :  { %1332 = vmatpush.bf16.msra.mxu3 %v4846_v61  ;;  %1242 = vmatmul.bf16.vlgmr.msra.gmra.mxu0 %v4662_v18 }
  0xb8   :  { %6260 = vst [vmem:[#allocation105_spill] sm:$0xff] %v4862_v19  ;;  %1255 = vmatmul.bf16.vlgmr.msra.gmra.mxu1 %v4666_v22  ;;  %1449 = vmatpush.bf16.msra.mxu0 %v4518_v47 }
  0xb9   :  { %1320 = vmatmul.bf16.vlgmr.msra.gmra.mxu2 %v4662_v18  ;;  %1462 = vmatpush.bf16.msra.mxu1 %v4520_v48 }
  0xba   :  { %1475 = vmatpush.bf16.msrb.mxu2 %v4574_v13  ;;  %1333 = vmatmul.bf16.vlgmr.msra.gmra.mxu3 %v4666_v22 }
  0xbb   :  { %1488 = vmatpush.bf16.msrb.mxu3 %v4578_v15 }
  0xbc   :  { %v4876_v17 = vpop.f32.mrf.mxu2  ;;  %v4878_v13 = vpop.f32.mrf.mxu0  ;;  %1450 = vmatpush.bf16.msra.mxu0 %v4527_v59 }
  0xbd   :  { %v514_v19 = vpop.f32.mrf.mxu3  ;;  %6262 = vst [vmem:[#allocation107_spill] sm:$0xff] %v4878_v13  ;;  %v4883_v53 = vpop.f32.mrf.mxu1  ;;  %1463 = vmatpush.bf16.msra.mxu1 %v4530_v60 }
  0xbe   :  { %1476 = vmatpush.bf16.msrb.mxu2 %v4583_v23  ;;  %v4881_v4 = vadd.f32 %v514_v19, %v4870_v50  ;;  %6264 = vst [vmem:[#allocation109_spill] sm:$0xff] %v4883_v53  ;;  %v4894_v19 = vperm.slane %v4848_v16, 0 }
  0xbf   :  { %1489 = vmatpush.bf16.msrb.mxu3 %v4587_v24 }
  0xc0   :  { %6263 = vst [vmem:[#allocation108_spill] sm:$0xff] %v4881_v4  ;;  %1451 = vmatpush.bf16.msra.mxu0 %v4533_v7 }
  0xc1   :  { %1464 = vmatpush.bf16.msra.mxu1 %v4536_v8  ;;  %6265 = vst [vmem:[#allocation110_spill] sm:$0xff] %v4894_v19 }
  0xc2   :  { %1477 = vmatpush.bf16.msrb.mxu2 %v4593_v34 }
  0xc3   :  { %1490 = vmatpush.bf16.msrb.mxu3 %v4598_v38 }
  0xc4   :  { %v4896_v4 = vpop.f32.mrf.mxu2  ;;  %v432_v13 = vpop.f32.mrf.mxu0  ;;  %1452 = vmatpush.bf16.msra.mxu0 %v4541_v20 }
  0xc5   :  { %6266 = vst [vmem:[#allocation111_spill] sm:$0xff] %v4896_v4  ;;  %v4898_v53 = vpop.f32.mrf.mxu3  ;;  %v4901_v23 = vadd.f32 %v432_v13, %v4894_v19  ;;  %v461_v34 = vpop.f32.mrf.mxu1  ;;  %1465 = vmatpush.bf16.msra.mxu1 %v4544_v21  ;;  %v4915_v13 = vperm.slane %v4848_v16, 2 }
  0xc6   :  { %1478 = vmatpush.bf16.msrb.mxu2 %v4605_v46  ;;  %6267 = vst [vmem:[#allocation112_spill] sm:$0xff] %v4898_v53  ;;  %v4906_v7 = vadd.f32 %v461_v34, %v4852_v58 }
  0xc7   :  { %1491 = vmatpush.bf16.msrb.mxu3 %v4608_v52  ;;  %6268 = vst [vmem:[#allocation113_spill] sm:$0xff] %v4901_v23  ;;  %1294 = vmatmul.bf16.vlgmr.msrb.gmra.mxu0 %v4662_v18 }
  0xc8   :  { %6269 = vst [vmem:[#allocation114_spill] sm:$0xff] %v4906_v7  ;;  %1307 = vmatmul.bf16.vlgmr.msrb.gmra.mxu1 %v4666_v22  ;;  %1453 = vmatpush.bf16.msra.mxu0 %v4547_v32 }
  0xc9   :  { %1466 = vmatpush.bf16.msra.mxu1 %v4550_v33  ;;  %6270 = vst [vmem:[#allocation115_spill] sm:$0xff] %v4915_v13 }
  0xca   :  { %1479 = vmatpush.bf16.msrb.mxu2 %v4616_v0 }
  0xcb   :  { %1492 = vmatpush.bf16.msrb.mxu3 %v4622_v2 }
  0xcc   :  { %v490_v34 = vpop.f32.mrf.mxu2  ;;  %v4922_v23 = vpop.f32.mrf.mxu0  ;;  %1454 = vmatpush.bf16.msra.mxu0 %v4557_v41 }
  0xcd   :  { %v4920_v53 = vadd.f32 %v490_v34, %v4915_v13  ;;  %v519_v7 = vpop.f32.mrf.mxu3  ;;  %6272 = vst [vmem:[#allocation117_spill] sm:$0xff] %v4922_v23  ;;  %v4927_v22 = vpop.f32.mrf.mxu1  ;;  %1467 = vmatpush.bf16.msra.mxu1 %v4560_v45 }
  0xce   :  { %1480 = vmatpush.bf16.msrb.mxu2 %v4625_v9  ;;  %v4925_v18 = vadd.f32 %v519_v7, %v4870_v50  ;;  %6274 = vst [vmem:[#allocation119_spill] sm:$0xff] %v4927_v22 }
  0xcf   :  { %1493 = vmatpush.bf16.msrb.mxu3 %v4629_v10  ;;  %6271 = vst [vmem:[#allocation116_spill] sm:$0xff] %v4920_v53 }
  0xd0   :  { %6273 = vst [vmem:[#allocation118_spill] sm:$0xff] %v4925_v18  ;;  %1455 = vmatpush.bf16.msra.mxu0 %v4563_v56 }
  0xd1   :  { %1468 = vmatpush.bf16.msra.mxu1 %v4566_v62 }
  0xd2   :  { %1481 = vmatpush.bf16.msrb.mxu2 %v4635_v28  ;;  %v6289_v28 = vld [vmem:[#allocation69_spill] sm:$0xff] }
  0xd3   :  { %1494 = vmatpush.bf16.msrb.mxu3 %v4640_v31 }
  0xd4   :  { %v4937_v7 = vpop.f32.mrf.mxu2  ;;  %v437_v18 = vpop.f32.mrf.mxu0  ;;  %1456 = vmatpush.bf16.msra.mxu0 %v4569_v11 }
  0xd5   :  { %6275 = vst [vmem:[#allocation120_spill] sm:$0xff] %v4937_v7  ;;  %v4940_v34 = vpop.f32.mrf.mxu3  ;;  %v4944_v22 = vadd.f32 %v437_v18, %v4894_v19  ;;  %v466_v23 = vpop.f32.mrf.mxu1  ;;  %1469 = vmatpush.bf16.msra.mxu1 %v4572_v12  ;;  %v6280_v7 = vld [vmem:[#allocation44_spill] sm:$0xff]  ;;  %v6281_v18 = vld [vmem:[#allocation65_spill] sm:$0xff] }
  0xd6   :  { %1482 = vmatpush.bf16.msrb.mxu2 %v4647_v49  ;;  %6276 = vst [vmem:[#allocation121_spill] sm:$0xff] %v4940_v34  ;;  %v4948_v53 = vadd.f32 %v466_v23, %v4852_v58  ;;  %v6279_v34 = vld [vmem:[#allocation60_spill] sm:$0xff] }
  0xd7   :  { %1495 = vmatpush.bf16.msrb.mxu3 %v4650_v54  ;;  %6277 = vst [vmem:[#allocation122_spill] sm:$0xff] %v4944_v22  ;;  %v6285_v49 = vld [vmem:[#allocation64_spill] sm:$0xff] }
  0xd8   :  { %6278 = vst [vmem:[#allocation123_spill] sm:$0xff] %v4948_v53  ;;  %1501 = vmatpush.bf16.msrb.mxu0 %v4595_v36 }
  0xd9   :  { %1514 = vmatpush.bf16.msrb.mxu1 %v4600_v42 }
  0xda   :  { %1527 = vmatpush.bf16.msra.mxu2 %v4668_v25  ;;  %v6284_v25 = vld [vmem:[#allocation43_spill] sm:$0xff] }
  0xdb   :  { %1540 = vmatpush.bf16.msra.mxu3 %v4670_v26 }
  0xdc   :  { %v495_v22 = vpop.f32.mrf.mxu2  ;;  %v4960_v53 = vpop.f32.mrf.mxu0  ;;  %1502 = vmatpush.bf16.msrb.mxu0 %v6284_v25 }
  0xdd   :  { %1515 = vmatpush.bf16.msrb.mxu1 %v6280_v7  ;;  %v4958_v4 = vadd.f32 %v495_v22, %v4915_v13  ;;  %v524_v23 = vpop.f32.mrf.mxu3  ;;  %6283 = vst [vmem:[#allocation125_spill] sm:$0xff] %v4960_v53  ;;  %v4967_v36 = vpop.f32.mrf.mxu1  ;;  %v6291_v22 = vld [vmem:[#allocation67_spill] sm:$0xff]  ;;  %v6293_v53 = vld [vmem:[#allocation73_spill] sm:$0xff] }
  0xde   :  { %1528 = vmatpush.bf16.msra.mxu2 %v6279_v34  ;;  %v4965_v11 = vadd.f32 %v524_v23, %v4870_v50  ;;  %6287 = vst [vmem:[#allocation127_spill] sm:$0xff] %v4967_v36  ;;  %v6288_v34 = vld [vmem:[#allocation52_spill] sm:$0xff]  ;;  %v6297_v36 = vld [vmem:[#allocation71_spill] sm:$0xff] }
  0xdf   :  { %1541 = vmatpush.bf16.msra.mxu3 %v4682_v3  ;;  %6282 = vst [vmem:[#allocation124_spill] sm:$0xff] %v4958_v4  ;;  %v6292_v4 = vld [vmem:[#allocation56_spill] sm:$0xff] }
  0xe0   :  { %6286 = vst [vmem:[#allocation126_spill] sm:$0xff] %v4965_v11  ;;  %v6296_v11 = vld [vmem:[#allocation55_spill] sm:$0xff] }
  0xe1   :  { %1516 = vmatpush.bf16.msrb.mxu1 %v6288_v34 }
  0xe2   :  { %1529 = vmatpush.bf16.msra.mxu2 %v6285_v49 }
  0xe3   :  { %1542 = vmatpush.bf16.msra.mxu3 %v6281_v18  ;;  %v6290_v18 = vld [vmem:[#allocation50_spill] sm:$0xff] }
  0xe4   :  { %1503 = vmatpush.bf16.msrb.mxu0 %v6290_v18  ;;  %v4975_v25 = vpop.f32.mrf.mxu2  ;;  %v442_v23 = vpop.f32.mrf.mxu0 }
  0xe5   :  { %1517 = vmatpush.bf16.msrb.mxu1 %v6292_v4  ;;  %6294 = vst [vmem:[#allocation128_spill] sm:$0xff] %v4975_v25  ;;  %v4977_v49 = vpop.f32.mrf.mxu3  ;;  %v4982_v34 = vadd.f32 %v442_v23, %v4894_v19  ;;  %v6301_v4 = vld [vmem:[#allocation78_spill] sm:$0xff]  ;;  %v6303_v25 = vld [vmem:[#allocation75_spill] sm:$0xff] }
  0xe6   :  { %1530 = vmatpush.bf16.msra.mxu2 %v6291_v22  ;;  %6295 = vst [vmem:[#allocation129_spill] sm:$0xff] %v4977_v49  ;;  %v6300_v22 = vld [vmem:[#allocation63_spill] sm:$0xff]  ;;  %v6304_v49 = vld [vmem:[#allocation68_spill] sm:$0xff] }
  0xe7   :  { %1543 = vmatpush.bf16.msra.mxu3 %v6289_v28  ;;  %6298 = vst [vmem:[#allocation130_spill] sm:$0xff] %v4982_v34  ;;  %v471_v28 = vpop.f32.mrf.mxu1 }
  0xe8   :  { %1504 = vmatpush.bf16.msrb.mxu0 %v6296_v11  ;;  %v4985_v18 = vadd.f32 %v471_v28, %v4852_v58  ;;  %v6307_v28 = vld [vmem:[#allocation66_spill] sm:$0xff] }
  0xe9   :  { %1518 = vmatpush.bf16.msrb.mxu1 %v6300_v22  ;;  %v5024_v22 = vperm.slane %v4848_v16, 4 }
  0xea   :  { %1531 = vmatpush.bf16.msra.mxu2 %v6297_v36  ;;  %6299 = vst [vmem:[#allocation131_spill] sm:$0xff] %v4985_v18 }
  0xeb   :  { %1544 = vmatpush.bf16.msra.mxu3 %v6293_v53  ;;  %v6302_v53 = vld [vmem:[#allocation61_spill] sm:$0xff]  ;;  %6319 = vst [vmem:[#allocation140_spill] sm:$0xff] %v5024_v22 }
  0xec   :  { %1505 = vmatpush.bf16.msrb.mxu0 %v6302_v53  ;;  %v500_v36 = vpop.f32.mrf.mxu2  ;;  %v4996_v11 = vpop.f32.mrf.mxu0 }
  0xed   :  { %1519 = vmatpush.bf16.msrb.mxu1 %v6304_v49  ;;  %v4994_v23 = vadd.f32 %v500_v36, %v4915_v13  ;;  %v529_v34 = vpop.f32.mrf.mxu3  ;;  %6306 = vst [vmem:[#allocation133_spill] sm:$0xff] %v4996_v11  ;;  %v5008_v36 = vperm.slane %v4848_v16, 5  ;;  %v6313_v11 = vld [vmem:[#allocation76_spill] sm:$0xff] }
  0xee   :  { %1532 = vmatpush.bf16.msra.mxu2 %v6303_v25  ;;  %v5001_v18 = vadd.f32 %v529_v34, %v4870_v50  ;;  %v6309_v25 = vld [vmem:[#allocation72_spill] sm:$0xff]  ;;  %v6315_v34 = vld [vmem:[#allocation74_spill] sm:$0xff] }
  0xef   :  { %1545 = vmatpush.bf16.msra.mxu3 %v6301_v4  ;;  %6305 = vst [vmem:[#allocation132_spill] sm:$0xff] %v4994_v23  ;;  %v473_v53 = vpop.f32.mrf.mxu1  ;;  %v6311_v4 = vld [vmem:[#allocation85_spill] sm:$0xff] }
  0xf0   :  { %1506 = vmatpush.bf16.msrb.mxu0 %v6307_v28  ;;  %6308 = vst [vmem:[#allocation134_spill] sm:$0xff] %v5001_v18 }
  0xf1   :  { %1520 = vmatpush.bf16.msrb.mxu1 %v6309_v25  ;;  %6312 = vst [vmem:[#allocation135_spill] sm:$0xff] %v5008_v36 }
  0xf2   :  { %1533 = vmatpush.bf16.msra.mxu2 %v4743_v35 }
  0xf3   :  { %1546 = vmatpush.bf16.msra.mxu3 %v4748_v6  ;;  %v6310_v6 = vld [vmem:[#allocation70_spill] sm:$0xff] }
  0xf4   :  { %1507 = vmatpush.bf16.msrb.mxu0 %v6310_v6  ;;  %v5011_v23 = vpop.f32.mrf.mxu2  ;;  %v5013_v28 = vpop.f32.mrf.mxu0 }
  0xf5   :  { %1521 = vmatpush.bf16.msrb.mxu1 %v6313_v11  ;;  %6314 = vst [vmem:[#allocation136_spill] sm:$0xff] %v5011_v23  ;;  %v531_v35 = vpop.f32.mrf.mxu3 }
  0xf6   :  { %1534 = vmatpush.bf16.msra.mxu2 %v6311_v4 }
  0xf7   :  { %1547 = vmatpush.bf16.msra.mxu3 %v4760_v43  ;;  %v572_v18 = vpop.f32.mrf.mxu1 }
  0xf8   :  { %1508 = vmatpush.bf16.msrb.mxu0 %v6315_v34  ;;  %v5017_v25 = vadd.f32 %v572_v18, %v5008_v36 }
  0xfa   :  { %6316 = vst [vmem:[#allocation137_spill] sm:$0xff] %v5017_v25 }
  0xfc   :  { %v1191_v43 = vpop.f32.mrf.mxu2  ;;  %v5019_v49 = vpop.f32.mrf.mxu0 }
  0xfd   :  { %v1204_v6 = vpop.f32.mrf.mxu3  ;;  %6317 = vst [vmem:[#allocation138_spill] sm:$0xff] %v5019_v49  ;;  %v474_v49 = vadd.f32 %v473_v53, %v4852_v58 }
  0xfe   :  { %v1205_v26 = vadd.f32 %v1204_v6, %v1191_v43  ;;  %v532_v6 = vadd.f32 %v531_v35, %v4870_v50 }
  0xff   :  { %v5021_v4 = vpop.f32.mrf.mxu1 }
 0x100   :  { %6318 = vst [vmem:[#allocation139_spill] sm:$0xff] %v5021_v4 }
 0x104   :  { %v1193_v11 = vpop.f32.mrf.mxu2  ;;  %v548_v56 = vpop.f32.mrf.mxu0 }
 0x105   :  { %v1206_v23 = vpop.f32.mrf.mxu3  ;;  %v5027_v3 = vadd.f32 %v548_v56, %v5024_v22 }
 0x107   :  { %6320 = vst [vmem:[#allocation141_spill] sm:$0xff] %v5027_v3  ;;  %v577_v34 = vpop.f32.mrf.mxu1 }
 0x108   :  { %v5030_v7 = vadd.f32 %v577_v34, %v5008_v36 }
 0x10a   :  { %6321 = vst [vmem:[#allocation142_spill] sm:$0xff] %v5030_v7  ;;  %v428_v7 = vadd.f32 %v4856_v14, %v4894_v19 }
 0x10c   :  { %v1217_v18 = vpop.f32.mrf.mxu2  ;;  %v5032_v9 = vpop.f32.mrf.mxu0 }
 0x10d   :  { %v1230_v25 = vpop.f32.mrf.mxu3  ;;  %6322 = vst [vmem:[#allocation143_spill] sm:$0xff] %v5032_v9 }
 0x10e   :  { %v1231_v4 = vadd.f32 %v1230_v25, %v1217_v18  ;;  %v1338_v25 = vadd.f32 %v1205_v26, %v428_v7 }
 0x10f   :  { %v5035_v41 = vpop.f32.mrf.mxu1 }
 0x110   :  { %6323 = vst [vmem:[#allocation144_spill] sm:$0xff] %v5035_v41  ;;  %v1339_v16 = vadd.f32 %v1231_v4, %v474_v49  ;;  %v3930_v49 = vmul.f32 -1.442695, %v1338_v25 }
 0x112   :  { %v3931_v11 = vmul.f32 -1.442695, %v1339_v16 }
 0x114   :  { %v1219_v23 = vpop.f32.mrf.mxu2  ;;  %4140 = vpow2.f32 %v3931_v11  ;;  %v553_v3 = vpop.f32.mrf.mxu0 }
 0x115   :  { %v1232_v56 = vpop.f32.mrf.mxu3  ;;  %v5038_v42 = vadd.f32 %v553_v3, %v5024_v22  ;;  %4142 = vpow2.f32 %v3930_v49 }
 0x117   :  { %6324 = vst [vmem:[#allocation145_spill] sm:$0xff] %v5038_v42  ;;  %v582_v34 = vpop.f32.mrf.mxu1 }
 0x118   :  { %v5043_v9 = vadd.f32 %v582_v34, %v5008_v36 }
 0x11a   :  { %6325 = vst [vmem:[#allocation146_spill] sm:$0xff] %v5043_v9  ;;  %v4141_v53 = vpop.eup %4140 }
 0x11b   :  { %v1355_v43 = vadd.f32 1.0, %v4141_v53  ;;  %v4143_v41 = vpop.eup %4142 }
 0x11c   :  { %v1269_v18 = vpop.f32.mrf.mxu2  ;;  %v5045_v16 = vpop.f32.mrf.mxu0 }
 0x11d   :  { %v1282_v4 = vpop.f32.mrf.mxu3  ;;  %6326 = vst [vmem:[#allocation147_spill] sm:$0xff] %v5045_v16  ;;  %4144 = vrcp.f32 %v1355_v43  ;;  %v1384_v50 = vand.u32 2147483648, %v1355_v43  ;;  %vm1378_vm1 = vweird.f32 %v1355_v43 }
 0x11e   :  { %v1283_v11 = vadd.f32 %v1282_v4, %v1269_v18  ;;  %v5056_v18 = vadd.f32 1.0, %v4143_v41 }
 0x11f   :  { %v5048_v3 = vpop.f32.mrf.mxu1 }
 0x120   :  { %6327 = vst [vmem:[#allocation148_spill] sm:$0xff] %v5048_v3  ;;  %v1341_v23 = vadd.f32 %v1283_v11, %v532_v6  ;;  %vm1363_vm9 = vweird.f32 %v5056_v18 }
 0x122   :  { %v3933_v14 = vmul.f32 -1.442695, %v1341_v23 }
 0x123   :  { %v4145_v35 = vpop.eup %4144 }
 0x124   :  { %4146 = vpow2.f32 %v3933_v14  ;;  %v1271_v56 = vpop.f32.mrf.mxu2  ;;  %v558_v34 = vpop.f32.mrf.mxu0  ;;  %v1374_v49 = vmul.f32 %v4145_v35, %v1355_v43  ;;  %vm1379_vm0 = vweird.f32 %v4145_v35 }
 0x125   :  { %v1284_v26 = vpop.f32.mrf.mxu3  ;;  %v5051_v7 = vadd.f32 %v558_v34, %v5024_v22  ;;  %vm1380_vm2 = vmor %vm1378_vm1, %vm1379_vm0 }
 0x126   :  { %v1375_v23 = vsub.f32 1.0, %v1374_v49 }
 0x127   :  { %6328 = vst [vmem:[#allocation149_spill] sm:$0xff] %v5051_v7  ;;  %v587_v25 = vpop.f32.mrf.mxu1  ;;  %v486_v7 = vadd.f32 %v4876_v17, %v4915_v13 }
 0x128   :  { %v5054_v16 = vadd.f32 %v587_v25, %v5008_v36  ;;  %v1376_v56 = vmul.f32 %v4145_v35, %v1375_v23 }
 0x12a   :  { %6329 = vst [vmem:[#allocation150_spill] sm:$0xff] %v5054_v16  ;;  %v4147_v53 = vpop.eup %4146  ;;  %v1377_v3 = vadd.f32 %v4145_v35, %v1376_v56  ;;  %v1382_v16 = vand.u32 2147483647, %v1355_v43 }
 0x12b   :  { %v1357_v4 = vadd.f32 1.0, %v4147_v53  ;;  %v689_v53 = vld [vmem:[#allocation8 + $0x9] ss:$2 sm:$0x3] }
 0x12c   :  { %v5058_v6 = vpop.f32.mrf.mxu0  ;;  %v5067_v23 = vperm.slane %v689_v53, 1  ;;  %v1381_v13 = vsel %vm1380_vm2, %v4145_v35, %v1377_v3  ;;  %vm1383_vm3 = vcmp.eq.f32.partialorder %v1382_v16, 8.507059e+37 }
 0x12d   :  { %4148 = vrcp.f32 %v1357_v4  ;;  %6330 = vst [vmem:[#allocation151_spill] sm:$0xff] %v5058_v6  ;;  %v1414_v12 = vand.u32 2147483648, %v1357_v4  ;;  %vm1408_vm5 = vweird.f32 %v1357_v4 }
 0x12e   :  { %4150 = vrcp.f32 %v5056_v18 }
 0x12f   :  { %v589_v11 = vpop.f32.mrf.mxu1 }
 0x130   :  { %v590_v43 = vadd.f32 %v589_v11, %v5008_v36  ;;  %v1369_v11 = vand.u32 2147483648, %v5056_v18  ;;  %v6361_v36 = vld [vmem:[#allocation45_spill] sm:$0xff] }
 0x133   :  { %v4149_v14 = vpop.eup %4148 }
 0x134   :  { %v5061_v34 = vpop.eup %4150  ;;  %v1404_v26 = vmul.f32 %v4149_v14, %v1357_v4  ;;  %v1243_v25 = vpop.f32.mrf.mxu0  ;;  %vm1409_vm4 = vweird.f32 %v4149_v14 }
 0x135   :  { %v1359_v6 = vmul.f32 %v5061_v34, %v5056_v18  ;;  %vm1410_vm6 = vmor %vm1408_vm5, %vm1409_vm4  ;;  %vm1364_vm7 = vweird.f32 %v5061_v34 }
 0x136   :  { %v1405_v41 = vsub.f32 1.0, %v1404_v26  ;;  %vm1365_vm10 = vmor %vm1363_vm9, %vm1364_vm7 }
 0x137   :  { %v1256_v42 = vpop.f32.mrf.mxu1  ;;  %v1360_v32 = vsub.f32 1.0, %v1359_v6  ;;  %v1415_v6 = vor.u32 1.1754944e-38, %v1414_v12 }
 0x138   :  { %v1257_v9 = vadd.f32 %v1256_v42, %v1243_v25  ;;  %v1406_v19 = vmul.f32 %v4149_v14, %v1405_v41  ;;  %v1385_v42 = vor.u32 1.1754944e-38, %v1384_v50 }
 0x139   :  { %v1361_v46 = vmul.f32 %v5061_v34, %v1360_v32 }
 0x13a   :  { %v1340_v49 = vadd.f32 %v1257_v9, %v486_v7  ;;  %v1407_v54 = vadd.f32 %v4149_v14, %v1406_v19  ;;  %v1386_v9 = vsel %vm1383_vm3, %v1385_v42, %v1381_v13  ;;  %v5080_v42 = vpop.permute.xlu0 %1439 }
 0x13b   :  { %v1362_v19 = vadd.f32 %v5061_v34, %v1361_v46  ;;  %vm3935_vm12 = vcmp.gt.s32.totalorder %v5080_v42, 7  ;;  %vm3934_vm1 = vcmp.gt.s32.totalorder %v5080_v42, 0 }
 0x13c   :  { %v1321_v58 = vpop.f32.mrf.mxu2  ;;  %v3932_v17 = vmul.f32 -1.442695, %v1340_v49  ;;  %v1245_v25 = vpop.f32.mrf.mxu0  ;;  %v1411_v3 = vsel %vm1410_vm6, %v4149_v14, %v1407_v54  ;;  %v1367_v54 = vand.u32 2147483647, %v5056_v18  ;;  %v544_v18 = vadd.f32 %v5013_v28, %v5024_v22 }
 0x13d   :  { %v1334_v0 = vpop.f32.mrf.mxu3  ;;  %v1366_v46 = vsel %vm1365_vm10, %v5061_v34, %v1362_v19 }
 0x13e   :  { %v1335_v26 = vadd.f32 %v1334_v0, %v1321_v58  ;;  %4152 = vpow2.f32 %v3932_v17  ;;  %v1412_v0 = vand.u32 2147483647, %v1357_v4  ;;  %v5075_v17 = vperm.slane %v689_v53, 0 }
 0x13f   :  { %v1258_v7 = vpop.f32.mrf.mxu1  ;;  %vm1368_vm11 = vcmp.eq.f32.partialorder %v1367_v54, 8.507059e+37  ;;  %v6334_v54 = vld [vmem:[#allocation79_spill] sm:$0xff] }
 0x140   :  { %v1419_v56 = vadd.f32 %v1335_v26, %v5067_v23  ;;  %vm1413_vm8 = vcmp.eq.f32.partialorder %v1412_v0, 8.507059e+37  ;;  %6331 = vst [vmem:[#allocation152_spill] sm:$0xff] %v5075_v17  ;;  %v1370_v26 = vor.u32 1.1754944e-38, %v1369_v11 }
 0x141   :  { %v1416_v49 = vsel %vm1413_vm8, %v1415_v6, %v1411_v3 }
 0x142   :  { %v1421_v41 = vmul.f32 %v1419_v56, %v1386_v9  ;;  %v1427_v14 = vsub.f32 1.0, %v1416_v49  ;;  %v6332_v9 = vld [vmem:[#allocation57_spill] sm:$0xff] }
 0x143   :  { %v1431_v7 = vmul.f32 %v1416_v49, %v6332_v9 }
 0x144   :  { %v1423_v58 = vadd.f32 %v1421_v41, %v590_v43  ;;  %v1323_v50 = vpop.f32.mrf.mxu2  ;;  %v4153_v35 = vpop.eup %4152  ;;  %v1371_v43 = vsel %vm1368_vm11, %v1370_v26, %v1366_v46 }
 0x145   :  { %v1336_v16 = vpop.f32.mrf.mxu3  ;;  %v1356_v13 = vadd.f32 1.0, %v4153_v35  ;;  %v1295_v32 = vpop.f32.mrf.mxu0 }
 0x146   :  { %4154 = vtanh.f32 %v1423_v58  ;;  %v4300_v16 = vld [vmem:[#allocation5 + $0x8] sm:$0xff] }
 0x147   :  { %4156 = vrcp.f32 %v1356_v13  ;;  %v1308_v4 = vpop.f32.mrf.mxu1  ;;  %v1399_v11 = vand.u32 2147483648, %v1356_v13  ;;  %vm1393_vm14 = vweird.f32 %v1356_v13 }
 0x148   :  { %v1309_v12 = vadd.f32 %v1308_v4, %v1295_v32  ;;  %v1397_v32 = vand.u32 2147483647, %v1356_v13  ;;  %v6335_v4 = vld [vmem:[#allocation89_spill] sm:$0xff] }
 0x149   :  { %v1400_v46 = vor.u32 1.1754944e-38, %v1399_v11  ;;  %v6345_v11 = vld [vmem:[#allocation80_spill] sm:$0xff] }
 0x14a   :  { %v1418_v25 = vadd.f32 %v1309_v12, %v5075_v17  ;;  %vm1398_vm0 = vcmp.eq.f32.partialorder %v1397_v32, 8.507059e+37  ;;  %v6347_v32 = vld [vmem:[#allocation84_spill] sm:$0xff] }
 0x14c   :  { %v4155_v56 = vpop.eup %4154  ;;  %v1420_v41 = vmul.f32 %v1418_v25, %v1371_v43  ;;  %v6337_v25 = vld [vmem:[#allocation93_spill] sm:$0xff] }
 0x14d   :  { %v1429_v53 = vmul.f32 %v4155_v56, %v1427_v14  ;;  %v4157_v0 = vpop.eup %4156  ;;  %v1297_v3 = vpop.f32.mrf.mxu0  ;;  %v6336_v56 = vld [vmem:[#allocation82_spill] sm:$0xff]  ;;  %v4301_v43 = vld [vmem:[#allocation5] sm:$0xff] }
 0x14e   :  { %v1389_v58 = vmul.f32 %v4157_v0, %v1356_v13  ;;  %v1422_v50 = vadd.f32 %v1420_v41, %v544_v18  ;;  %vm1394_vm13 = vweird.f32 %v4157_v0  ;;  %v6338_v41 = vld [vmem:[#allocation86_spill] sm:$0xff] }
 0x14f   :  { %v5087_v34 = vadd.f32 %v1431_v7, %v1429_v53  ;;  %v1310_v6 = vpop.f32.mrf.mxu1  ;;  %vm1395_vm15 = vmor %vm1393_vm14, %vm1394_vm13 }
 0x150   :  { %v1390_v19 = vsub.f32 1.0, %v1389_v58  ;;  %4158 = vtanh.f32 %v1422_v50  ;;  %v6339_v58 = vld [vmem:[#allocation97_spill] sm:$0xff]  ;;  %v6341_v50 = vld [vmem:[#allocation92_spill] sm:$0xff] }
 0x151   :  { %6333 = vst [vmem:[#allocation57_spill] sm:$0xff] %v5087_v34  ;;  %v5092_v35 = vsel %vm3935_vm12, %v5087_v34, %v4300_v16  ;;  %v6342_v16 = vld [vmem:[#allocation96_spill] sm:$0xff]  ;;  %v6343_v6 = vld [vmem:[#allocation77_spill] sm:$0xff] }
 0x152   :  { %v1448_v28 = vpack.c.bf16 %v5092_v35, %v5092_v35  ;;  %v1391_v49 = vmul.f32 %v4157_v0, %v1390_v19  ;;  %v6344_v19 = vld [vmem:[#allocation88_spill] sm:$0xff]  ;;  %v6360_v34 = vld [vmem:[#allocation25_spill] sm:$0xff] }
 0x154   :  { %1470 = vmatmul.bf16.vlgmr.msra.gmra.mxu1 %v1448_v28  ;;  %1496 = vmatmul.bf16.vlgmr.msrb.gmra.mxu3 %v1448_v28  ;;  %v1392_v12 = vadd.f32 %v4157_v0, %v1391_v49  ;;  %v6346_v49 = vld [vmem:[#allocation91_spill] sm:$0xff] }
 0x155   :  { %1566 = vmatpush.bf16.msra.mxu1 %v6334_v54  ;;  %1592 = vmatpush.bf16.msrb.mxu3 %v6335_v4 }
 0x156   :  { %v1396_v14 = vsel %vm1395_vm15, %v4157_v0, %v1392_v12  ;;  %v4159_v9 = vpop.eup %4158  ;;  %v6348_v12 = vld [vmem:[#allocation95_spill] sm:$0xff] }
 0x157   :  { %v1401_v26 = vsel %vm1398_vm0, %v1400_v46, %v1396_v14  ;;  %v6349_v46 = vld [vmem:[#allocation90_spill] sm:$0xff] }
 0x158   :  { %v1426_v53 = vsub.f32 1.0, %v1401_v26  ;;  %v1430_v18 = vmul.f32 %v4301_v43, %v1401_v26  ;;  %v6350_v14 = vld [vmem:[#allocation94_spill] sm:$0xff] }
 0x159   :  { %1567 = vmatpush.bf16.msra.mxu1 %v6336_v56  ;;  %1593 = vmatpush.bf16.msrb.mxu3 %v6337_v25  ;;  %v6351_v26 = vld [vmem:[#allocation98_spill] sm:$0xff] }
 0x15a   :  { %v1428_v7 = vmul.f32 %v4159_v9, %v1426_v53  ;;  %v6353_v53 = vld [vmem:[#allocation33_spill] sm:$0xff]  ;;  %v6354_v9 = vld [vmem:[#allocation35_spill] sm:$0xff] }
 0x15c   :  { %v5103_v13 = vadd.f32 %v1430_v18, %v1428_v7  ;;  %v6355_v7 = vld [vmem:[#allocation21_spill] sm:$0xff] }
 0x15d   :  { %1568 = vmatpush.bf16.msra.mxu1 %v6338_v41  ;;  %1594 = vmatpush.bf16.msrb.mxu3 %v6339_v58  ;;  %v6357_v18 = vld [vmem:[#allocation41_spill] sm:$0xff] }
 0x15e   :  { %6340 = vst [vmem:[#allocation79_spill] sm:$0xff] %v5103_v13  ;;  %v5108_v0 = vsel %vm3934_vm1, %v5103_v13, %v4301_v43  ;;  %v6356_v43 = vld [vmem:[#allocation37_spill] sm:$0xff]  ;;  %v6359_v13 = vld [vmem:[#allocation54_spill] sm:$0xff] }
 0x15f   :  { %v1447_v3 = vpack.c.bf16 %v5108_v0, %v5108_v0 }
 0x161   :  { %1569 = vmatpush.bf16.msra.mxu1 %v6341_v50  ;;  %1595 = vmatpush.bf16.msrb.mxu3 %v4806_v30 }
 0x162   :  { %1457 = vmatmul.bf16.vlgmr.msra.gmra.mxu0 %v1447_v3  ;;  %1483 = vmatmul.bf16.vlgmr.msrb.gmra.mxu2 %v1447_v3 }
 0x163   :  { %1553 = vmatpush.bf16.msra.mxu0 %v6343_v6  ;;  %1579 = vmatpush.bf16.msrb.mxu2 %v6344_v19 }
 0x164   :  { %1522 = vmatmul.bf16.vlgmr.msrb.gmra.mxu1 %v1448_v28  ;;  %1548 = vmatmul.bf16.vlgmr.msra.gmra.mxu3 %v1448_v28 }
 0x165   :  { %1570 = vmatpush.bf16.msra.mxu1 %v6342_v16  ;;  %1596 = vmatpush.bf16.msrb.mxu3 %v4818_v39 }
 0x167   :  { %1554 = vmatpush.bf16.msra.mxu0 %v6345_v11  ;;  %1580 = vmatpush.bf16.msrb.mxu2 %v6346_v49 }
 0x169   :  { %1571 = vmatpush.bf16.msra.mxu1 %v4803_v5  ;;  %1597 = vmatpush.bf16.msrb.mxu3 %v4831_v57 }
 0x16b   :  { %1555 = vmatpush.bf16.msra.mxu0 %v6347_v32  ;;  %1581 = vmatpush.bf16.msrb.mxu2 %v6348_v12 }
 0x16d   :  { %1572 = vmatpush.bf16.msra.mxu1 %v4815_v27  ;;  %1598 = vmatpush.bf16.msrb.mxu3 %v4840_v55 }
 0x16f   :  { %1556 = vmatpush.bf16.msra.mxu0 %v6349_v46  ;;  %1582 = vmatpush.bf16.msrb.mxu2 %v4800_v51 }
 0x171   :  { %1573 = vmatpush.bf16.msra.mxu1 %v4827_v44  ;;  %1599 = vmatpush.bf16.msrb.mxu3 %v4846_v61 }
 0x172   :  { %1509 = vmatmul.bf16.vlgmr.msrb.gmra.mxu0 %v1447_v3  ;;  %1535 = vmatmul.bf16.vlgmr.msra.gmra.mxu2 %v1447_v3 }
 0x173   :  { %1557 = vmatpush.bf16.msra.mxu0 %v6350_v14  ;;  %1583 = vmatpush.bf16.msrb.mxu2 %v4812_v40 }
 0x174   :  { %1574 = vmatmul.bf16.vlgmr.msra.gmra.mxu1 %v1448_v28  ;;  %1600 = vmatmul.bf16.vlgmr.msrb.gmra.mxu3 %v1448_v28  ;;  %v6352_v28 = vld [vmem:[#allocation100_spill] sm:$0xff] }
 0x175   :  { %1724 = vmatpush.bf16.msrb.mxu1 %v4520_v48  ;;  %1750 = vmatpush.bf16.msra.mxu3 %v4578_v15 }
 0x177   :  { %1558 = vmatpush.bf16.msra.mxu0 %v6351_v26  ;;  %1584 = vmatpush.bf16.msrb.mxu2 %v4824_v63 }
 0x179   :  { %1725 = vmatpush.bf16.msrb.mxu1 %v4530_v60  ;;  %1751 = vmatpush.bf16.msra.mxu3 %v4587_v24 }
 0x17b   :  { %1559 = vmatpush.bf16.msra.mxu0 %v4809_v29  ;;  %1585 = vmatpush.bf16.msrb.mxu2 %v4836_v37 }
 0x17d   :  { %1726 = vmatpush.bf16.msrb.mxu1 %v4536_v8  ;;  %1752 = vmatpush.bf16.msra.mxu3 %v4598_v38  ;;  %v6401_v8 = vld [vmem:[#allocation107_spill] sm:$0xff] }
 0x17f   :  { %1560 = vmatpush.bf16.msra.mxu0 %v6352_v28  ;;  %1586 = vmatpush.bf16.msrb.mxu2 %v4843_v1 }
 0x181   :  { %1727 = vmatpush.bf16.msrb.mxu1 %v4544_v21  ;;  %1753 = vmatpush.bf16.msra.mxu3 %v4608_v52  ;;  %v6368_v52 = vld [vmem:[#allocation29_spill] sm:$0xff] }
 0x182   :  { %1561 = vmatmul.bf16.vlgmr.msra.gmra.mxu0 %v1447_v3  ;;  %1587 = vmatmul.bf16.vlgmr.msrb.gmra.mxu2 %v1447_v3  ;;  %v6358_v3 = vld [vmem:[#allocation32_spill] sm:$0xff]  ;;  %v6371_v21 = vld [vmem:[#allocation65_spill] sm:$0xff] }
 0x183   :  { %1711 = vmatpush.bf16.msrb.mxu0 %v4518_v47  ;;  %1737 = vmatpush.bf16.msra.mxu2 %v6353_v53 }
 0x185   :  { %1728 = vmatpush.bf16.msrb.mxu1 %v4550_v33  ;;  %1754 = vmatpush.bf16.msra.mxu3 %v4622_v2  ;;  %v6364_v2 = vld [vmem:[#allocation27_spill] sm:$0xff]  ;;  %v6367_v33 = vld [vmem:[#allocation62_spill] sm:$0xff] }
 0x187   :  { %1712 = vmatpush.bf16.msrb.mxu0 %v4527_v59  ;;  %1738 = vmatpush.bf16.msra.mxu2 %v6354_v9 }
 0x189   :  { %1729 = vmatpush.bf16.msrb.mxu1 %v4560_v45  ;;  %1755 = vmatpush.bf16.msra.mxu3 %v4629_v10  ;;  %v6362_v10 = vld [vmem:[#allocation40_spill] sm:$0xff]  ;;  %v6363_v45 = vld [vmem:[#allocation59_spill] sm:$0xff] }
 0x18b   :  { %1713 = vmatpush.bf16.msrb.mxu0 %v6355_v7  ;;  %1739 = vmatpush.bf16.msra.mxu2 %v6356_v43 }
 0x18d   :  { %1730 = vmatpush.bf16.msrb.mxu1 %v4566_v62  ;;  %1756 = vmatpush.bf16.msra.mxu3 %v4640_v31  ;;  %v6365_v62 = vld [vmem:[#allocation47_spill] sm:$0xff]  ;;  %v6366_v31 = vld [vmem:[#allocation44_spill] sm:$0xff] }
 0x18f   :  { %1714 = vmatpush.bf16.msrb.mxu0 %v4541_v20  ;;  %1740 = vmatpush.bf16.msra.mxu2 %v6357_v18 }
 0x191   :  { %1731 = vmatpush.bf16.msrb.mxu1 %v6358_v3  ;;  %1757 = vmatpush.bf16.msra.mxu3 %v6359_v13  ;;  %v6369_v3 = vld [vmem:[#allocation49_spill] sm:$0xff]  ;;  %v6370_v13 = vld [vmem:[#allocation52_spill] sm:$0xff] }
 0x193   :  { %1715 = vmatpush.bf16.msrb.mxu0 %v6360_v34  ;;  %1741 = vmatpush.bf16.msra.mxu2 %v6361_v36  ;;  %v6372_v36 = vld [vmem:[#allocation31_spill] sm:$0xff] }
 0x195   :  { %1776 = vmatpush.bf16.msra.mxu1 %v6362_v10  ;;  %1802 = vmatpush.bf16.msrb.mxu3 %v6363_v45  ;;  %v6373_v10 = vld [vmem:[#allocation53_spill] sm:$0xff]  ;;  %v6374_v45 = vld [vmem:[#allocation38_spill] sm:$0xff] }
 0x197   :  { %1716 = vmatpush.bf16.msrb.mxu0 %v6364_v2  ;;  %1742 = vmatpush.bf16.msra.mxu2 %v6365_v62  ;;  %v6375_v2 = vld [vmem:[#allocation58_spill] sm:$0xff]  ;;  %v6376_v62 = vld [vmem:[#allocation56_spill] sm:$0xff] }
 0x199   :  { %1777 = vmatpush.bf16.msra.mxu1 %v6366_v31  ;;  %1803 = vmatpush.bf16.msrb.mxu3 %v6367_v33  ;;  %v6377_v31 = vld [vmem:[#allocation69_spill] sm:$0xff]  ;;  %v6378_v33 = vld [vmem:[#allocation43_spill] sm:$0xff] }
 0x19b   :  { %1717 = vmatpush.bf16.msrb.mxu0 %v6368_v52  ;;  %1743 = vmatpush.bf16.msra.mxu2 %v6369_v3  ;;  %v6379_v52 = vld [vmem:[#allocation60_spill] sm:$0xff]  ;;  %v6380_v3 = vld [vmem:[#allocation63_spill] sm:$0xff] }
 0x19d   :  { %1778 = vmatpush.bf16.msra.mxu1 %v6370_v13  ;;  %1804 = vmatpush.bf16.msrb.mxu3 %v6371_v21  ;;  %v6381_v13 = vld [vmem:[#allocation73_spill] sm:$0xff]  ;;  %v6382_v21 = vld [vmem:[#allocation50_spill] sm:$0xff] }
 0x19f   :  { %1718 = vmatpush.bf16.msrb.mxu0 %v6372_v36  ;;  %1744 = vmatpush.bf16.msra.mxu2 %v6373_v10  ;;  %v6383_v36 = vld [vmem:[#allocation64_spill] sm:$0xff] }
 0x1a0   :  { %v6384_v10 = vld [vmem:[#allocation68_spill] sm:$0xff] }
 0x1a1   :  { %1779 = vmatpush.bf16.msra.mxu1 %v6376_v62  ;;  %1805 = vmatpush.bf16.msrb.mxu3 %v6377_v31  ;;  %v6387_v62 = vld [vmem:[#allocation67_spill] sm:$0xff]  ;;  %v6388_v31 = vld [vmem:[#allocation72_spill] sm:$0xff] }
 0x1a3   :  { %1763 = vmatpush.bf16.msra.mxu0 %v6374_v45  ;;  %1789 = vmatpush.bf16.msrb.mxu2 %v6375_v2  ;;  %v6385_v45 = vld [vmem:[#allocation78_spill] sm:$0xff]  ;;  %v6386_v2 = vld [vmem:[#allocation55_spill] sm:$0xff] }
 0x1a5   :  { %1780 = vmatpush.bf16.msra.mxu1 %v6380_v3  ;;  %1806 = vmatpush.bf16.msrb.mxu3 %v6381_v13  ;;  %v6391_v3 = vld [vmem:[#allocation71_spill] sm:$0xff]  ;;  %v6392_v13 = vld [vmem:[#allocation76_spill] sm:$0xff] }
 0x1a7   :  { %1764 = vmatpush.bf16.msra.mxu0 %v6378_v33  ;;  %1790 = vmatpush.bf16.msrb.mxu2 %v6379_v52  ;;  %v6389_v33 = vld [vmem:[#allocation83_spill] sm:$0xff]  ;;  %v6390_v52 = vld [vmem:[#allocation61_spill] sm:$0xff] }
 0x1a9   :  { %1781 = vmatpush.bf16.msra.mxu1 %v6384_v10  ;;  %1807 = vmatpush.bf16.msrb.mxu3 %v6385_v45  ;;  %v6395_v10 = vld [vmem:[#allocation75_spill] sm:$0xff]  ;;  %v6396_v45 = vld [vmem:[#allocation70_spill] sm:$0xff] }
 0x1ab   :  { %1765 = vmatpush.bf16.msra.mxu0 %v6382_v21  ;;  %1791 = vmatpush.bf16.msrb.mxu2 %v6383_v36  ;;  %v6393_v21 = vld [vmem:[#allocation87_spill] sm:$0xff]  ;;  %v6394_v36 = vld [vmem:[#allocation66_spill] sm:$0xff] }
 0x1ad   :  { %1782 = vmatpush.bf16.msra.mxu1 %v6388_v31  ;;  %1808 = vmatpush.bf16.msrb.mxu3 %v6389_v33  ;;  %v6399_v31 = vld [vmem:[#allocation85_spill] sm:$0xff] }
 0x1af   :  { %1766 = vmatpush.bf16.msra.mxu0 %v6386_v2  ;;  %1792 = vmatpush.bf16.msrb.mxu2 %v6387_v62  ;;  %v6397_v2 = vld [vmem:[#allocation81_spill] sm:$0xff]  ;;  %v6398_v62 = vld [vmem:[#allocation74_spill] sm:$0xff] }
 0x1b1   :  { %1783 = vmatpush.bf16.msra.mxu1 %v6392_v13  ;;  %1809 = vmatpush.bf16.msrb.mxu3 %v6393_v21  ;;  %v6400_v13 = vld [vmem:[#allocation110_spill] sm:$0xff] }
 0x1b2   :  { %v430_v21 = vadd.f32 %v6401_v8, %v6400_v13  ;;  %v6403_v13 = vld [vmem:[#allocation115_spill] sm:$0xff] }
 0x1b3   :  { %1767 = vmatpush.bf16.msra.mxu0 %v6390_v52  ;;  %1793 = vmatpush.bf16.msrb.mxu2 %v6391_v3 }
 0x1b7   :  { %1768 = vmatpush.bf16.msra.mxu0 %v6394_v36  ;;  %1794 = vmatpush.bf16.msrb.mxu2 %v6395_v10 }
 0x1bb   :  { %1769 = vmatpush.bf16.msra.mxu0 %v6396_v45  ;;  %1795 = vmatpush.bf16.msrb.mxu2 %v6397_v2 }
 0x1bf   :  { %1770 = vmatpush.bf16.msra.mxu0 %v6398_v62  ;;  %1796 = vmatpush.bf16.msrb.mxu2 %v6399_v31  ;;  %v6402_v62 = vld [vmem:[#allocation131_spill] sm:$0xff] }
 0x1d1   :  { %v1471_v33 = vpop.f32.mrf.mxu1 }
 0x1d7   :  { %v1497_v52 = vpop.f32.mrf.mxu3 }
 0x1d9   :  { %v1473_v34 = vpop.f32.mrf.mxu1 }
 0x1df   :  { %v1499_v3 = vpop.f32.mrf.mxu3  ;;  %v1458_v38 = vpop.f32.mrf.mxu0 }
 0x1e0   :  { %v1472_v36 = vadd.f32 %v1471_v33, %v1458_v38  ;;  %v6404_v33 = vld [vmem:[#allocation111_spill] sm:$0xff] }
 0x1e1   :  { %v1523_v18 = vpop.f32.mrf.mxu1 }
 0x1e2   :  { %v1605_v20 = vadd.f32 %v1472_v36, %v430_v21  ;;  %v488_v21 = vadd.f32 %v6404_v33, %v6403_v13 }
 0x1e4   :  { %v3936_v10 = vmul.f32 -1.442695, %v1605_v20 }
 0x1e5   :  { %v1484_v24 = vpop.f32.mrf.mxu2 }
 0x1e6   :  { %4160 = vpow2.f32 %v3936_v10  ;;  %v1498_v2 = vadd.f32 %v1497_v52, %v1484_v24 }
 0x1e7   :  { %v1549_v45 = vpop.f32.mrf.mxu3  ;;  %v1460_v60 = vpop.f32.mrf.mxu0 }
 0x1e8   :  { %v1606_v43 = vadd.f32 %v1498_v2, %v6402_v62 }
 0x1e9   :  { %v1525_v31 = vpop.f32.mrf.mxu1 }
 0x1ea   :  { %v3937_v7 = vmul.f32 -1.442695, %v1606_v43 }
 0x1ec   :  { %v4161_v15 = vpop.eup %4160  ;;  %4162 = vpow2.f32 %v3937_v7 }
 0x1ed   :  { %v1621_v34 = vadd.f32 1.0, %v4161_v15  ;;  %v1486_v3 = vpop.f32.mrf.mxu2 }
 0x1ef   :  { %v1551_v48 = vpop.f32.mrf.mxu3  ;;  %4164 = vrcp.f32 %v1621_v34  ;;  %v1510_v8 = vpop.f32.mrf.mxu0  ;;  %vm1630_vm3 = vweird.f32 %v1621_v34 }
 0x1f0   :  { %v1524_v38 = vadd.f32 %v1523_v18, %v1510_v8  ;;  %v6405_v48 = vld [vmem:[#allocation134_spill] sm:$0xff] }
 0x1f1   :  { %v1575_v20 = vpop.f32.mrf.mxu1 }
 0x1f2   :  { %v4163_v10 = vpop.eup %4162  ;;  %v1607_v36 = vadd.f32 %v1524_v38, %v488_v21 }
 0x1f3   :  { %v1622_v24 = vadd.f32 1.0, %v4163_v10 }
 0x1f4   :  { %v3938_v60 = vmul.f32 -1.442695, %v1607_v36 }
 0x1f5   :  { %v4165_v52 = vpop.eup %4164  ;;  %4166 = vrcp.f32 %v1622_v24  ;;  %v1536_v62 = vpop.f32.mrf.mxu2  ;;  %vm1645_vm7 = vweird.f32 %v1622_v24 }
 0x1f6   :  { %4168 = vpow2.f32 %v3938_v60  ;;  %v1550_v31 = vadd.f32 %v1549_v45, %v1536_v62  ;;  %v1626_v15 = vmul.f32 %v4165_v52, %v1621_v34  ;;  %vm1631_vm2 = vweird.f32 %v4165_v52 }
 0x1f7   :  { %v1601_v2 = vpop.f32.mrf.mxu3  ;;  %v1512_v7 = vpop.f32.mrf.mxu0  ;;  %v1636_v45 = vand.u32 2147483648, %v1621_v34  ;;  %v1634_v62 = vand.u32 2147483647, %v1621_v34  ;;  %vm1632_vm4 = vmor %vm1630_vm3, %vm1631_vm2  ;;  %v6406_v34 = vld [vmem:[#allocation138_spill] sm:$0xff] }
 0x1f8   :  { %v1608_v43 = vadd.f32 %v1550_v31, %v6405_v48  ;;  %v1627_v61 = vsub.f32 1.0, %v1626_v15 }
 0x1f9   :  { %v1577_v3 = vpop.f32.mrf.mxu1  ;;  %vm1635_vm5 = vcmp.eq.f32.partialorder %v1634_v62, 8.507059e+37 }
 0x1fa   :  { %v3939_v44 = vmul.f32 -1.442695, %v1608_v43  ;;  %v1628_v33 = vmul.f32 %v4165_v52, %v1627_v61  ;;  %v1637_v3 = vor.u32 1.1754944e-38, %v1636_v45 }
 0x1fb   :  { %v4167_v13 = vpop.eup %4166 }
 0x1fc   :  { %v4169_v18 = vpop.eup %4168  ;;  %4170 = vpow2.f32 %v3939_v44  ;;  %v1641_v8 = vmul.f32 %v4167_v13, %v1622_v24  ;;  %v1629_v36 = vadd.f32 %v4165_v52, %v1628_v33  ;;  %vm1646_vm6 = vweird.f32 %v4167_v13 }
 0x1fd   :  { %v1623_v21 = vadd.f32 1.0, %v4169_v18  ;;  %v1538_v38 = vpop.f32.mrf.mxu2  ;;  %vm5211_vm8 = vmor %vm1645_vm7, %vm1646_vm6 }
 0x1fe   :  { %v1642_v60 = vsub.f32 1.0, %v1641_v8  ;;  %v1633_v61 = vsel %vm1632_vm4, %v4165_v52, %v1629_v36  ;;  %v1649_v38 = vand.u32 2147483647, %v1622_v24  ;;  %vm3940_vm4 = vcmp.gt.s32.totalorder %v5080_v42, 1 }
 0x1ff   :  { %v1603_v10 = vpop.f32.mrf.mxu3  ;;  %4172 = vrcp.f32 %v1623_v21  ;;  %v1562_v31 = vpop.f32.mrf.mxu0  ;;  %v1638_v8 = vsel %vm1635_vm5, %v1637_v3, %v1633_v61  ;;  %v1664_v3 = vand.u32 2147483647, %v1623_v21  ;;  %vm1660_vm11 = vweird.f32 %v1623_v21 }
 0x200   :  { %v1643_v7 = vmul.f32 %v4167_v13, %v1642_v60  ;;  %v1576_v48 = vadd.f32 %v1575_v20, %v1562_v31  ;;  %v1651_v10 = vand.u32 2147483648, %v1622_v24  ;;  %v546_v60 = vadd.f32 %v6406_v34, %v5024_v22  ;;  %v6438_v22 = vld [vmem:[#allocation31_spill] sm:$0xff] }
 0x201   :  { %v1666_v31 = vand.u32 2147483648, %v1623_v21  ;;  %vm1650_vm9 = vcmp.eq.f32.partialorder %v1649_v38, 8.507059e+37  ;;  %vm1665_vm14 = vcmp.eq.f32.partialorder %v1664_v3, 8.507059e+37  ;;  %v6409_v38 = vld [vmem:[#allocation150_spill] sm:$0xff]  ;;  %vm3941_vm5 = vcmp.gt.s32.totalorder %v5080_v42, 6 }
 0x202   :  { %v4171_v15 = vpop.eup %4170  ;;  %v1685_v44 = vadd.f32 %v1576_v48, %v5075_v17  ;;  %v1644_v18 = vadd.f32 %v4167_v13, %v1643_v7 }
 0x203   :  { %v1624_v43 = vadd.f32 1.0, %v4171_v15  ;;  %v1652_v15 = vor.u32 1.1754944e-38, %v1651_v10 }
 0x204   :  { %v1687_v59 = vmul.f32 %v1685_v44, %v1638_v8  ;;  %v1648_v7 = vsel %vm5211_vm8, %v4167_v13, %v1644_v18 }
 0x205   :  { %v4173_v33 = vpop.eup %4172  ;;  %4174 = vrcp.f32 %v1624_v43  ;;  %v1588_v20 = vpop.f32.mrf.mxu2  ;;  %v1653_v8 = vsel %vm1650_vm9, %v1652_v15, %v1648_v7  ;;  %vm1675_vm0 = vweird.f32 %v1624_v43 }
 0x206   :  { %v1656_v9 = vmul.f32 %v4173_v33, %v1623_v21  ;;  %v1689_v45 = vadd.f32 %v1687_v59, %v546_v60  ;;  %v1602_v62 = vadd.f32 %v1601_v2, %v1588_v20  ;;  %vm1661_vm10 = vweird.f32 %v4173_v33 }
 0x207   :  { %v1564_v48 = vpop.f32.mrf.mxu0  ;;  %vm1662_vm13 = vmor %vm1660_vm11, %vm1661_vm10  ;;  %v1667_v2 = vor.u32 1.1754944e-38, %v1666_v31  ;;  %v1681_v60 = vand.u32 2147483648, %v1624_v43 }
 0x208   :  { %v1657_v36 = vsub.f32 1.0, %v1656_v9  ;;  %v1686_v24 = vadd.f32 %v1602_v62, %v5067_v23  ;;  %4176 = vtanh.f32 %v1689_v45  ;;  %v1679_v62 = vand.u32 2147483647, %v1624_v43 }
 0x209   :  { %v1682_v31 = vor.u32 1.1754944e-38, %v1681_v60  ;;  %v6417_v60 = vld [vmem:[#allocation34_spill] sm:$0xff] }
 0x20a   :  { %v1658_v61 = vmul.f32 %v4173_v33, %v1657_v36  ;;  %v1688_v59 = vmul.f32 %v1686_v24, %v1653_v8  ;;  %vm1680_vm3 = vcmp.eq.f32.partialorder %v1679_v62, 8.507059e+37  ;;  %v6421_v62 = vld [vmem:[#allocation36_spill] sm:$0xff] }
 0x20b   :  { %v4175_v44 = vpop.eup %4174 }
 0x20c   :  { %v1659_v34 = vadd.f32 %v4173_v33, %v1658_v61  ;;  %v1671_v9 = vmul.f32 %v4175_v44, %v1624_v43  ;;  %v1690_v10 = vadd.f32 %v1688_v59, %v6409_v38  ;;  %vm1676_vm15 = vweird.f32 %v4175_v44  ;;  %v6415_v38 = vld [vmem:[#allocation103_spill] sm:$0xff] }
 0x20d   :  { %v1590_v52 = vpop.f32.mrf.mxu2  ;;  %vm1677_vm2 = vmor %vm1675_vm0, %vm1676_vm15 }
 0x20e   :  { %v1672_v13 = vsub.f32 1.0, %v1671_v9  ;;  %v1663_v18 = vsel %vm1662_vm13, %v4173_v33, %v1659_v34  ;;  %v4177_v45 = vpop.eup %4176  ;;  %4178 = vtanh.f32 %v1690_v10  ;;  %v6416_v10 = vld [vmem:[#allocation18_spill] sm:$0xff]  ;;  %v6419_v52 = vld [vmem:[#allocation37_spill] sm:$0xff] }
 0x20f   :  { %v1668_v20 = vsel %vm1665_vm14, %v1667_v2, %v1663_v18  ;;  %v6414_v18 = vld [vmem:[#allocation101_spill] sm:$0xff] }
 0x210   :  { %v1673_v36 = vmul.f32 %v4175_v44, %v1672_v13  ;;  %v1693_v48 = vsub.f32 1.0, %v1668_v20  ;;  %v1697_v15 = vmul.f32 %v1668_v20, %v5108_v0  ;;  %v6413_v13 = vld [vmem:[#allocation35_spill] sm:$0xff]  ;;  %v6418_v20 = vld [vmem:[#allocation21_spill] sm:$0xff] }
 0x212   :  { %v1674_v7 = vadd.f32 %v4175_v44, %v1673_v36  ;;  %v1695_v21 = vmul.f32 %v4177_v45, %v1693_v48  ;;  %v6420_v36 = vld [vmem:[#allocation20_spill] sm:$0xff]  ;;  %v6422_v48 = vld [vmem:[#allocation23_spill] sm:$0xff]  ;;  %v6423_v45 = vld [vmem:[#allocation41_spill] sm:$0xff] }
 0x214   :  { %v5220_v33 = vadd.f32 %v1697_v15, %v1695_v21  ;;  %v1678_v61 = vsel %vm1677_vm2, %v4175_v44, %v1674_v7  ;;  %v4179_v43 = vpop.eup %4178  ;;  %v6424_v7 = vld [vmem:[#allocation22_spill] sm:$0xff]  ;;  %v6425_v21 = vld [vmem:[#allocation39_spill] sm:$0xff]  ;;  %v6426_v15 = vld [vmem:[#allocation25_spill] sm:$0xff] }
 0x215   :  { %v1683_v3 = vsel %vm1680_vm3, %v1682_v31, %v1678_v61  ;;  %v6427_v31 = vld [vmem:[#allocation45_spill] sm:$0xff]  ;;  %v6428_v61 = vld [vmem:[#allocation24_spill] sm:$0xff] }
 0x216   :  { %6410 = vst [vmem:[#allocation89_spill] sm:$0xff] %v5220_v33  ;;  %v1694_v24 = vsub.f32 1.0, %v1683_v3  ;;  %v5227_v8 = vsel %vm3940_vm4, %v5220_v33, %v5108_v0  ;;  %v1698_v59 = vmul.f32 %v1683_v3, %v5092_v35  ;;  %v6429_v3 = vld [vmem:[#allocation42_spill] sm:$0xff]  ;;  %v6436_v33 = vld [vmem:[#allocation28_spill] sm:$0xff] }
 0x217   :  { %v1709_v34 = vpack.c.bf16 %v5227_v8, %v5227_v8 }
 0x218   :  { %v1696_v9 = vmul.f32 %v4179_v43, %v1694_v24  ;;  %v6430_v24 = vld [vmem:[#allocation27_spill] sm:$0xff] }
 0x219   :  { %1719 = vmatmul.bf16.vlgmr.msrb.gmra.mxu0 %v1709_v34  ;;  %1745 = vmatmul.bf16.vlgmr.msra.gmra.mxu2 %v1709_v34  ;;  %v6431_v43 = vld [vmem:[#allocation47_spill] sm:$0xff] }
 0x21a   :  { %v5232_v44 = vadd.f32 %v1698_v59, %v1696_v9  ;;  %1815 = vmatpush.bf16.msrb.mxu0 %v6343_v6  ;;  %1841 = vmatpush.bf16.msra.mxu2 %v6344_v19  ;;  %v6433_v9 = vld [vmem:[#allocation46_spill] sm:$0xff]  ;;  %v6434_v59 = vld [vmem:[#allocation29_spill] sm:$0xff] }
 0x21c   :  { %6411 = vst [vmem:[#allocation82_spill] sm:$0xff] %v5232_v44  ;;  %v5241_v0 = vsel %vm3941_vm5, %v5232_v44, %v5092_v35  ;;  %v6412_v35 = vld [vmem:[#allocation19_spill] sm:$0xff]  ;;  %v6437_v44 = vld [vmem:[#allocation48_spill] sm:$0xff] }
 0x21d   :  { %v1710_v2 = vpack.c.bf16 %v5241_v0, %v5241_v0 }
 0x21e   :  { %1816 = vmatpush.bf16.msrb.mxu0 %v6345_v11  ;;  %1842 = vmatpush.bf16.msra.mxu2 %v6346_v49 }
 0x21f   :  { %1732 = vmatmul.bf16.vlgmr.msrb.gmra.mxu1 %v1710_v2  ;;  %1758 = vmatmul.bf16.vlgmr.msra.gmra.mxu3 %v1710_v2 }
 0x220   :  { %1828 = vmatpush.bf16.msrb.mxu1 %v6334_v54  ;;  %1854 = vmatpush.bf16.msra.mxu3 %v6335_v4 }
 0x222   :  { %1817 = vmatpush.bf16.msrb.mxu0 %v6347_v32  ;;  %1843 = vmatpush.bf16.msra.mxu2 %v6348_v12 }
 0x224   :  { %1829 = vmatpush.bf16.msrb.mxu1 %v6336_v56  ;;  %1855 = vmatpush.bf16.msra.mxu3 %v6337_v25 }
 0x226   :  { %1818 = vmatpush.bf16.msrb.mxu0 %v6349_v46  ;;  %1844 = vmatpush.bf16.msra.mxu2 %v4800_v51 }
 0x228   :  { %1830 = vmatpush.bf16.msrb.mxu1 %v6338_v41  ;;  %1856 = vmatpush.bf16.msra.mxu3 %v6339_v58 }
 0x229   :  { %1771 = vmatmul.bf16.vlgmr.msra.gmra.mxu0 %v1709_v34  ;;  %1797 = vmatmul.bf16.vlgmr.msrb.gmra.mxu2 %v1709_v34 }
 0x22a   :  { %1819 = vmatpush.bf16.msrb.mxu0 %v6350_v14  ;;  %1845 = vmatpush.bf16.msra.mxu2 %v4812_v40 }
 0x22c   :  { %1831 = vmatpush.bf16.msrb.mxu1 %v6341_v50  ;;  %1857 = vmatpush.bf16.msra.mxu3 %v4806_v30 }
 0x22e   :  { %1820 = vmatpush.bf16.msrb.mxu0 %v6351_v26  ;;  %1846 = vmatpush.bf16.msra.mxu2 %v4824_v63 }
 0x22f   :  { %1784 = vmatmul.bf16.vlgmr.msra.gmra.mxu1 %v1710_v2  ;;  %1810 = vmatmul.bf16.vlgmr.msrb.gmra.mxu3 %v1710_v2 }
 0x230   :  { %1832 = vmatpush.bf16.msrb.mxu1 %v6342_v16  ;;  %1858 = vmatpush.bf16.msra.mxu3 %v4818_v39 }
 0x232   :  { %1821 = vmatpush.bf16.msrb.mxu0 %v4809_v29  ;;  %1847 = vmatpush.bf16.msra.mxu2 %v4836_v37 }
 0x234   :  { %1833 = vmatpush.bf16.msrb.mxu1 %v4803_v5  ;;  %1859 = vmatpush.bf16.msra.mxu3 %v4831_v57 }
 0x236   :  { %1822 = vmatpush.bf16.msrb.mxu0 %v6352_v28  ;;  %1848 = vmatpush.bf16.msra.mxu2 %v4843_v1 }
 0x238   :  { %1834 = vmatpush.bf16.msrb.mxu1 %v4815_v27  ;;  %1860 = vmatpush.bf16.msra.mxu3 %v4840_v55 }
 0x239   :  { %1823 = vmatmul.bf16.vlgmr.msrb.gmra.mxu0 %v1709_v34  ;;  %1849 = vmatmul.bf16.vlgmr.msra.gmra.mxu2 %v1709_v34  ;;  %v6432_v34 = vld [vmem:[#allocation26_spill] sm:$0xff] }
 0x23a   :  { %1973 = vmatpush.bf16.msra.mxu0 %v4518_v47  ;;  %1999 = vmatpush.bf16.msrb.mxu2 %v6353_v53 }
 0x23c   :  { %1835 = vmatpush.bf16.msrb.mxu1 %v6414_v18  ;;  %1861 = vmatpush.bf16.msra.mxu3 %v6415_v38 }
 0x23e   :  { %1974 = vmatpush.bf16.msra.mxu0 %v6412_v35  ;;  %2000 = vmatpush.bf16.msrb.mxu2 %v6413_v13 }
 0x23f   :  { %1836 = vmatmul.bf16.vlgmr.msrb.gmra.mxu1 %v1710_v2  ;;  %1862 = vmatmul.bf16.vlgmr.msra.gmra.mxu3 %v1710_v2  ;;  %v6435_v2 = vld [vmem:[#allocation49_spill] sm:$0xff] }
 0x240   :  { %1986 = vmatpush.bf16.msra.mxu1 %v6416_v10  ;;  %2012 = vmatpush.bf16.msrb.mxu3 %v6417_v60 }
 0x242   :  { %1975 = vmatpush.bf16.msra.mxu0 %v6418_v20  ;;  %2001 = vmatpush.bf16.msrb.mxu2 %v6419_v52 }
 0x244   :  { %1987 = vmatpush.bf16.msra.mxu1 %v6420_v36  ;;  %2013 = vmatpush.bf16.msrb.mxu3 %v6421_v62 }
 0x246   :  { %1976 = vmatpush.bf16.msra.mxu0 %v6422_v48  ;;  %2002 = vmatpush.bf16.msrb.mxu2 %v6423_v45  ;;  %v6478_v45 = vld [vmem:[#allocation127_spill] sm:$0xff] }
 0x248   :  { %1988 = vmatpush.bf16.msra.mxu1 %v6424_v7  ;;  %2014 = vmatpush.bf16.msrb.mxu3 %v6425_v21 }
 0x24a   :  { %1977 = vmatpush.bf16.msra.mxu0 %v6426_v15  ;;  %2003 = vmatpush.bf16.msrb.mxu2 %v6427_v31 }
 0x24c   :  { %1989 = vmatpush.bf16.msra.mxu1 %v6428_v61  ;;  %2015 = vmatpush.bf16.msrb.mxu3 %v6429_v3  ;;  %v6439_v61 = vld [vmem:[#allocation53_spill] sm:$0xff]  ;;  %v6440_v3 = vld [vmem:[#allocation38_spill] sm:$0xff] }
 0x24e   :  { %1978 = vmatpush.bf16.msra.mxu0 %v6430_v24  ;;  %2004 = vmatpush.bf16.msrb.mxu2 %v6431_v43  ;;  %v6441_v24 = vld [vmem:[#allocation58_spill] sm:$0xff] }
 0x24f   :  { %v6442_v43 = vld [vmem:[#allocation30_spill] sm:$0xff] }
 0x250   :  { %1990 = vmatpush.bf16.msra.mxu1 %v6432_v34  ;;  %2016 = vmatpush.bf16.msrb.mxu3 %v6433_v9  ;;  %v6443_v34 = vld [vmem:[#allocation51_spill] sm:$0xff] }
 0x251   :  { %v6444_v9 = vld [vmem:[#allocation43_spill] sm:$0xff] }
 0x252   :  { %1979 = vmatpush.bf16.msra.mxu0 %v6434_v59  ;;  %2005 = vmatpush.bf16.msrb.mxu2 %v6435_v2  ;;  %v6445_v59 = vld [vmem:[#allocation60_spill] sm:$0xff] }
 0x253   :  { %v6446_v2 = vld [vmem:[#allocation32_spill] sm:$0xff] }
 0x254   :  { %1991 = vmatpush.bf16.msra.mxu1 %v6436_v33  ;;  %2017 = vmatpush.bf16.msrb.mxu3 %v6437_v44  ;;  %v6447_v33 = vld [vmem:[#allocation54_spill] sm:$0xff]  ;;  %v6448_v44 = vld [vmem:[#allocation40_spill] sm:$0xff] }
 0x256   :  { %1980 = vmatpush.bf16.msra.mxu0 %v6438_v22  ;;  %2006 = vmatpush.bf16.msrb.mxu2 %v6439_v61  ;;  %v6449_v22 = vld [vmem:[#allocation59_spill] sm:$0xff]  ;;  %v6450_v61 = vld [vmem:[#allocation50_spill] sm:$0xff] }
 0x258   :  { %1992 = vmatpush.bf16.msra.mxu1 %v6442_v43  ;;  %2018 = vmatpush.bf16.msrb.mxu3 %v6443_v34  ;;  %v6453_v43 = vld [vmem:[#allocation62_spill] sm:$0xff]  ;;  %v6454_v34 = vld [vmem:[#allocation55_spill] sm:$0xff] }
 0x25a   :  { %2025 = vmatpush.bf16.msrb.mxu0 %v6440_v3  ;;  %2051 = vmatpush.bf16.msra.mxu2 %v6441_v24  ;;  %v6451_v3 = vld [vmem:[#allocation64_spill] sm:$0xff] }
 0x25b   :  { %v6452_v24 = vld [vmem:[#allocation44_spill] sm:$0xff] }
 0x25c   :  { %1993 = vmatpush.bf16.msra.mxu1 %v6446_v2  ;;  %2019 = vmatpush.bf16.msrb.mxu3 %v6447_v33  ;;  %v6457_v2 = vld [vmem:[#allocation65_spill] sm:$0xff] }
 0x25d   :  { %v6458_v33 = vld [vmem:[#allocation61_spill] sm:$0xff] }
 0x25e   :  { %2026 = vmatpush.bf16.msrb.mxu0 %v6444_v9  ;;  %2052 = vmatpush.bf16.msra.mxu2 %v6445_v59  ;;  %v6455_v9 = vld [vmem:[#allocation67_spill] sm:$0xff]  ;;  %v6456_v59 = vld [vmem:[#allocation52_spill] sm:$0xff] }
 0x260   :  { %2038 = vmatpush.bf16.msrb.mxu1 %v6448_v44  ;;  %2064 = vmatpush.bf16.msra.mxu3 %v6449_v22  ;;  %v6459_v44 = vld [vmem:[#allocation71_spill] sm:$0xff]  ;;  %v6460_v22 = vld [vmem:[#allocation56_spill] sm:$0xff] }
 0x262   :  { %2027 = vmatpush.bf16.msrb.mxu0 %v6450_v61  ;;  %2053 = vmatpush.bf16.msra.mxu2 %v6451_v3  ;;  %v6461_v61 = vld [vmem:[#allocation69_spill] sm:$0xff]  ;;  %v6462_v3 = vld [vmem:[#allocation66_spill] sm:$0xff] }
 0x264   :  { %2039 = vmatpush.bf16.msrb.mxu1 %v6452_v24  ;;  %2065 = vmatpush.bf16.msra.mxu3 %v6453_v43  ;;  %v6463_v24 = vld [vmem:[#allocation75_spill] sm:$0xff] }
 0x265   :  { %v6464_v43 = vld [vmem:[#allocation63_spill] sm:$0xff] }
 0x266   :  { %2028 = vmatpush.bf16.msrb.mxu0 %v6454_v34  ;;  %2054 = vmatpush.bf16.msra.mxu2 %v6455_v9  ;;  %v6465_v34 = vld [vmem:[#allocation73_spill] sm:$0xff]  ;;  %v6466_v9 = vld [vmem:[#allocation70_spill] sm:$0xff] }
 0x268   :  { %2040 = vmatpush.bf16.msrb.mxu1 %v6456_v59  ;;  %2066 = vmatpush.bf16.msra.mxu3 %v6457_v2  ;;  %v6467_v59 = vld [vmem:[#allocation81_spill] sm:$0xff]  ;;  %v6468_v2 = vld [vmem:[#allocation68_spill] sm:$0xff] }
 0x26a   :  { %2029 = vmatpush.bf16.msrb.mxu0 %v6458_v33  ;;  %2055 = vmatpush.bf16.msra.mxu2 %v6459_v44  ;;  %v6469_v33 = vld [vmem:[#allocation78_spill] sm:$0xff] }
 0x26b   :  { %v6470_v44 = vld [vmem:[#allocation74_spill] sm:$0xff] }
 0x26c   :  { %2041 = vmatpush.bf16.msrb.mxu1 %v6460_v22  ;;  %2067 = vmatpush.bf16.msra.mxu3 %v6461_v61  ;;  %v6471_v22 = vld [vmem:[#allocation85_spill] sm:$0xff]  ;;  %v6472_v61 = vld [vmem:[#allocation72_spill] sm:$0xff] }
 0x26e   :  { %2030 = vmatpush.bf16.msrb.mxu0 %v6462_v3  ;;  %2056 = vmatpush.bf16.msra.mxu2 %v6463_v24  ;;  %v6473_v3 = vld [vmem:[#allocation83_spill] sm:$0xff]  ;;  %v6474_v24 = vld [vmem:[#allocation76_spill] sm:$0xff] }
 0x270   :  { %2042 = vmatpush.bf16.msrb.mxu1 %v6464_v43  ;;  %2068 = vmatpush.bf16.msra.mxu3 %v6465_v34  ;;  %v6475_v43 = vld [vmem:[#allocation87_spill] sm:$0xff] }
 0x272   :  { %2031 = vmatpush.bf16.msrb.mxu0 %v6466_v9  ;;  %2057 = vmatpush.bf16.msra.mxu2 %v6467_v59 }
 0x274   :  { %2043 = vmatpush.bf16.msrb.mxu1 %v6468_v2  ;;  %2069 = vmatpush.bf16.msra.mxu3 %v6469_v33  ;;  %v6476_v2 = vld [vmem:[#allocation113_spill] sm:$0xff] }
 0x276   :  { %2032 = vmatpush.bf16.msrb.mxu0 %v6470_v44  ;;  %2058 = vmatpush.bf16.msra.mxu2 %v6471_v22  ;;  %v6477_v44 = vld [vmem:[#allocation104_spill] sm:$0xff] }
 0x277   :  { %v469_v22 = vadd.f32 %v6478_v45, %v6477_v44 }
 0x278   :  { %2044 = vmatpush.bf16.msrb.mxu1 %v6472_v61  ;;  %2070 = vmatpush.bf16.msra.mxu3 %v6473_v3 }
 0x27c   :  { %2045 = vmatpush.bf16.msrb.mxu1 %v6474_v24  ;;  %2071 = vmatpush.bf16.msra.mxu3 %v6475_v43 }
 0x296   :  { %v1720_v34 = vpop.f32.mrf.mxu0 }
 0x29c   :  { %v1733_v9 = vpop.f32.mrf.mxu1  ;;  %v1746_v31 = vpop.f32.mrf.mxu2 }
 0x29d   :  { %v1734_v59 = vadd.f32 %v1733_v9, %v1720_v34 }
 0x29e   :  { %v1722_v15 = vpop.f32.mrf.mxu0 }
 0x29f   :  { %v1867_v21 = vadd.f32 %v1734_v59, %v6476_v2  ;;  %v6479_v2 = vld [vmem:[#allocation116_spill] sm:$0xff] }
 0x2a1   :  { %v3942_v33 = vmul.f32 -1.442695, %v1867_v21 }
 0x2a2   :  { %v1759_v7 = vpop.f32.mrf.mxu3 }
 0x2a3   :  { %4180 = vpow2.f32 %v3942_v33  ;;  %v1760_v61 = vadd.f32 %v1759_v7, %v1746_v31  ;;  %v6481_v31 = vld [vmem:[#allocation129_spill] sm:$0xff] }
 0x2a4   :  { %v1735_v48 = vpop.f32.mrf.mxu1  ;;  %v1748_v3 = vpop.f32.mrf.mxu2 }
 0x2a5   :  { %v1868_v62 = vadd.f32 %v1760_v61, %v469_v22  ;;  %v6480_v22 = vld [vmem:[#allocation106_spill] sm:$0xff] }
 0x2a6   :  { %v1772_v24 = vpop.f32.mrf.mxu0 }
 0x2a7   :  { %v3943_v36 = vmul.f32 -1.442695, %v1868_v62  ;;  %v527_v62 = vadd.f32 %v6481_v31, %v6480_v22 }
 0x2a9   :  { %v4181_v43 = vpop.eup %4180  ;;  %4182 = vpow2.f32 %v3943_v36 }
 0x2aa   :  { %v1883_v52 = vadd.f32 1.0, %v4181_v43  ;;  %v1761_v20 = vpop.f32.mrf.mxu3 }
 0x2ac   :  { %4184 = vrcp.f32 %v1883_v52  ;;  %v1785_v15 = vpop.f32.mrf.mxu1  ;;  %v1798_v34 = vpop.f32.mrf.mxu2  ;;  %v1898_v18 = vand.u32 2147483648, %v1883_v52  ;;  %vm1892_vm7 = vweird.f32 %v1883_v52 }
 0x2ad   :  { %v1786_v9 = vadd.f32 %v1785_v15, %v1772_v24 }
 0x2ae   :  { %v1774_v21 = vpop.f32.mrf.mxu0 }
 0x2af   :  { %v4183_v59 = vpop.eup %4182  ;;  %v1869_v60 = vadd.f32 %v1786_v9, %v6479_v2 }
 0x2b0   :  { %v1884_v45 = vadd.f32 1.0, %v4183_v59 }
 0x2b1   :  { %v3944_v33 = vmul.f32 -1.442695, %v1869_v60 }
 0x2b2   :  { %v4185_v7 = vpop.eup %4184  ;;  %4186 = vrcp.f32 %v1884_v45  ;;  %v1811_v48 = vpop.f32.mrf.mxu3  ;;  %vm1907_vm11 = vweird.f32 %v1884_v45 }
 0x2b3   :  { %4188 = vpow2.f32 %v3944_v33  ;;  %v1812_v36 = vadd.f32 %v1811_v48, %v1798_v34  ;;  %v1888_v61 = vmul.f32 %v4185_v7, %v1883_v52  ;;  %vm1893_vm6 = vweird.f32 %v4185_v7 }
 0x2b4   :  { %v1787_v20 = vpop.f32.mrf.mxu1  ;;  %v1800_v3 = vpop.f32.mrf.mxu2  ;;  %v1896_v33 = vand.u32 2147483647, %v1883_v52  ;;  %vm1894_vm8 = vmor %vm1892_vm7, %vm1893_vm6 }
 0x2b5   :  { %v1870_v43 = vadd.f32 %v1812_v36, %v527_v62  ;;  %v1889_v44 = vsub.f32 1.0, %v1888_v61 }
 0x2b6   :  { %v1824_v24 = vpop.f32.mrf.mxu0  ;;  %vm1897_vm9 = vcmp.eq.f32.partialorder %v1896_v33, 8.507059e+37 }
 0x2b7   :  { %v3945_v15 = vmul.f32 -1.442695, %v1870_v43  ;;  %v1890_v21 = vmul.f32 %v4185_v7, %v1889_v44  ;;  %v1899_v44 = vor.u32 1.1754944e-38, %v1898_v18 }
 0x2b8   :  { %v4187_v10 = vpop.eup %4186 }
 0x2b9   :  { %v4189_v9 = vpop.eup %4188  ;;  %4190 = vpow2.f32 %v3945_v15  ;;  %v1891_v60 = vadd.f32 %v4185_v7, %v1890_v21  ;;  %v1903_v59 = vmul.f32 %v4187_v10, %v1884_v45  ;;  %vm1908_vm10 = vweird.f32 %v4187_v10 }
 0x2ba   :  { %v1885_v2 = vadd.f32 1.0, %v4189_v9  ;;  %v1813_v38 = vpop.f32.mrf.mxu3  ;;  %v1913_v9 = vand.u32 2147483648, %v1884_v45  ;;  %vm1909_vm13 = vmor %vm1907_vm11, %vm1908_vm10  ;;  %vm3946_vm10 = vcmp.gt.s32.totalorder %v5080_v42, 2  ;;  %vm3947_vm11 = vcmp.gt.s32.totalorder %v5080_v42, 5 }
 0x2bb   :  { %v1904_v34 = vsub.f32 1.0, %v1903_v59  ;;  %v1895_v36 = vsel %vm1894_vm8, %v4185_v7, %v1891_v60  ;;  %v1911_v59 = vand.u32 2147483647, %v1884_v45 }
 0x2bc   :  { %4192 = vrcp.f32 %v1885_v2  ;;  %v1837_v48 = vpop.f32.mrf.mxu1  ;;  %v1850_v31 = vpop.f32.mrf.mxu2  ;;  %v1900_v21 = vsel %vm1897_vm9, %v1899_v44, %v1895_v36  ;;  %v1914_v33 = vor.u32 1.1754944e-38, %v1913_v9  ;;  %v6483_v44 = vld [vmem:[#allocation135_spill] sm:$0xff]  ;;  %v1928_v45 = vand.u32 2147483648, %v1885_v2 }
 0x2bd   :  { %v1838_v62 = vadd.f32 %v1837_v48, %v1824_v24  ;;  %v1905_v61 = vmul.f32 %v4187_v10, %v1904_v34  ;;  %v6482_v24 = vld [vmem:[#allocation141_spill] sm:$0xff]  ;;  %vm1912_vm14 = vcmp.eq.f32.partialorder %v1911_v59, 8.507059e+37  ;;  %vm1922_vm0 = vweird.f32 %v1885_v2 }
 0x2be   :  { %v1826_v20 = vpop.f32.mrf.mxu0 }
 0x2bf   :  { %v4191_v3 = vpop.eup %4190  ;;  %v1947_v43 = vadd.f32 %v1838_v62, %v5075_v17  ;;  %v1906_v15 = vadd.f32 %v4187_v10, %v1905_v61  ;;  %v6484_v20 = vld [vmem:[#allocation148_spill] sm:$0xff]  ;;  %v1926_v17 = vand.u32 2147483647, %v1885_v2 }
 0x2c0   :  { %v1886_v38 = vadd.f32 1.0, %v4191_v3  ;;  %v585_v3 = vadd.f32 %v6484_v20, %v6483_v44  ;;  %v6515_v44 = vld [vmem:[#allocation53_spill] sm:$0xff] }
 0x2c1   :  { %v1949_v52 = vmul.f32 %v1947_v43, %v1900_v21  ;;  %v1910_v34 = vsel %vm1909_vm13, %v4187_v10, %v1906_v15  ;;  %v1929_v15 = vor.u32 1.1754944e-38, %v1928_v45  ;;  %vm1927_vm3 = vcmp.eq.f32.partialorder %v1926_v17, 8.507059e+37 }
 0x2c2   :  { %v4193_v22 = vpop.eup %4192  ;;  %4194 = vrcp.f32 %v1886_v38  ;;  %v1863_v13 = vpop.f32.mrf.mxu3  ;;  %v1915_v43 = vsel %vm1912_vm14, %v1914_v33, %v1910_v34  ;;  %v1941_v34 = vand.u32 2147483647, %v1886_v38  ;;  %vm1937_vm7 = vweird.f32 %v1886_v38 }
 0x2c3   :  { %v1918_v7 = vmul.f32 %v4193_v22, %v1885_v2  ;;  %v1951_v18 = vadd.f32 %v1949_v52, %v6482_v24  ;;  %v1864_v60 = vadd.f32 %v1863_v13, %v1850_v31  ;;  %vm1923_vm15 = vweird.f32 %v4193_v22 }
 0x2c4   :  { %v1839_v48 = vpop.f32.mrf.mxu1  ;;  %v1852_v62 = vpop.f32.mrf.mxu2  ;;  %vm1924_vm2 = vmor %vm1922_vm0, %vm1923_vm15  ;;  %vm1942_vm9 = vcmp.eq.f32.partialorder %v1941_v34, 8.507059e+37  ;;  %v6498_v34 = vld [vmem:[#allocation23_spill] sm:$0xff] }
 0x2c5   :  { %v1919_v61 = vsub.f32 1.0, %v1918_v7  ;;  %v1948_v36 = vadd.f32 %v1864_v60, %v5067_v23  ;;  %4196 = vtanh.f32 %v1951_v18  ;;  %v1943_v7 = vand.u32 2147483648, %v1886_v38 }
 0x2c7   :  { %v1920_v21 = vmul.f32 %v4193_v22, %v1919_v61  ;;  %v1950_v35 = vmul.f32 %v1948_v36, %v1915_v43 }
 0x2c8   :  { %v4195_v55 = vpop.eup %4194 }
 0x2c9   :  { %v1921_v13 = vadd.f32 %v4193_v22, %v1920_v21  ;;  %v1933_v10 = vmul.f32 %v4195_v55, %v1886_v38  ;;  %v1952_v31 = vadd.f32 %v1950_v35, %v585_v3  ;;  %vm1938_vm6 = vweird.f32 %v4195_v55 }
 0x2ca   :  { %v1865_v9 = vpop.f32.mrf.mxu3  ;;  %vm1939_vm8 = vmor %vm1937_vm7, %vm1938_vm6  ;;  %v1944_v35 = vor.u32 1.1754944e-38, %v1943_v7  ;;  %v6495_v7 = vld [vmem:[#allocation37_spill] sm:$0xff] }
 0x2cb   :  { %v1934_v52 = vsub.f32 1.0, %v1933_v10  ;;  %v1925_v59 = vsel %vm1924_vm2, %v4193_v22, %v1921_v13  ;;  %v4197_v48 = vpop.eup %4196  ;;  %4198 = vtanh.f32 %v1952_v31  ;;  %v6488_v13 = vld [vmem:[#allocation19_spill] sm:$0xff]  ;;  %v6490_v31 = vld [vmem:[#allocation101_spill] sm:$0xff]  ;;  %v6492_v9 = vld [vmem:[#allocation18_spill] sm:$0xff] }
 0x2cc   :  { %v1930_v24 = vsel %vm1927_vm3, %v1929_v15, %v1925_v59  ;;  %v6489_v10 = vld [vmem:[#allocation35_spill] sm:$0xff]  ;;  %v6494_v59 = vld [vmem:[#allocation21_spill] sm:$0xff] }
 0x2cd   :  { %v1935_v60 = vmul.f32 %v4195_v55, %v1934_v52  ;;  %v1955_v33 = vsub.f32 1.0, %v1930_v24  ;;  %v1959_v2 = vmul.f32 %v1930_v24, %v5227_v8  ;;  %v6491_v15 = vld [vmem:[#allocation103_spill] sm:$0xff]  ;;  %v6493_v52 = vld [vmem:[#allocation34_spill] sm:$0xff]  ;;  %v6496_v24 = vld [vmem:[#allocation20_spill] sm:$0xff] }
 0x2cf   :  { %v1936_v62 = vadd.f32 %v4195_v55, %v1935_v60  ;;  %v1957_v18 = vmul.f32 %v4197_v48, %v1955_v33  ;;  %v6497_v60 = vld [vmem:[#allocation36_spill] sm:$0xff]  ;;  %v6499_v33 = vld [vmem:[#allocation41_spill] sm:$0xff]  ;;  %v6500_v48 = vld [vmem:[#allocation22_spill] sm:$0xff] }
 0x2d1   :  { %v5351_v61 = vadd.f32 %v1959_v2, %v1957_v18  ;;  %v1940_v17 = vsel %vm1939_vm8, %v4195_v55, %v1936_v62  ;;  %v4199_v38 = vpop.eup %4198  ;;  %v6501_v62 = vld [vmem:[#allocation39_spill] sm:$0xff]  ;;  %v6502_v18 = vld [vmem:[#allocation25_spill] sm:$0xff] }
 0x2d2   :  { %v1945_v22 = vsel %vm1942_vm9, %v1944_v35, %v1940_v17  ;;  %v6503_v2 = vld [vmem:[#allocation45_spill] sm:$0xff]  ;;  %v6504_v35 = vld [vmem:[#allocation24_spill] sm:$0xff]  ;;  %v6505_v17 = vld [vmem:[#allocation42_spill] sm:$0xff] }
 0x2d3   :  { %6485 = vst [vmem:[#allocation93_spill] sm:$0xff] %v5351_v61  ;;  %v1956_v36 = vsub.f32 1.0, %v1945_v22  ;;  %v5358_v20 = vsel %vm3946_vm10, %v5351_v61, %v5227_v8  ;;  %v1960_v43 = vmul.f32 %v1945_v22, %v5241_v0  ;;  %v6506_v22 = vld [vmem:[#allocation27_spill] sm:$0xff]  ;;  %v6513_v61 = vld [vmem:[#allocation48_spill] sm:$0xff] }
 0x2d4   :  { %v1971_v3 = vpack.c.bf16 %v5358_v20, %v5358_v20 }
 0x2d5   :  { %v1958_v45 = vmul.f32 %v4199_v38, %v1956_v36  ;;  %v6507_v36 = vld [vmem:[#allocation47_spill] sm:$0xff]  ;;  %v6508_v38 = vld [vmem:[#allocation26_spill] sm:$0xff] }
 0x2d6   :  { %1981 = vmatmul.bf16.vlgmr.msra.gmra.mxu0 %v1971_v3  ;;  %2007 = vmatmul.bf16.vlgmr.msrb.gmra.mxu2 %v1971_v3 }
 0x2d7   :  { %v5363_v55 = vadd.f32 %v1960_v43, %v1958_v45  ;;  %2077 = vmatpush.bf16.msra.mxu0 %v6343_v6  ;;  %2103 = vmatpush.bf16.msrb.mxu2 %v6344_v19  ;;  %v6510_v45 = vld [vmem:[#allocation29_spill] sm:$0xff] }
 0x2d8   :  { %v6511_v43 = vld [vmem:[#allocation49_spill] sm:$0xff] }
 0x2d9   :  { %6486 = vst [vmem:[#allocation86_spill] sm:$0xff] %v5363_v55  ;;  %v5372_v8 = vsel %vm3947_vm11, %v5363_v55, %v5241_v0  ;;  %v6487_v0 = vld [vmem:[#allocation102_spill] sm:$0xff]  ;;  %v6514_v55 = vld [vmem:[#allocation31_spill] sm:$0xff] }
 0x2da   :  { %v1972_v21 = vpack.c.bf16 %v5372_v8, %v5372_v8 }
 0x2db   :  { %2078 = vmatpush.bf16.msra.mxu0 %v6345_v11  ;;  %2104 = vmatpush.bf16.msrb.mxu2 %v6346_v49 }
 0x2dc   :  { %1994 = vmatmul.bf16.vlgmr.msra.gmra.mxu1 %v1972_v21  ;;  %2020 = vmatmul.bf16.vlgmr.msrb.gmra.mxu3 %v1972_v21 }
 0x2dd   :  { %2090 = vmatpush.bf16.msra.mxu1 %v6334_v54  ;;  %2116 = vmatpush.bf16.msrb.mxu3 %v6335_v4 }
 0x2df   :  { %2079 = vmatpush.bf16.msra.mxu0 %v6347_v32  ;;  %2105 = vmatpush.bf16.msrb.mxu2 %v6348_v12 }
 0x2e1   :  { %2091 = vmatpush.bf16.msra.mxu1 %v6336_v56  ;;  %2117 = vmatpush.bf16.msrb.mxu3 %v6337_v25 }
 0x2e3   :  { %2080 = vmatpush.bf16.msra.mxu0 %v6349_v46  ;;  %2106 = vmatpush.bf16.msrb.mxu2 %v4800_v51 }
 0x2e5   :  { %2092 = vmatpush.bf16.msra.mxu1 %v6338_v41  ;;  %2118 = vmatpush.bf16.msrb.mxu3 %v6339_v58 }
 0x2e6   :  { %2033 = vmatmul.bf16.vlgmr.msrb.gmra.mxu0 %v1971_v3  ;;  %2059 = vmatmul.bf16.vlgmr.msra.gmra.mxu2 %v1971_v3 }
 0x2e7   :  { %2081 = vmatpush.bf16.msra.mxu0 %v6350_v14  ;;  %2107 = vmatpush.bf16.msrb.mxu2 %v4812_v40 }
 0x2e9   :  { %2093 = vmatpush.bf16.msra.mxu1 %v6341_v50  ;;  %2119 = vmatpush.bf16.msrb.mxu3 %v4806_v30 }
 0x2eb   :  { %2082 = vmatpush.bf16.msra.mxu0 %v6351_v26  ;;  %2108 = vmatpush.bf16.msrb.mxu2 %v4824_v63 }
 0x2ec   :  { %2046 = vmatmul.bf16.vlgmr.msrb.gmra.mxu1 %v1972_v21  ;;  %2072 = vmatmul.bf16.vlgmr.msra.gmra.mxu3 %v1972_v21 }
 0x2ed   :  { %2094 = vmatpush.bf16.msra.mxu1 %v6342_v16  ;;  %2120 = vmatpush.bf16.msrb.mxu3 %v4818_v39 }
 0x2ef   :  { %2083 = vmatpush.bf16.msra.mxu0 %v4809_v29  ;;  %2109 = vmatpush.bf16.msrb.mxu2 %v4836_v37 }
 0x2f1   :  { %2095 = vmatpush.bf16.msra.mxu1 %v4803_v5  ;;  %2121 = vmatpush.bf16.msrb.mxu3 %v4831_v57 }
 0x2f3   :  { %2084 = vmatpush.bf16.msra.mxu0 %v6352_v28  ;;  %2110 = vmatpush.bf16.msrb.mxu2 %v4843_v1 }
 0x2f5   :  { %2096 = vmatpush.bf16.msra.mxu1 %v4815_v27  ;;  %2122 = vmatpush.bf16.msrb.mxu3 %v6487_v0 }
 0x2f6   :  { %2085 = vmatmul.bf16.vlgmr.msra.gmra.mxu0 %v1971_v3  ;;  %2111 = vmatmul.bf16.vlgmr.msrb.gmra.mxu2 %v1971_v3  ;;  %v6509_v3 = vld [vmem:[#allocation46_spill] sm:$0xff] }
 0x2f7   :  { %2235 = vmatpush.bf16.msrb.mxu0 %v4518_v47  ;;  %2261 = vmatpush.bf16.msra.mxu2 %v6353_v53 }
 0x2f9   :  { %2097 = vmatpush.bf16.msra.mxu1 %v6490_v31  ;;  %2123 = vmatpush.bf16.msrb.mxu3 %v6491_v15 }
 0x2fb   :  { %2236 = vmatpush.bf16.msrb.mxu0 %v6488_v13  ;;  %2262 = vmatpush.bf16.msra.mxu2 %v6489_v10 }
 0x2fc   :  { %2098 = vmatmul.bf16.vlgmr.msra.gmra.mxu1 %v1972_v21  ;;  %2124 = vmatmul.bf16.vlgmr.msrb.gmra.mxu3 %v1972_v21  ;;  %v6512_v21 = vld [vmem:[#allocation28_spill] sm:$0xff] }
 0x2fd   :  { %2248 = vmatpush.bf16.msrb.mxu1 %v6492_v9  ;;  %2274 = vmatpush.bf16.msra.mxu3 %v6493_v52 }
 0x2ff   :  { %2237 = vmatpush.bf16.msrb.mxu0 %v6494_v59  ;;  %2263 = vmatpush.bf16.msra.mxu2 %v6495_v7 }
 0x301   :  { %2249 = vmatpush.bf16.msrb.mxu1 %v6496_v24  ;;  %2275 = vmatpush.bf16.msra.mxu3 %v6497_v60 }
 0x303   :  { %2238 = vmatpush.bf16.msrb.mxu0 %v6498_v34  ;;  %2264 = vmatpush.bf16.msra.mxu2 %v6499_v33 }
 0x305   :  { %2250 = vmatpush.bf16.msrb.mxu1 %v6500_v48  ;;  %2276 = vmatpush.bf16.msra.mxu3 %v6501_v62 }
 0x307   :  { %2239 = vmatpush.bf16.msrb.mxu0 %v6502_v18  ;;  %2265 = vmatpush.bf16.msra.mxu2 %v6503_v2  ;;  %v6553_v2 = vld [vmem:[#allocation117_spill] sm:$0xff] }
 0x309   :  { %2251 = vmatpush.bf16.msrb.mxu1 %v6504_v35  ;;  %2277 = vmatpush.bf16.msra.mxu3 %v6505_v17  ;;  %v6516_v17 = vld [vmem:[#allocation38_spill] sm:$0xff] }
 0x30b   :  { %2240 = vmatpush.bf16.msrb.mxu0 %v6506_v22  ;;  %2266 = vmatpush.bf16.msra.mxu2 %v6507_v36  ;;  %v6517_v22 = vld [vmem:[#allocation58_spill] sm:$0xff] }
 0x30c   :  { %v6518_v36 = vld [vmem:[#allocation30_spill] sm:$0xff] }
 0x30d   :  { %2252 = vmatpush.bf16.msrb.mxu1 %v6508_v38  ;;  %2278 = vmatpush.bf16.msra.mxu3 %v6509_v3  ;;  %v6519_v38 = vld [vmem:[#allocation51_spill] sm:$0xff] }
 0x30e   :  { %v6520_v3 = vld [vmem:[#allocation43_spill] sm:$0xff] }
 0x30f   :  { %2241 = vmatpush.bf16.msrb.mxu0 %v6510_v45  ;;  %2267 = vmatpush.bf16.msra.mxu2 %v6511_v43  ;;  %v6521_v45 = vld [vmem:[#allocation60_spill] sm:$0xff] }
 0x310   :  { %v6522_v43 = vld [vmem:[#allocation32_spill] sm:$0xff] }
 0x311   :  { %2253 = vmatpush.bf16.msrb.mxu1 %v6512_v21  ;;  %2279 = vmatpush.bf16.msra.mxu3 %v6513_v61  ;;  %v6523_v21 = vld [vmem:[#allocation54_spill] sm:$0xff]  ;;  %v6524_v61 = vld [vmem:[#allocation40_spill] sm:$0xff] }
 0x313   :  { %2242 = vmatpush.bf16.msrb.mxu0 %v6514_v55  ;;  %2268 = vmatpush.bf16.msra.mxu2 %v6515_v44  ;;  %v6525_v55 = vld [vmem:[#allocation59_spill] sm:$0xff]  ;;  %v6526_v44 = vld [vmem:[#allocation50_spill] sm:$0xff] }
 0x315   :  { %2254 = vmatpush.bf16.msrb.mxu1 %v6518_v36  ;;  %2280 = vmatpush.bf16.msra.mxu3 %v6519_v38  ;;  %v6529_v36 = vld [vmem:[#allocation62_spill] sm:$0xff]  ;;  %v6530_v38 = vld [vmem:[#allocation55_spill] sm:$0xff] }
 0x317   :  { %2287 = vmatpush.bf16.msra.mxu0 %v6516_v17  ;;  %2313 = vmatpush.bf16.msrb.mxu2 %v6517_v22  ;;  %v6527_v17 = vld [vmem:[#allocation64_spill] sm:$0xff] }
 0x318   :  { %v6528_v22 = vld [vmem:[#allocation44_spill] sm:$0xff] }
 0x319   :  { %2255 = vmatpush.bf16.msrb.mxu1 %v6522_v43  ;;  %2281 = vmatpush.bf16.msra.mxu3 %v6523_v21  ;;  %v6533_v43 = vld [vmem:[#allocation65_spill] sm:$0xff] }
 0x31a   :  { %v6534_v21 = vld [vmem:[#allocation61_spill] sm:$0xff] }
 0x31b   :  { %2288 = vmatpush.bf16.msra.mxu0 %v6520_v3  ;;  %2314 = vmatpush.bf16.msrb.mxu2 %v6521_v45  ;;  %v6531_v3 = vld [vmem:[#allocation67_spill] sm:$0xff]  ;;  %v6532_v45 = vld [vmem:[#allocation52_spill] sm:$0xff] }
 0x31d   :  { %2300 = vmatpush.bf16.msra.mxu1 %v6524_v61  ;;  %2326 = vmatpush.bf16.msrb.mxu3 %v6525_v55  ;;  %v6535_v61 = vld [vmem:[#allocation71_spill] sm:$0xff]  ;;  %v6536_v55 = vld [vmem:[#allocation56_spill] sm:$0xff] }
 0x31f   :  { %2289 = vmatpush.bf16.msra.mxu0 %v6526_v44  ;;  %2315 = vmatpush.bf16.msrb.mxu2 %v6527_v17  ;;  %v6537_v44 = vld [vmem:[#allocation69_spill] sm:$0xff]  ;;  %v6538_v17 = vld [vmem:[#allocation66_spill] sm:$0xff] }
 0x321   :  { %2301 = vmatpush.bf16.msra.mxu1 %v6528_v22  ;;  %2327 = vmatpush.bf16.msrb.mxu3 %v6529_v36  ;;  %v6539_v22 = vld [vmem:[#allocation75_spill] sm:$0xff] }
 0x322   :  { %v6540_v36 = vld [vmem:[#allocation63_spill] sm:$0xff] }
 0x323   :  { %2290 = vmatpush.bf16.msra.mxu0 %v6530_v38  ;;  %2316 = vmatpush.bf16.msrb.mxu2 %v6531_v3  ;;  %v6541_v38 = vld [vmem:[#allocation73_spill] sm:$0xff]  ;;  %v6542_v3 = vld [vmem:[#allocation70_spill] sm:$0xff] }
 0x325   :  { %2302 = vmatpush.bf16.msra.mxu1 %v6532_v45  ;;  %2328 = vmatpush.bf16.msrb.mxu3 %v6533_v43  ;;  %v6543_v45 = vld [vmem:[#allocation81_spill] sm:$0xff]  ;;  %v6544_v43 = vld [vmem:[#allocation68_spill] sm:$0xff] }
 0x327   :  { %2291 = vmatpush.bf16.msra.mxu0 %v6534_v21  ;;  %2317 = vmatpush.bf16.msrb.mxu2 %v6535_v61  ;;  %v6545_v21 = vld [vmem:[#allocation78_spill] sm:$0xff] }
 0x328   :  { %v6546_v61 = vld [vmem:[#allocation74_spill] sm:$0xff] }
 0x329   :  { %2303 = vmatpush.bf16.msra.mxu1 %v6536_v55  ;;  %2329 = vmatpush.bf16.msrb.mxu3 %v6537_v44  ;;  %v6547_v55 = vld [vmem:[#allocation85_spill] sm:$0xff]  ;;  %v6548_v44 = vld [vmem:[#allocation72_spill] sm:$0xff] }
 0x32b   :  { %2292 = vmatpush.bf16.msra.mxu0 %v6538_v17  ;;  %2318 = vmatpush.bf16.msrb.mxu2 %v6539_v22  ;;  %v6549_v17 = vld [vmem:[#allocation83_spill] sm:$0xff]  ;;  %v6550_v22 = vld [vmem:[#allocation76_spill] sm:$0xff] }
 0x32d   :  { %2304 = vmatpush.bf16.msra.mxu1 %v6540_v36  ;;  %2330 = vmatpush.bf16.msrb.mxu3 %v6541_v38  ;;  %v6551_v36 = vld [vmem:[#allocation87_spill] sm:$0xff] }
 0x32f   :  { %2293 = vmatpush.bf16.msra.mxu0 %v6542_v3  ;;  %2319 = vmatpush.bf16.msrb.mxu2 %v6543_v45  ;;  %v6552_v45 = vld [vmem:[#allocation110_spill] sm:$0xff] }
 0x331   :  { %2305 = vmatpush.bf16.msra.mxu1 %v6544_v43  ;;  %2331 = vmatpush.bf16.msrb.mxu3 %v6545_v21  ;;  %v435_v43 = vadd.f32 %v6553_v2, %v6552_v45 }
 0x333   :  { %2294 = vmatpush.bf16.msra.mxu0 %v6546_v61  ;;  %2320 = vmatpush.bf16.msrb.mxu2 %v6547_v55 }
 0x335   :  { %2306 = vmatpush.bf16.msra.mxu1 %v6548_v44  ;;  %2332 = vmatpush.bf16.msrb.mxu3 %v6549_v17  ;;  %v6554_v17 = vld [vmem:[#allocation123_spill] sm:$0xff] }
 0x339   :  { %2307 = vmatpush.bf16.msra.mxu1 %v6550_v22  ;;  %2333 = vmatpush.bf16.msrb.mxu3 %v6551_v36 }
 0x353   :  { %v1982_v38 = vpop.f32.mrf.mxu0 }
 0x359   :  { %v1995_v3 = vpop.f32.mrf.mxu1  ;;  %v2008_v35 = vpop.f32.mrf.mxu2 }
 0x35a   :  { %v1996_v18 = vadd.f32 %v1995_v3, %v1982_v38  ;;  %v6555_v38 = vld [vmem:[#allocation115_spill] sm:$0xff]  ;;  %v6556_v3 = vld [vmem:[#allocation120_spill] sm:$0xff] }
 0x35b   :  { %v1984_v21 = vpop.f32.mrf.mxu0 }
 0x35c   :  { %v2129_v62 = vadd.f32 %v1996_v18, %v435_v43  ;;  %v493_v18 = vadd.f32 %v6556_v3, %v6555_v38 }
 0x35e   :  { %v3948_v61 = vmul.f32 -1.442695, %v2129_v62 }
 0x35f   :  { %v2021_v48 = vpop.f32.mrf.mxu3 }
 0x360   :  { %4200 = vpow2.f32 %v3948_v61  ;;  %v2022_v55 = vadd.f32 %v2021_v48, %v2008_v35 }
 0x361   :  { %v1997_v44 = vpop.f32.mrf.mxu1  ;;  %v2010_v33 = vpop.f32.mrf.mxu2 }
 0x362   :  { %v2130_v34 = vadd.f32 %v2022_v55, %v6554_v17 }
 0x363   :  { %v2034_v22 = vpop.f32.mrf.mxu0 }
 0x364   :  { %v3949_v60 = vmul.f32 -1.442695, %v2130_v34 }
 0x366   :  { %v4201_v36 = vpop.eup %4200  ;;  %4202 = vpow2.f32 %v3949_v60 }
 0x367   :  { %v2145_v24 = vadd.f32 1.0, %v4201_v36  ;;  %v2023_v7 = vpop.f32.mrf.mxu3  ;;  %v6557_v36 = vld [vmem:[#allocation126_spill] sm:$0xff] }
 0x369   :  { %4204 = vrcp.f32 %v2145_v24  ;;  %v2047_v59 = vpop.f32.mrf.mxu1  ;;  %v2060_v2 = vpop.f32.mrf.mxu2  ;;  %vm2154_vm14 = vweird.f32 %v2145_v24 }
 0x36a   :  { %v2048_v62 = vadd.f32 %v2047_v59, %v2034_v22 }
 0x36b   :  { %v2036_v43 = vpop.f32.mrf.mxu0 }
 0x36c   :  { %v4203_v61 = vpop.eup %4202  ;;  %v2131_v48 = vadd.f32 %v2048_v62, %v493_v18 }
 0x36d   :  { %v2146_v44 = vadd.f32 1.0, %v4203_v61 }
 0x36e   :  { %v3950_v33 = vmul.f32 -1.442695, %v2131_v48  ;;  %v2160_v48 = vand.u32 2147483648, %v2145_v24 }
 0x36f   :  { %v4205_v35 = vpop.eup %4204  ;;  %4206 = vrcp.f32 %v2146_v44  ;;  %v2073_v55 = vpop.f32.mrf.mxu3  ;;  %v2175_v15 = vand.u32 2147483648, %v2146_v44  ;;  %vm2169_vm3 = vweird.f32 %v2146_v44  ;;  %v2173_v13 = vand.u32 2147483647, %v2146_v44 }
 0x370   :  { %4208 = vpow2.f32 %v3950_v33  ;;  %v2074_v34 = vadd.f32 %v2073_v55, %v2060_v2  ;;  %v2150_v60 = vmul.f32 %v4205_v35, %v2145_v24  ;;  %vm2155_vm13 = vweird.f32 %v4205_v35 }
 0x371   :  { %v2049_v17 = vpop.f32.mrf.mxu1  ;;  %v2062_v7 = vpop.f32.mrf.mxu2  ;;  %v2158_v2 = vand.u32 2147483647, %v2145_v24  ;;  %vm2156_vm15 = vmor %vm2154_vm14, %vm2155_vm13  ;;  %v6559_v24 = vld [vmem:[#allocation140_spill] sm:$0xff]  ;;  %vm2174_vm7 = vcmp.eq.f32.partialorder %v2173_v13, 8.507059e+37 }
 0x372   :  { %v2132_v21 = vadd.f32 %v2074_v34, %v6557_v36  ;;  %v2151_v45 = vsub.f32 1.0, %v2150_v60 }
 0x373   :  { %v2086_v52 = vpop.f32.mrf.mxu0  ;;  %vm2159_vm0 = vcmp.eq.f32.partialorder %v2158_v2, 8.507059e+37 }
 0x374   :  { %v3951_v9 = vmul.f32 -1.442695, %v2132_v21  ;;  %v2152_v3 = vmul.f32 %v4205_v35, %v2151_v45  ;;  %v2161_v45 = vor.u32 1.1754944e-38, %v2160_v48 }
 0x375   :  { %v4207_v59 = vpop.eup %4206 }
 0x376   :  { %v4209_v22 = vpop.eup %4208  ;;  %4210 = vpow2.f32 %v3951_v9  ;;  %v2153_v18 = vadd.f32 %v4205_v35, %v2152_v3  ;;  %v2165_v62 = vmul.f32 %v4207_v59, %v2146_v44  ;;  %v6558_v9 = vld [vmem:[#allocation152_spill] sm:$0xff]  ;;  %vm2170_vm2 = vweird.f32 %v4207_v59 }
 0x377   :  { %v2147_v43 = vadd.f32 1.0, %v4209_v22  ;;  %v2075_v61 = vpop.f32.mrf.mxu3  ;;  %vm2171_vm6 = vmor %vm2169_vm3, %vm2170_vm2 }
 0x378   :  { %v2166_v33 = vsub.f32 1.0, %v2165_v62  ;;  %v2157_v17 = vsel %vm2156_vm15, %v4205_v35, %v2153_v18  ;;  %v6560_v62 = vld [vmem:[#allocation143_spill] sm:$0xff] }
 0x379   :  { %4212 = vrcp.f32 %v2147_v43  ;;  %v2099_v55 = vpop.f32.mrf.mxu1  ;;  %v2112_v34 = vpop.f32.mrf.mxu2  ;;  %v2162_v61 = vsel %vm2159_vm0, %v2161_v45, %v2157_v17  ;;  %v551_v31 = vadd.f32 %v6560_v62, %v6559_v24  ;;  %v2190_v45 = vand.u32 2147483648, %v2147_v43 }
 0x37a   :  { %v2100_v60 = vadd.f32 %v2099_v55, %v2086_v52  ;;  %v2167_v7 = vmul.f32 %v4207_v59, %v2166_v33  ;;  %v2176_v55 = vor.u32 1.1754944e-38, %v2175_v15  ;;  %v2188_v44 = vand.u32 2147483647, %v2147_v43 }
 0x37b   :  { %v2088_v36 = vpop.f32.mrf.mxu0  ;;  %vm2184_vm9 = vweird.f32 %v2147_v43  ;;  %v2191_v15 = vor.u32 1.1754944e-38, %v2190_v45 }
 0x37c   :  { %v4211_v21 = vpop.eup %4210  ;;  %v2209_v3 = vadd.f32 %v2100_v60, %v6558_v9  ;;  %v2168_v38 = vadd.f32 %v4207_v59, %v2167_v7  ;;  %vm2189_vm14 = vcmp.eq.f32.partialorder %v2188_v44, 8.507059e+37 }
 0x37d   :  { %v2148_v22 = vadd.f32 1.0, %v4211_v21 }
 0x37e   :  { %v2211_v10 = vmul.f32 %v2209_v3, %v2162_v61  ;;  %v2172_v33 = vsel %vm2171_vm6, %v4207_v59, %v2168_v38  ;;  %vm3952_vm6 = vcmp.gt.s32.totalorder %v5080_v42, 3 }
 0x37f   :  { %v4213_v52 = vpop.eup %4212  ;;  %4214 = vrcp.f32 %v2148_v22  ;;  %v2125_v35 = vpop.f32.mrf.mxu3  ;;  %v2177_v21 = vsel %vm2174_vm7, %v2176_v55, %v2172_v33  ;;  %v2203_v33 = vand.u32 2147483647, %v2148_v22  ;;  %vm2199_vm0 = vweird.f32 %v2148_v22 }
 0x380   :  { %v2180_v18 = vmul.f32 %v4213_v52, %v2147_v43  ;;  %v2213_v48 = vadd.f32 %v2211_v10, %v551_v31  ;;  %v2126_v2 = vadd.f32 %v2125_v35, %v2112_v34  ;;  %vm2185_vm8 = vweird.f32 %v4213_v52  ;;  %v6561_v31 = vld [vmem:[#allocation146_spill] sm:$0xff] }
 0x381   :  { %v2101_v60 = vpop.f32.mrf.mxu1  ;;  %v2114_v7 = vpop.f32.mrf.mxu2  ;;  %vm2186_vm13 = vmor %vm2184_vm9, %vm2185_vm8  ;;  %v2205_v35 = vand.u32 2147483648, %v2148_v22  ;;  %vm2204_vm3 = vcmp.eq.f32.partialorder %v2203_v33, 8.507059e+37  ;;  %vm3953_vm7 = vcmp.gt.s32.totalorder %v5080_v42, 4  ;;  %v6572_v33 = vld [vmem:[#allocation23_spill] sm:$0xff] }
 0x382   :  { %v2181_v36 = vsub.f32 1.0, %v2180_v18  ;;  %v2210_v17 = vadd.f32 %v2126_v2, %v5067_v23  ;;  %4216 = vtanh.f32 %v2213_v48 }
 0x384   :  { %v2182_v3 = vmul.f32 %v4213_v52, %v2181_v36  ;;  %v2212_v61 = vmul.f32 %v2210_v17, %v2177_v21  ;;  %v2206_v36 = vor.u32 1.1754944e-38, %v2205_v35  ;;  %v6569_v35 = vld [vmem:[#allocation37_spill] sm:$0xff] }
 0x385   :  { %v4215_v62 = vpop.eup %4214 }
 0x386   :  { %v2183_v24 = vadd.f32 %v4213_v52, %v2182_v3  ;;  %v2195_v10 = vmul.f32 %v4215_v62, %v2148_v22  ;;  %v2214_v38 = vadd.f32 %v2212_v61, %v6561_v31  ;;  %vm2200_vm15 = vweird.f32 %v4215_v62  ;;  %v6563_v31 = vld [vmem:[#allocation35_spill] sm:$0xff] }
 0x387   :  { %v2127_v59 = vpop.f32.mrf.mxu3  ;;  %vm2201_vm2 = vmor %vm2199_vm0, %vm2200_vm15 }
 0x388   :  { %v2196_v13 = vsub.f32 1.0, %v2195_v10  ;;  %v2187_v34 = vsel %vm2186_vm13, %v4213_v52, %v2183_v24  ;;  %v4217_v60 = vpop.eup %4216  ;;  %4218 = vtanh.f32 %v2214_v38  ;;  %v6564_v38 = vld [vmem:[#allocation101_spill] sm:$0xff]  ;;  %v6566_v59 = vld [vmem:[#allocation18_spill] sm:$0xff] }
 0x389   :  { %v2192_v18 = vsel %vm2189_vm14, %v2191_v15, %v2187_v34  ;;  %v6565_v15 = vld [vmem:[#allocation103_spill] sm:$0xff]  ;;  %v6568_v34 = vld [vmem:[#allocation21_spill] sm:$0xff] }
 0x38a   :  { %v2197_v2 = vmul.f32 %v4215_v62, %v2196_v13  ;;  %v2217_v55 = vsub.f32 1.0, %v2192_v18  ;;  %v2221_v7 = vmul.f32 %v2192_v18, %v5358_v20  ;;  %v6567_v13 = vld [vmem:[#allocation34_spill] sm:$0xff]  ;;  %v6570_v18 = vld [vmem:[#allocation20_spill] sm:$0xff] }
 0x38c   :  { %v2198_v48 = vadd.f32 %v4215_v62, %v2197_v2  ;;  %v2219_v43 = vmul.f32 %v4217_v60, %v2217_v55  ;;  %v6571_v2 = vld [vmem:[#allocation36_spill] sm:$0xff]  ;;  %v6573_v55 = vld [vmem:[#allocation41_spill] sm:$0xff]  ;;  %v6574_v60 = vld [vmem:[#allocation22_spill] sm:$0xff] }
 0x38e   :  { %v5482_v17 = vadd.f32 %v2221_v7, %v2219_v43  ;;  %v2202_v45 = vsel %vm2201_vm2, %v4215_v62, %v2198_v48  ;;  %v4219_v22 = vpop.eup %4218  ;;  %v6575_v48 = vld [vmem:[#allocation39_spill] sm:$0xff]  ;;  %v6576_v43 = vld [vmem:[#allocation25_spill] sm:$0xff] }
 0x38f   :  { %v2207_v24 = vsel %vm2204_vm3, %v2206_v36, %v2202_v45  ;;  %v6577_v7 = vld [vmem:[#allocation45_spill] sm:$0xff]  ;;  %v6578_v36 = vld [vmem:[#allocation24_spill] sm:$0xff]  ;;  %v6579_v45 = vld [vmem:[#allocation42_spill] sm:$0xff] }
 0x390   :  { %v2218_v52 = vsub.f32 1.0, %v2207_v24  ;;  %v5489_v21 = vsel %vm3952_vm6, %v5482_v17, %v5358_v20  ;;  %v2222_v61 = vmul.f32 %v2207_v24, %v5372_v8  ;;  %v6580_v24 = vld [vmem:[#allocation27_spill] sm:$0xff] }
 0x391   :  { %v2233_v3 = vpack.c.bf16 %v5489_v21, %v5489_v21 }
 0x392   :  { %v2220_v44 = vmul.f32 %v4219_v22, %v2218_v52  ;;  %v6581_v52 = vld [vmem:[#allocation47_spill] sm:$0xff]  ;;  %v6582_v22 = vld [vmem:[#allocation26_spill] sm:$0xff] }
 0x393   :  { %2243 = vmatmul.bf16.vlgmr.msrb.gmra.mxu0 %v2233_v3  ;;  %2269 = vmatmul.bf16.vlgmr.msra.gmra.mxu2 %v2233_v3 }
 0x394   :  { %v5494_v62 = vadd.f32 %v2222_v61, %v2220_v44  ;;  %2339 = vmatpush.bf16.msrb.mxu0 %v6343_v6  ;;  %2365 = vmatpush.bf16.msra.mxu2 %v6344_v19  ;;  %v6584_v44 = vld [vmem:[#allocation29_spill] sm:$0xff] }
 0x395   :  { %v6585_v61 = vld [vmem:[#allocation49_spill] sm:$0xff] }
 0x396   :  { %v5503_v20 = vsel %vm3953_vm7, %v5494_v62, %v5372_v8  ;;  %v6562_v8 = vld [vmem:[#allocation19_spill] sm:$0xff] }
 0x397   :  { %v2234_v10 = vpack.c.bf16 %v5503_v20, %v5503_v20 }
 0x398   :  { %2340 = vmatpush.bf16.msrb.mxu0 %v6345_v11  ;;  %2366 = vmatpush.bf16.msra.mxu2 %v6346_v49 }
 0x399   :  { %2256 = vmatmul.bf16.vlgmr.msrb.gmra.mxu1 %v2234_v10  ;;  %2282 = vmatmul.bf16.vlgmr.msra.gmra.mxu3 %v2234_v10 }
 0x39a   :  { %2352 = vmatpush.bf16.msrb.mxu1 %v6334_v54  ;;  %2378 = vmatpush.bf16.msra.mxu3 %v6335_v4 }
 0x39c   :  { %2341 = vmatpush.bf16.msrb.mxu0 %v6347_v32  ;;  %2367 = vmatpush.bf16.msra.mxu2 %v6348_v12 }
 0x39e   :  { %2353 = vmatpush.bf16.msrb.mxu1 %v6336_v56  ;;  %2379 = vmatpush.bf16.msra.mxu3 %v6337_v25 }
 0x3a0   :  { %2342 = vmatpush.bf16.msrb.mxu0 %v6349_v46  ;;  %2368 = vmatpush.bf16.msra.mxu2 %v4800_v51 }
 0x3a2   :  { %2354 = vmatpush.bf16.msrb.mxu1 %v6338_v41  ;;  %2380 = vmatpush.bf16.msra.mxu3 %v6339_v58 }
 0x3a3   :  { %2295 = vmatmul.bf16.vlgmr.msra.gmra.mxu0 %v2233_v3  ;;  %2321 = vmatmul.bf16.vlgmr.msrb.gmra.mxu2 %v2233_v3 }
 0x3a4   :  { %2343 = vmatpush.bf16.msrb.mxu0 %v6350_v14  ;;  %2369 = vmatpush.bf16.msra.mxu2 %v4812_v40 }
 0x3a6   :  { %2355 = vmatpush.bf16.msrb.mxu1 %v6341_v50  ;;  %2381 = vmatpush.bf16.msra.mxu3 %v4806_v30 }
 0x3a8   :  { %2344 = vmatpush.bf16.msrb.mxu0 %v6351_v26  ;;  %2370 = vmatpush.bf16.msra.mxu2 %v4824_v63 }
 0x3a9   :  { %2308 = vmatmul.bf16.vlgmr.msra.gmra.mxu1 %v2234_v10  ;;  %2334 = vmatmul.bf16.vlgmr.msrb.gmra.mxu3 %v2234_v10 }
 0x3aa   :  { %2356 = vmatpush.bf16.msrb.mxu1 %v6342_v16  ;;  %2382 = vmatpush.bf16.msra.mxu3 %v4818_v39 }
 0x3ac   :  { %2345 = vmatpush.bf16.msrb.mxu0 %v4809_v29  ;;  %2371 = vmatpush.bf16.msra.mxu2 %v4836_v37 }
 0x3ae   :  { %2357 = vmatpush.bf16.msrb.mxu1 %v4803_v5  ;;  %2383 = vmatpush.bf16.msra.mxu3 %v4831_v57 }
 0x3b0   :  { %2346 = vmatpush.bf16.msrb.mxu0 %v6352_v28  ;;  %2372 = vmatpush.bf16.msra.mxu2 %v4843_v1 }
 0x3b2   :  { %2358 = vmatpush.bf16.msrb.mxu1 %v4815_v27  ;;  %2384 = vmatpush.bf16.msra.mxu3 %v6487_v0 }
 0x3b3   :  { %2347 = vmatmul.bf16.vlgmr.msrb.gmra.mxu0 %v2233_v3  ;;  %2373 = vmatmul.bf16.vlgmr.msra.gmra.mxu2 %v2233_v3  ;;  %v6583_v3 = vld [vmem:[#allocation46_spill] sm:$0xff] }
 0x3b4   :  { %2497 = vmatpush.bf16.msra.mxu0 %v4518_v47  ;;  %2523 = vmatpush.bf16.msrb.mxu2 %v6353_v53 }
 0x3b6   :  { %2359 = vmatpush.bf16.msrb.mxu1 %v6564_v38  ;;  %2385 = vmatpush.bf16.msra.mxu3 %v6565_v15 }
 0x3b8   :  { %2498 = vmatpush.bf16.msra.mxu0 %v6562_v8  ;;  %2524 = vmatpush.bf16.msrb.mxu2 %v6563_v31 }
 0x3b9   :  { %2360 = vmatmul.bf16.vlgmr.msrb.gmra.mxu1 %v2234_v10  ;;  %2386 = vmatmul.bf16.vlgmr.msra.gmra.mxu3 %v2234_v10  ;;  %v6586_v10 = vld [vmem:[#allocation28_spill] sm:$0xff] }
 0x3ba   :  { %2510 = vmatpush.bf16.msra.mxu1 %v6566_v59  ;;  %2536 = vmatpush.bf16.msrb.mxu3 %v6567_v13 }
 0x3bc   :  { %2499 = vmatpush.bf16.msra.mxu0 %v6568_v34  ;;  %2525 = vmatpush.bf16.msrb.mxu2 %v6569_v35 }
 0x3be   :  { %2511 = vmatpush.bf16.msra.mxu1 %v6570_v18  ;;  %2537 = vmatpush.bf16.msrb.mxu3 %v6571_v2  ;;  %v6628_v2 = vld [vmem:[#allocation119_spill] sm:$0xff] }
 0x3c0   :  { %2500 = vmatpush.bf16.msra.mxu0 %v6572_v33  ;;  %2526 = vmatpush.bf16.msrb.mxu2 %v6573_v55 }
 0x3c2   :  { %2512 = vmatpush.bf16.msra.mxu1 %v6574_v60  ;;  %2538 = vmatpush.bf16.msrb.mxu3 %v6575_v48 }
 0x3c4   :  { %2501 = vmatpush.bf16.msra.mxu0 %v6576_v43  ;;  %2527 = vmatpush.bf16.msrb.mxu2 %v6577_v7  ;;  %v6587_v43 = vld [vmem:[#allocation48_spill] sm:$0xff]  ;;  %v6588_v7 = vld [vmem:[#allocation31_spill] sm:$0xff] }
 0x3c6   :  { %2513 = vmatpush.bf16.msra.mxu1 %v6578_v36  ;;  %2539 = vmatpush.bf16.msrb.mxu3 %v6579_v45  ;;  %v6589_v36 = vld [vmem:[#allocation53_spill] sm:$0xff]  ;;  %v6590_v45 = vld [vmem:[#allocation38_spill] sm:$0xff] }
 0x3c8   :  { %2502 = vmatpush.bf16.msra.mxu0 %v6580_v24  ;;  %2528 = vmatpush.bf16.msrb.mxu2 %v6581_v52  ;;  %v6591_v24 = vld [vmem:[#allocation58_spill] sm:$0xff] }
 0x3c9   :  { %v6592_v52 = vld [vmem:[#allocation30_spill] sm:$0xff] }
 0x3ca   :  { %2514 = vmatpush.bf16.msra.mxu1 %v6582_v22  ;;  %2540 = vmatpush.bf16.msrb.mxu3 %v6583_v3  ;;  %v6593_v22 = vld [vmem:[#allocation51_spill] sm:$0xff] }
 0x3cb   :  { %v6594_v3 = vld [vmem:[#allocation43_spill] sm:$0xff] }
 0x3cc   :  { %2503 = vmatpush.bf16.msra.mxu0 %v6584_v44  ;;  %2529 = vmatpush.bf16.msrb.mxu2 %v6585_v61  ;;  %v6595_v44 = vld [vmem:[#allocation60_spill] sm:$0xff] }
 0x3cd   :  { %v6596_v61 = vld [vmem:[#allocation32_spill] sm:$0xff] }
 0x3ce   :  { %2515 = vmatpush.bf16.msra.mxu1 %v6586_v10  ;;  %2541 = vmatpush.bf16.msrb.mxu3 %v6587_v43  ;;  %v6597_v10 = vld [vmem:[#allocation54_spill] sm:$0xff]  ;;  %v6598_v43 = vld [vmem:[#allocation40_spill] sm:$0xff] }
 0x3d0   :  { %2504 = vmatpush.bf16.msra.mxu0 %v6588_v7  ;;  %2530 = vmatpush.bf16.msrb.mxu2 %v6589_v36  ;;  %v6599_v7 = vld [vmem:[#allocation59_spill] sm:$0xff]  ;;  %v6600_v36 = vld [vmem:[#allocation50_spill] sm:$0xff] }
 0x3d2   :  { %2516 = vmatpush.bf16.msra.mxu1 %v6592_v52  ;;  %2542 = vmatpush.bf16.msrb.mxu3 %v6593_v22  ;;  %v6603_v52 = vld [vmem:[#allocation62_spill] sm:$0xff]  ;;  %v6604_v22 = vld [vmem:[#allocation55_spill] sm:$0xff] }
 0x3d4   :  { %2549 = vmatpush.bf16.msrb.mxu0 %v6590_v45  ;;  %2575 = vmatpush.bf16.msra.mxu2 %v6591_v24  ;;  %v6601_v45 = vld [vmem:[#allocation64_spill] sm:$0xff] }
 0x3d5   :  { %v6602_v24 = vld [vmem:[#allocation44_spill] sm:$0xff] }
 0x3d6   :  { %2517 = vmatpush.bf16.msra.mxu1 %v6596_v61  ;;  %2543 = vmatpush.bf16.msrb.mxu3 %v6597_v10  ;;  %v6607_v61 = vld [vmem:[#allocation65_spill] sm:$0xff] }
 0x3d7   :  { %v6608_v10 = vld [vmem:[#allocation61_spill] sm:$0xff] }
 0x3d8   :  { %2550 = vmatpush.bf16.msrb.mxu0 %v6594_v3  ;;  %2576 = vmatpush.bf16.msra.mxu2 %v6595_v44  ;;  %v6605_v3 = vld [vmem:[#allocation67_spill] sm:$0xff]  ;;  %v6606_v44 = vld [vmem:[#allocation52_spill] sm:$0xff] }
 0x3da   :  { %2562 = vmatpush.bf16.msrb.mxu1 %v6598_v43  ;;  %2588 = vmatpush.bf16.msra.mxu3 %v6599_v7  ;;  %v6609_v43 = vld [vmem:[#allocation71_spill] sm:$0xff]  ;;  %v6610_v7 = vld [vmem:[#allocation56_spill] sm:$0xff] }
 0x3dc   :  { %2551 = vmatpush.bf16.msrb.mxu0 %v6600_v36  ;;  %2577 = vmatpush.bf16.msra.mxu2 %v6601_v45  ;;  %v6611_v36 = vld [vmem:[#allocation69_spill] sm:$0xff]  ;;  %v6612_v45 = vld [vmem:[#allocation66_spill] sm:$0xff] }
 0x3de   :  { %2563 = vmatpush.bf16.msrb.mxu1 %v6602_v24  ;;  %2589 = vmatpush.bf16.msra.mxu3 %v6603_v52  ;;  %v6613_v24 = vld [vmem:[#allocation75_spill] sm:$0xff] }
 0x3df   :  { %v6614_v52 = vld [vmem:[#allocation63_spill] sm:$0xff] }
 0x3e0   :  { %2552 = vmatpush.bf16.msrb.mxu0 %v6604_v22  ;;  %2578 = vmatpush.bf16.msra.mxu2 %v6605_v3  ;;  %v6615_v22 = vld [vmem:[#allocation73_spill] sm:$0xff]  ;;  %v6616_v3 = vld [vmem:[#allocation70_spill] sm:$0xff] }
 0x3e2   :  { %2564 = vmatpush.bf16.msrb.mxu1 %v6606_v44  ;;  %2590 = vmatpush.bf16.msra.mxu3 %v6607_v61  ;;  %v6617_v44 = vld [vmem:[#allocation81_spill] sm:$0xff]  ;;  %v6618_v61 = vld [vmem:[#allocation68_spill] sm:$0xff] }
 0x3e4   :  { %2553 = vmatpush.bf16.msrb.mxu0 %v6608_v10  ;;  %2579 = vmatpush.bf16.msra.mxu2 %v6609_v43  ;;  %v6619_v10 = vld [vmem:[#allocation78_spill] sm:$0xff] }
 0x3e5   :  { %v6620_v43 = vld [vmem:[#allocation74_spill] sm:$0xff] }
 0x3e6   :  { %2565 = vmatpush.bf16.msrb.mxu1 %v6610_v7  ;;  %2591 = vmatpush.bf16.msra.mxu3 %v6611_v36  ;;  %v6621_v7 = vld [vmem:[#allocation85_spill] sm:$0xff]  ;;  %v6622_v36 = vld [vmem:[#allocation72_spill] sm:$0xff] }
 0x3e8   :  { %2554 = vmatpush.bf16.msrb.mxu0 %v6612_v45  ;;  %2580 = vmatpush.bf16.msra.mxu2 %v6613_v24  ;;  %v6623_v45 = vld [vmem:[#allocation83_spill] sm:$0xff]  ;;  %v6624_v24 = vld [vmem:[#allocation76_spill] sm:$0xff] }
 0x3ea   :  { %2566 = vmatpush.bf16.msrb.mxu1 %v6614_v52  ;;  %2592 = vmatpush.bf16.msra.mxu3 %v6615_v22  ;;  %v6625_v52 = vld [vmem:[#allocation87_spill] sm:$0xff] }
 0x3ec   :  { %2555 = vmatpush.bf16.msrb.mxu0 %v6616_v3  ;;  %2581 = vmatpush.bf16.msra.mxu2 %v6617_v44 }
 0x3ee   :  { %2567 = vmatpush.bf16.msrb.mxu1 %v6618_v61  ;;  %2593 = vmatpush.bf16.msra.mxu3 %v6619_v10  ;;  %v6626_v61 = vld [vmem:[#allocation122_spill] sm:$0xff] }
 0x3f0   :  { %2556 = vmatpush.bf16.msrb.mxu0 %v6620_v43  ;;  %2582 = vmatpush.bf16.msra.mxu2 %v6621_v7  ;;  %v6627_v43 = vld [vmem:[#allocation104_spill] sm:$0xff] }
 0x3f1   :  { %v464_v7 = vadd.f32 %v6628_v2, %v6627_v43 }
 0x3f2   :  { %2568 = vmatpush.bf16.msrb.mxu1 %v6622_v36  ;;  %2594 = vmatpush.bf16.msra.mxu3 %v6623_v45 }
 0x3f6   :  { %2569 = vmatpush.bf16.msrb.mxu1 %v6624_v24  ;;  %2595 = vmatpush.bf16.msra.mxu3 %v6625_v52 }
 0x410   :  { %v2244_v22 = vpop.f32.mrf.mxu0 }
 0x416   :  { %v2257_v3 = vpop.f32.mrf.mxu1  ;;  %v2270_v48 = vpop.f32.mrf.mxu2 }
 0x417   :  { %v2258_v44 = vadd.f32 %v2257_v3, %v2244_v22 }
 0x418   :  { %v2246_v60 = vpop.f32.mrf.mxu0 }
 0x419   :  { %v2391_v55 = vadd.f32 %v2258_v44, %v6626_v61  ;;  %v6629_v61 = vld [vmem:[#allocation124_spill] sm:$0xff] }
 0x41b   :  { %v3954_v10 = vmul.f32 -1.442695, %v2391_v55 }
 0x41c   :  { %v2283_v33 = vpop.f32.mrf.mxu3 }
 0x41d   :  { %4220 = vpow2.f32 %v3954_v10  ;;  %v2284_v36 = vadd.f32 %v2283_v33, %v2270_v48  ;;  %v6630_v48 = vld [vmem:[#allocation106_spill] sm:$0xff] }
 0x41e   :  { %v2259_v18 = vpop.f32.mrf.mxu1  ;;  %v2272_v45 = vpop.f32.mrf.mxu2 }
 0x41f   :  { %v2392_v35 = vadd.f32 %v2284_v36, %v464_v7  ;;  %v6631_v7 = vld [vmem:[#allocation121_spill] sm:$0xff] }
 0x420   :  { %v2296_v24 = vpop.f32.mrf.mxu0 }
 0x421   :  { %v3955_v34 = vmul.f32 -1.442695, %v2392_v35  ;;  %v522_v35 = vadd.f32 %v6631_v7, %v6630_v48 }
 0x423   :  { %v4221_v52 = vpop.eup %4220  ;;  %4222 = vpow2.f32 %v3955_v34 }
 0x424   :  { %v2407_v13 = vadd.f32 1.0, %v4221_v52  ;;  %v2285_v59 = vpop.f32.mrf.mxu3 }
 0x426   :  { %4224 = vrcp.f32 %v2407_v13  ;;  %v2309_v60 = vpop.f32.mrf.mxu1  ;;  %v2322_v22 = vpop.f32.mrf.mxu2  ;;  %v2422_v8 = vand.u32 2147483648, %v2407_v13  ;;  %vm2416_vm9 = vweird.f32 %v2407_v13 }
 0x427   :  { %v2310_v3 = vadd.f32 %v2309_v60, %v2296_v24 }
 0x428   :  { %v2298_v55 = vpop.f32.mrf.mxu0 }
 0x429   :  { %v4223_v44 = vpop.eup %4222  ;;  %v2393_v15 = vadd.f32 %v2310_v3, %v6629_v61 }
 0x42a   :  { %v2408_v2 = vadd.f32 1.0, %v4223_v44 }
 0x42b   :  { %v3956_v10 = vmul.f32 -1.442695, %v2393_v15 }
 0x42c   :  { %v4225_v33 = vpop.eup %4224  ;;  %4226 = vrcp.f32 %v2408_v2  ;;  %v2335_v18 = vpop.f32.mrf.mxu3  ;;  %vm2431_vm0 = vweird.f32 %v2408_v2 }
 0x42d   :  { %4228 = vpow2.f32 %v3956_v10  ;;  %v2336_v34 = vadd.f32 %v2335_v18, %v2322_v22  ;;  %v2412_v36 = vmul.f32 %v4225_v33, %v2407_v13  ;;  %vm2417_vm8 = vweird.f32 %v4225_v33 }
 0x42e   :  { %v2311_v59 = vpop.f32.mrf.mxu1  ;;  %v2324_v45 = vpop.f32.mrf.mxu2  ;;  %v2420_v10 = vand.u32 2147483647, %v2407_v13  ;;  %vm2418_vm13 = vmor %vm2416_vm9, %vm2417_vm8 }
 0x42f   :  { %v2394_v52 = vadd.f32 %v2336_v34, %v522_v35  ;;  %v2413_v43 = vsub.f32 1.0, %v2412_v36 }
 0x430   :  { %v2348_v24 = vpop.f32.mrf.mxu0  ;;  %vm2421_vm14 = vcmp.eq.f32.partialorder %v2420_v10, 8.507059e+37 }
 0x431   :  { %v3957_v60 = vmul.f32 -1.442695, %v2394_v52  ;;  %v2414_v55 = vmul.f32 %v4225_v33, %v2413_v43  ;;  %v2423_v43 = vor.u32 1.1754944e-38, %v2422_v8 }
 0x432   :  { %v4227_v38 = vpop.eup %4226 }
 0x433   :  { %v4229_v3 = vpop.eup %4228  ;;  %4230 = vpow2.f32 %v3957_v60  ;;  %v2415_v15 = vadd.f32 %v4225_v33, %v2414_v55  ;;  %v2427_v44 = vmul.f32 %v4227_v38, %v2408_v2  ;;  %vm2432_vm15 = vweird.f32 %v4227_v38 }
 0x434   :  { %v2409_v61 = vadd.f32 1.0, %v4229_v3  ;;  %v2337_v31 = vpop.f32.mrf.mxu3  ;;  %v2437_v3 = vand.u32 2147483648, %v2408_v2  ;;  %vm2433_vm2 = vmor %vm2431_vm0, %vm2432_vm15 }
 0x435   :  { %v2428_v22 = vsub.f32 1.0, %v2427_v44  ;;  %v2419_v34 = vsel %vm2418_vm13, %v4225_v33, %v2415_v15  ;;  %v2435_v44 = vand.u32 2147483647, %v2408_v2 }
 0x436   :  { %4232 = vrcp.f32 %v2409_v61  ;;  %v2361_v18 = vpop.f32.mrf.mxu1  ;;  %v2374_v7 = vpop.f32.mrf.mxu2  ;;  %v2424_v55 = vsel %vm2421_vm14, %v2423_v43, %v2419_v34  ;;  %v2438_v10 = vor.u32 1.1754944e-38, %v2437_v3  ;;  %v6633_v43 = vld [vmem:[#allocation135_spill] sm:$0xff]  ;;  %v2452_v2 = vand.u32 2147483648, %v2409_v61 }
 0x437   :  { %v2362_v35 = vadd.f32 %v2361_v18, %v2348_v24  ;;  %v2429_v36 = vmul.f32 %v4227_v38, %v2428_v22  ;;  %v6632_v24 = vld [vmem:[#allocation145_spill] sm:$0xff]  ;;  %vm2436_vm3 = vcmp.eq.f32.partialorder %v2435_v44, 8.507059e+37  ;;  %vm2446_vm9 = vweird.f32 %v2409_v61 }
 0x438   :  { %v2350_v59 = vpop.f32.mrf.mxu0 }
 0x439   :  { %v4231_v45 = vpop.eup %4230  ;;  %v2471_v52 = vadd.f32 %v2362_v35, %v6558_v9  ;;  %v2430_v60 = vadd.f32 %v4227_v38, %v2429_v36  ;;  %v6634_v59 = vld [vmem:[#allocation144_spill] sm:$0xff]  ;;  %v2450_v9 = vand.u32 2147483647, %v2409_v61 }
 0x43a   :  { %v2410_v31 = vadd.f32 1.0, %v4231_v45  ;;  %v580_v45 = vadd.f32 %v6634_v59, %v6633_v43  ;;  %v6665_v43 = vld [vmem:[#allocation53_spill] sm:$0xff] }
 0x43b   :  { %v2473_v13 = vmul.f32 %v2471_v52, %v2424_v55  ;;  %v2434_v22 = vsel %vm2433_vm2, %v4227_v38, %v2430_v60  ;;  %v2453_v60 = vor.u32 1.1754944e-38, %v2452_v2  ;;  %vm2451_vm14 = vcmp.eq.f32.partialorder %v2450_v9, 8.507059e+37 }
 0x43c   :  { %v4233_v48 = vpop.eup %4232  ;;  %4234 = vrcp.f32 %v2410_v31  ;;  %v2387_v0 = vpop.f32.mrf.mxu3  ;;  %v2439_v52 = vsel %vm2436_vm3, %v2438_v10, %v2434_v22  ;;  %v2465_v22 = vand.u32 2147483647, %v2410_v31  ;;  %vm2461_vm0 = vweird.f32 %v2410_v31 }
 0x43d   :  { %v2442_v33 = vmul.f32 %v4233_v48, %v2409_v61  ;;  %v2475_v8 = vadd.f32 %v2473_v13, %v6632_v24  ;;  %v2388_v15 = vadd.f32 %v2387_v0, %v2374_v7  ;;  %vm2447_vm8 = vweird.f32 %v4233_v48 }
 0x43e   :  { %v2363_v18 = vpop.f32.mrf.mxu1  ;;  %v2376_v35 = vpop.f32.mrf.mxu2  ;;  %vm2448_vm13 = vmor %vm2446_vm9, %vm2447_vm8  ;;  %vm2466_vm3 = vcmp.eq.f32.partialorder %v2465_v22, 8.507059e+37  ;;  %v6642_v22 = vld [vmem:[#allocation18_spill] sm:$0xff] }
 0x43f   :  { %v2443_v36 = vsub.f32 1.0, %v2442_v33  ;;  %v2472_v34 = vadd.f32 %v2388_v15, %v5067_v23  ;;  %4236 = vtanh.f32 %v2475_v8  ;;  %v2467_v33 = vand.u32 2147483648, %v2410_v31 }
 0x441   :  { %v2444_v55 = vmul.f32 %v4233_v48, %v2443_v36  ;;  %v2474_v27 = vmul.f32 %v2472_v34, %v2439_v52 }
 0x442   :  { %v4235_v53 = vpop.eup %4234 }
 0x443   :  { %v2445_v0 = vadd.f32 %v4233_v48, %v2444_v55  ;;  %v2457_v38 = vmul.f32 %v4235_v53, %v2410_v31  ;;  %v2476_v7 = vadd.f32 %v2474_v27, %v580_v45  ;;  %vm2462_vm15 = vweird.f32 %v4235_v53 }
 0x444   :  { %v2389_v3 = vpop.f32.mrf.mxu3  ;;  %vm2463_vm2 = vmor %vm2461_vm0, %vm2462_vm15  ;;  %v2468_v27 = vor.u32 1.1754944e-38, %v2467_v33  ;;  %v6639_v33 = vld [vmem:[#allocation35_spill] sm:$0xff] }
 0x445   :  { %v2458_v13 = vsub.f32 1.0, %v2457_v38  ;;  %v2449_v44 = vsel %vm2448_vm13, %v4233_v48, %v2445_v0  ;;  %v4237_v18 = vpop.eup %4236  ;;  %4238 = vtanh.f32 %v2476_v7  ;;  %v2232_v48 = vsel %vm3953_vm7, %v5494_v62, 0.0 }
 0x446   :  { %v2454_v24 = vsel %vm2451_vm14, %v2453_v60, %v2449_v44  ;;  %v6638_v44 = vld [vmem:[#allocation19_spill] sm:$0xff] }
 0x447   :  { %v2459_v15 = vmul.f32 %v4235_v53, %v2458_v13  ;;  %v2479_v10 = vsub.f32 1.0, %v2454_v24  ;;  %v2483_v61 = vmul.f32 %v2454_v24, %v5489_v21  ;;  %v6637_v13 = vld [vmem:[#allocation102_spill] sm:$0xff]  ;;  %v6640_v24 = vld [vmem:[#allocation101_spill] sm:$0xff] }
 0x449   :  { %v2460_v35 = vadd.f32 %v4235_v53, %v2459_v15  ;;  %v2481_v8 = vmul.f32 %v4237_v18, %v2479_v10  ;;  %v6641_v15 = vld [vmem:[#allocation103_spill] sm:$0xff]  ;;  %v6643_v10 = vld [vmem:[#allocation34_spill] sm:$0xff]  ;;  %v6644_v18 = vld [vmem:[#allocation21_spill] sm:$0xff] }
 0x44b   :  { %v2485_v36 = vadd.f32 %v2483_v61, %v2481_v8  ;;  %v2464_v9 = vsel %vm2463_vm2, %v4235_v53, %v2460_v35  ;;  %v4239_v2 = vpop.eup %4238  ;;  %v6645_v35 = vld [vmem:[#allocation37_spill] sm:$0xff]  ;;  %v6646_v8 = vld [vmem:[#allocation20_spill] sm:$0xff] }
 0x44c   :  { %v2469_v34 = vsel %vm2466_vm3, %v2468_v27, %v2464_v9  ;;  %v6647_v61 = vld [vmem:[#allocation36_spill] sm:$0xff]  ;;  %v6648_v27 = vld [vmem:[#allocation23_spill] sm:$0xff]  ;;  %v6650_v9 = vld [vmem:[#allocation22_spill] sm:$0xff] }
 0x44d   :  { %v2493_v59 = vsel %vm3953_vm7, %v2485_v36, 0.0  ;;  %v2480_v45 = vsub.f32 1.0, %v2469_v34  ;;  %v5621_v31 = vsel %vm3953_vm7, %v2485_v36, %v5489_v21  ;;  %v2484_v0 = vmul.f32 %v2469_v34, %v5503_v20  ;;  %v6649_v36 = vld [vmem:[#allocation41_spill] sm:$0xff]  ;;  %v6651_v34 = vld [vmem:[#allocation39_spill] sm:$0xff] }
 0x44e   :  { %v3285_v52 = vadd.f32 %v2493_v59, %v2232_v48  ;;  %v2495_v55 = vpack.c.bf16 %v5621_v31, %v5621_v31  ;;  %v2231_v21 = vsel %vm3952_vm6, %v5482_v17, 0.0  ;;  %v6635_v17 = vld [vmem:[#allocation33_spill] sm:$0xff] }
 0x44f   :  { %v2482_v53 = vmul.f32 %v4239_v2, %v2480_v45  ;;  %v6652_v48 = vld [vmem:[#allocation25_spill] sm:$0xff]  ;;  %v6654_v45 = vld [vmem:[#allocation24_spill] sm:$0xff]  ;;  %v6655_v2 = vld [vmem:[#allocation42_spill] sm:$0xff] }
 0x450   :  { %3293 = vst [vmem:[#allocation10 + $0x20] sm:$0xff] %v3285_v52  ;;  %2505 = vmatmul.bf16.vlgmr.msra.gmra.mxu0 %v2495_v55  ;;  %2531 = vmatmul.bf16.vlgmr.msrb.gmra.mxu2 %v2495_v55  ;;  %v6653_v59 = vld [vmem:[#allocation45_spill] sm:$0xff]  ;;  %v6656_v52 = vld [vmem:[#allocation27_spill] sm:$0xff] }
 0x451   :  { %v2486_v62 = vadd.f32 %v2484_v0, %v2482_v53  ;;  %2601 = vmatpush.bf16.msra.mxu0 %v6343_v6  ;;  %2627 = vmatpush.bf16.msrb.mxu2 %v6344_v19  ;;  %v6658_v53 = vld [vmem:[#allocation26_spill] sm:$0xff] }
 0x452   :  { %v6659_v0 = vld [vmem:[#allocation46_spill] sm:$0xff] }
 0x453   :  { %v2494_v38 = vsel %vm3952_vm6, %v2486_v62, 0.0  ;;  %v5636_v7 = vsel %vm3952_vm6, %v2486_v62, %v5503_v20  ;;  %v6636_v20 = vld [vmem:[#allocation99_spill] sm:$0xff]  ;;  %v6660_v62 = vld [vmem:[#allocation29_spill] sm:$0xff] }
 0x454   :  { %v3284_v60 = vadd.f32 %v2494_v38, %v2231_v21  ;;  %v2496_v3 = vpack.c.bf16 %v5636_v7, %v5636_v7  ;;  %v6661_v21 = vld [vmem:[#allocation49_spill] sm:$0xff]  ;;  %v6662_v38 = vld [vmem:[#allocation28_spill] sm:$0xff] }
 0x455   :  { %2602 = vmatpush.bf16.msra.mxu0 %v6345_v11  ;;  %2628 = vmatpush.bf16.msrb.mxu2 %v6346_v49 }
 0x456   :  { %3292 = vst [vmem:[#allocation10 + $0x18] sm:$0xff] %v3284_v60  ;;  %2518 = vmatmul.bf16.vlgmr.msra.gmra.mxu1 %v2496_v3  ;;  %2544 = vmatmul.bf16.vlgmr.msrb.gmra.mxu3 %v2496_v3  ;;  %v6663_v60 = vld [vmem:[#allocation48_spill] sm:$0xff] }
 0x457   :  { %2614 = vmatpush.bf16.msra.mxu1 %v6334_v54  ;;  %2640 = vmatpush.bf16.msrb.mxu3 %v6335_v4 }
 0x459   :  { %2603 = vmatpush.bf16.msra.mxu0 %v6347_v32  ;;  %2629 = vmatpush.bf16.msrb.mxu2 %v6348_v12 }
 0x45b   :  { %2615 = vmatpush.bf16.msra.mxu1 %v6336_v56  ;;  %2641 = vmatpush.bf16.msrb.mxu3 %v6337_v25 }
 0x45d   :  { %2604 = vmatpush.bf16.msra.mxu0 %v6349_v46  ;;  %2630 = vmatpush.bf16.msrb.mxu2 %v4800_v51 }
 0x45f   :  { %2616 = vmatpush.bf16.msra.mxu1 %v6338_v41  ;;  %2642 = vmatpush.bf16.msrb.mxu3 %v6339_v58 }
 0x460   :  { %2557 = vmatmul.bf16.vlgmr.msrb.gmra.mxu0 %v2495_v55  ;;  %2583 = vmatmul.bf16.vlgmr.msra.gmra.mxu2 %v2495_v55 }
 0x461   :  { %2605 = vmatpush.bf16.msra.mxu0 %v6350_v14  ;;  %2631 = vmatpush.bf16.msrb.mxu2 %v4812_v40 }
 0x463   :  { %2617 = vmatpush.bf16.msra.mxu1 %v6341_v50  ;;  %2643 = vmatpush.bf16.msrb.mxu3 %v4806_v30 }
 0x465   :  { %2606 = vmatpush.bf16.msra.mxu0 %v6351_v26  ;;  %2632 = vmatpush.bf16.msrb.mxu2 %v4824_v63 }
 0x466   :  { %2570 = vmatmul.bf16.vlgmr.msrb.gmra.mxu1 %v2496_v3  ;;  %2596 = vmatmul.bf16.vlgmr.msra.gmra.mxu3 %v2496_v3 }
 0x467   :  { %2618 = vmatpush.bf16.msra.mxu1 %v6342_v16  ;;  %2644 = vmatpush.bf16.msrb.mxu3 %v4818_v39 }
 0x469   :  { %2607 = vmatpush.bf16.msra.mxu0 %v4809_v29  ;;  %2633 = vmatpush.bf16.msrb.mxu2 %v4836_v37 }
 0x46b   :  { %2619 = vmatpush.bf16.msra.mxu1 %v4803_v5  ;;  %2645 = vmatpush.bf16.msrb.mxu3 %v4831_v57 }
 0x46d   :  { %2608 = vmatpush.bf16.msra.mxu0 %v6352_v28  ;;  %2634 = vmatpush.bf16.msrb.mxu2 %v4843_v1 }
 0x46f   :  { %2620 = vmatpush.bf16.msra.mxu1 %v6636_v20  ;;  %2646 = vmatpush.bf16.msrb.mxu3 %v6637_v13 }
 0x470   :  { %2609 = vmatmul.bf16.vlgmr.msra.gmra.mxu0 %v2495_v55  ;;  %2635 = vmatmul.bf16.vlgmr.msrb.gmra.mxu2 %v2495_v55  ;;  %v6657_v55 = vld [vmem:[#allocation47_spill] sm:$0xff] }
 0x471   :  { %2759 = vmatpush.bf16.msrb.mxu0 %v4518_v47  ;;  %2785 = vmatpush.bf16.msra.mxu2 %v6635_v17 }
 0x473   :  { %2621 = vmatpush.bf16.msra.mxu1 %v6640_v24  ;;  %2647 = vmatpush.bf16.msrb.mxu3 %v6641_v15 }
 0x475   :  { %2760 = vmatpush.bf16.msrb.mxu0 %v6638_v44  ;;  %2786 = vmatpush.bf16.msra.mxu2 %v6639_v33 }
 0x476   :  { %2622 = vmatmul.bf16.vlgmr.msra.gmra.mxu1 %v2496_v3  ;;  %2648 = vmatmul.bf16.vlgmr.msrb.gmra.mxu3 %v2496_v3  ;;  %v6664_v3 = vld [vmem:[#allocation31_spill] sm:$0xff] }
 0x477   :  { %2772 = vmatpush.bf16.msrb.mxu1 %v6642_v22  ;;  %2798 = vmatpush.bf16.msra.mxu3 %v6643_v10 }
 0x479   :  { %2761 = vmatpush.bf16.msrb.mxu0 %v6644_v18  ;;  %2787 = vmatpush.bf16.msra.mxu2 %v6645_v35 }
 0x47b   :  { %2773 = vmatpush.bf16.msrb.mxu1 %v6646_v8  ;;  %2799 = vmatpush.bf16.msra.mxu3 %v6647_v61 }
 0x47d   :  { %2762 = vmatpush.bf16.msrb.mxu0 %v6648_v27  ;;  %2788 = vmatpush.bf16.msra.mxu2 %v6649_v36 }
 0x47f   :  { %2774 = vmatpush.bf16.msrb.mxu1 %v6650_v9  ;;  %2800 = vmatpush.bf16.msra.mxu3 %v6651_v34 }
 0x481   :  { %2763 = vmatpush.bf16.msrb.mxu0 %v6652_v48  ;;  %2789 = vmatpush.bf16.msra.mxu2 %v6653_v59  ;;  %v6703_v59 = vld [vmem:[#allocation125_spill] sm:$0xff] }
 0x483   :  { %2775 = vmatpush.bf16.msrb.mxu1 %v6654_v45  ;;  %2801 = vmatpush.bf16.msra.mxu3 %v6655_v2  ;;  %v6666_v2 = vld [vmem:[#allocation38_spill] sm:$0xff] }
 0x485   :  { %2764 = vmatpush.bf16.msrb.mxu0 %v6656_v52  ;;  %2790 = vmatpush.bf16.msra.mxu2 %v6657_v55  ;;  %v6667_v52 = vld [vmem:[#allocation58_spill] sm:$0xff] }
 0x486   :  { %v6668_v55 = vld [vmem:[#allocation30_spill] sm:$0xff] }
 0x487   :  { %2776 = vmatpush.bf16.msrb.mxu1 %v6658_v53  ;;  %2802 = vmatpush.bf16.msra.mxu3 %v6659_v0  ;;  %v6669_v53 = vld [vmem:[#allocation51_spill] sm:$0xff] }
 0x488   :  { %v6670_v0 = vld [vmem:[#allocation43_spill] sm:$0xff] }
 0x489   :  { %2765 = vmatpush.bf16.msrb.mxu0 %v6660_v62  ;;  %2791 = vmatpush.bf16.msra.mxu2 %v6661_v21  ;;  %v6671_v62 = vld [vmem:[#allocation60_spill] sm:$0xff] }
 0x48a   :  { %v6672_v21 = vld [vmem:[#allocation32_spill] sm:$0xff] }
 0x48b   :  { %2777 = vmatpush.bf16.msrb.mxu1 %v6662_v38  ;;  %2803 = vmatpush.bf16.msra.mxu3 %v6663_v60  ;;  %v6673_v38 = vld [vmem:[#allocation54_spill] sm:$0xff]  ;;  %v6674_v60 = vld [vmem:[#allocation40_spill] sm:$0xff] }
 0x48d   :  { %2766 = vmatpush.bf16.msrb.mxu0 %v6664_v3  ;;  %2792 = vmatpush.bf16.msra.mxu2 %v6665_v43  ;;  %v6675_v3 = vld [vmem:[#allocation59_spill] sm:$0xff]  ;;  %v6676_v43 = vld [vmem:[#allocation50_spill] sm:$0xff] }
 0x48f   :  { %2778 = vmatpush.bf16.msrb.mxu1 %v6668_v55  ;;  %2804 = vmatpush.bf16.msra.mxu3 %v6669_v53  ;;  %v6679_v55 = vld [vmem:[#allocation62_spill] sm:$0xff]  ;;  %v6680_v53 = vld [vmem:[#allocation55_spill] sm:$0xff] }
 0x491   :  { %2811 = vmatpush.bf16.msra.mxu0 %v6666_v2  ;;  %2837 = vmatpush.bf16.msrb.mxu2 %v6667_v52  ;;  %v6677_v2 = vld [vmem:[#allocation64_spill] sm:$0xff] }
 0x492   :  { %v6678_v52 = vld [vmem:[#allocation44_spill] sm:$0xff] }
 0x493   :  { %2779 = vmatpush.bf16.msrb.mxu1 %v6672_v21  ;;  %2805 = vmatpush.bf16.msra.mxu3 %v6673_v38  ;;  %v6683_v21 = vld [vmem:[#allocation65_spill] sm:$0xff] }
 0x494   :  { %v6684_v38 = vld [vmem:[#allocation61_spill] sm:$0xff] }
 0x495   :  { %2812 = vmatpush.bf16.msra.mxu0 %v6670_v0  ;;  %2838 = vmatpush.bf16.msrb.mxu2 %v6671_v62  ;;  %v6681_v0 = vld [vmem:[#allocation67_spill] sm:$0xff]  ;;  %v6682_v62 = vld [vmem:[#allocation52_spill] sm:$0xff] }
 0x497   :  { %2824 = vmatpush.bf16.msra.mxu1 %v6674_v60  ;;  %2850 = vmatpush.bf16.msrb.mxu3 %v6675_v3  ;;  %v6685_v60 = vld [vmem:[#allocation71_spill] sm:$0xff]  ;;  %v6686_v3 = vld [vmem:[#allocation56_spill] sm:$0xff] }
 0x499   :  { %2813 = vmatpush.bf16.msra.mxu0 %v6676_v43  ;;  %2839 = vmatpush.bf16.msrb.mxu2 %v6677_v2  ;;  %v6687_v43 = vld [vmem:[#allocation69_spill] sm:$0xff]  ;;  %v6688_v2 = vld [vmem:[#allocation66_spill] sm:$0xff] }
 0x49b   :  { %2825 = vmatpush.bf16.msra.mxu1 %v6678_v52  ;;  %2851 = vmatpush.bf16.msrb.mxu3 %v6679_v55  ;;  %v6689_v52 = vld [vmem:[#allocation75_spill] sm:$0xff] }
 0x49c   :  { %v6690_v55 = vld [vmem:[#allocation63_spill] sm:$0xff] }
 0x49d   :  { %2814 = vmatpush.bf16.msra.mxu0 %v6680_v53  ;;  %2840 = vmatpush.bf16.msrb.mxu2 %v6681_v0  ;;  %v6691_v53 = vld [vmem:[#allocation73_spill] sm:$0xff]  ;;  %v6692_v0 = vld [vmem:[#allocation70_spill] sm:$0xff] }
 0x49f   :  { %2826 = vmatpush.bf16.msra.mxu1 %v6682_v62  ;;  %2852 = vmatpush.bf16.msrb.mxu3 %v6683_v21  ;;  %v6693_v62 = vld [vmem:[#allocation81_spill] sm:$0xff]  ;;  %v6694_v21 = vld [vmem:[#allocation68_spill] sm:$0xff] }
 0x4a1   :  { %2815 = vmatpush.bf16.msra.mxu0 %v6684_v38  ;;  %2841 = vmatpush.bf16.msrb.mxu2 %v6685_v60  ;;  %v6695_v38 = vld [vmem:[#allocation78_spill] sm:$0xff] }
 0x4a2   :  { %v6696_v60 = vld [vmem:[#allocation74_spill] sm:$0xff] }
 0x4a3   :  { %2827 = vmatpush.bf16.msra.mxu1 %v6686_v3  ;;  %2853 = vmatpush.bf16.msrb.mxu3 %v6687_v43  ;;  %v6697_v3 = vld [vmem:[#allocation85_spill] sm:$0xff]  ;;  %v6698_v43 = vld [vmem:[#allocation72_spill] sm:$0xff] }
 0x4a5   :  { %2816 = vmatpush.bf16.msra.mxu0 %v6688_v2  ;;  %2842 = vmatpush.bf16.msrb.mxu2 %v6689_v52  ;;  %v6699_v2 = vld [vmem:[#allocation83_spill] sm:$0xff]  ;;  %v6700_v52 = vld [vmem:[#allocation76_spill] sm:$0xff] }
 0x4a7   :  { %2828 = vmatpush.bf16.msra.mxu1 %v6690_v55  ;;  %2854 = vmatpush.bf16.msrb.mxu3 %v6691_v53  ;;  %v6701_v55 = vld [vmem:[#allocation87_spill] sm:$0xff] }
 0x4a9   :  { %2817 = vmatpush.bf16.msra.mxu0 %v6692_v0  ;;  %2843 = vmatpush.bf16.msrb.mxu2 %v6693_v62  ;;  %v6702_v62 = vld [vmem:[#allocation110_spill] sm:$0xff] }
 0x4ab   :  { %2829 = vmatpush.bf16.msra.mxu1 %v6694_v21  ;;  %2855 = vmatpush.bf16.msrb.mxu3 %v6695_v38  ;;  %v440_v21 = vadd.f32 %v6703_v59, %v6702_v62 }
 0x4ad   :  { %2818 = vmatpush.bf16.msra.mxu0 %v6696_v60  ;;  %2844 = vmatpush.bf16.msrb.mxu2 %v6697_v3 }
 0x4af   :  { %2830 = vmatpush.bf16.msra.mxu1 %v6698_v43  ;;  %2856 = vmatpush.bf16.msrb.mxu3 %v6699_v2  ;;  %v6704_v2 = vld [vmem:[#allocation114_spill] sm:$0xff] }
 0x4b3   :  { %2831 = vmatpush.bf16.msra.mxu1 %v6700_v52  ;;  %2857 = vmatpush.bf16.msrb.mxu3 %v6701_v55 }
 0x4cd   :  { %v2506_v53 = vpop.f32.mrf.mxu0 }
 0x4d3   :  { %v2519_v0 = vpop.f32.mrf.mxu1  ;;  %v2532_v45 = vpop.f32.mrf.mxu2 }
 0x4d4   :  { %v2520_v48 = vadd.f32 %v2519_v0, %v2506_v53  ;;  %v6705_v53 = vld [vmem:[#allocation115_spill] sm:$0xff]  ;;  %v6706_v0 = vld [vmem:[#allocation128_spill] sm:$0xff] }
 0x4d5   :  { %v2508_v38 = vpop.f32.mrf.mxu0 }
 0x4d6   :  { %v2653_v34 = vadd.f32 %v2520_v48, %v440_v21  ;;  %v498_v48 = vadd.f32 %v6706_v0, %v6705_v53 }
 0x4d8   :  { %v3960_v60 = vmul.f32 -1.442695, %v2653_v34 }
 0x4d9   :  { %v2545_v9 = vpop.f32.mrf.mxu3 }
 0x4da   :  { %4240 = vpow2.f32 %v3960_v60  ;;  %v2546_v3 = vadd.f32 %v2545_v9, %v2532_v45  ;;  %v6707_v60 = vld [vmem:[#allocation118_spill] sm:$0xff] }
 0x4db   :  { %v2521_v43 = vpop.f32.mrf.mxu1  ;;  %v2534_v36 = vpop.f32.mrf.mxu2 }
 0x4dc   :  { %v2654_v27 = vadd.f32 %v2546_v3, %v6704_v2 }
 0x4dd   :  { %v2558_v52 = vpop.f32.mrf.mxu0 }
 0x4de   :  { %v3961_v61 = vmul.f32 -1.442695, %v2654_v27 }
 0x4e0   :  { %v4241_v55 = vpop.eup %4240  ;;  %4242 = vpow2.f32 %v3961_v61 }
 0x4e1   :  { %v2669_v8 = vadd.f32 1.0, %v4241_v55  ;;  %v2547_v35 = vpop.f32.mrf.mxu3 }
 0x4e3   :  { %4244 = vrcp.f32 %v2669_v8  ;;  %v2571_v18 = vpop.f32.mrf.mxu1  ;;  %v2584_v59 = vpop.f32.mrf.mxu2  ;;  %vm2678_vm7 = vweird.f32 %v2669_v8 }
 0x4e4   :  { %v2572_v34 = vadd.f32 %v2571_v18, %v2558_v52 }
 0x4e5   :  { %v2560_v21 = vpop.f32.mrf.mxu0 }
 0x4e6   :  { %v4243_v38 = vpop.eup %4242  ;;  %v2655_v9 = vadd.f32 %v2572_v34, %v498_v48 }
 0x4e7   :  { %v2670_v43 = vadd.f32 1.0, %v4243_v38 }
 0x4e8   :  { %v3962_v36 = vmul.f32 -1.442695, %v2655_v9  ;;  %v2684_v9 = vand.u32 2147483648, %v2669_v8 }
 0x4e9   :  { %v4245_v45 = vpop.eup %4244  ;;  %4246 = vrcp.f32 %v2670_v43  ;;  %v2597_v2 = vpop.f32.mrf.mxu3  ;;  %v2699_v15 = vand.u32 2147483648, %v2670_v43  ;;  %vm2693_vm14 = vweird.f32 %v2670_v43  ;;  %v2697_v44 = vand.u32 2147483647, %v2670_v43 }
 0x4ea   :  { %4248 = vpow2.f32 %v3962_v36  ;;  %v2598_v27 = vadd.f32 %v2597_v2, %v2584_v59  ;;  %v2674_v61 = vmul.f32 %v4245_v45, %v2669_v8  ;;  %vm2679_vm6 = vweird.f32 %v4245_v45 }
 0x4eb   :  { %v2573_v55 = vpop.f32.mrf.mxu1  ;;  %v2586_v35 = vpop.f32.mrf.mxu2  ;;  %v2682_v59 = vand.u32 2147483647, %v2669_v8  ;;  %vm2680_vm8 = vmor %vm2678_vm7, %vm2679_vm6  ;;  %v6709_v8 = vld [vmem:[#allocation140_spill] sm:$0xff]  ;;  %vm2698_vm0 = vcmp.eq.f32.partialorder %v2697_v44, 8.507059e+37 }
 0x4ec   :  { %v2656_v3 = vadd.f32 %v2598_v27, %v6707_v60  ;;  %v2675_v62 = vsub.f32 1.0, %v2674_v61 }
 0x4ed   :  { %v2610_v10 = vpop.f32.mrf.mxu0  ;;  %vm2683_vm9 = vcmp.eq.f32.partialorder %v2682_v59, 8.507059e+37 }
 0x4ee   :  { %v3963_v22 = vmul.f32 -1.442695, %v2656_v3  ;;  %v2676_v0 = vmul.f32 %v4245_v45, %v2675_v62  ;;  %v2685_v62 = vor.u32 1.1754944e-38, %v2684_v9 }
 0x4ef   :  { %v4247_v18 = vpop.eup %4246 }
 0x4f0   :  { %v4249_v52 = vpop.eup %4248  ;;  %4250 = vpow2.f32 %v3963_v22  ;;  %v2677_v48 = vadd.f32 %v4245_v45, %v2676_v0  ;;  %v2689_v34 = vmul.f32 %v4247_v18, %v2670_v43  ;;  %v6708_v22 = vld [vmem:[#allocation152_spill] sm:$0xff]  ;;  %vm2694_vm13 = vweird.f32 %v4247_v18 }
 0x4f1   :  { %v2671_v21 = vadd.f32 1.0, %v4249_v52  ;;  %v2599_v38 = vpop.f32.mrf.mxu3  ;;  %vm2695_vm15 = vmor %vm2693_vm14, %vm2694_vm13 }
 0x4f2   :  { %v2690_v36 = vsub.f32 1.0, %v2689_v34  ;;  %v2681_v55 = vsel %vm2680_vm8, %v4245_v45, %v2677_v48  ;;  %v6710_v34 = vld [vmem:[#allocation147_spill] sm:$0xff] }
 0x4f3   :  { %4252 = vrcp.f32 %v2671_v21  ;;  %v2623_v2 = vpop.f32.mrf.mxu1  ;;  %v2636_v27 = vpop.f32.mrf.mxu2  ;;  %v2686_v38 = vsel %vm2683_vm9, %v2685_v62, %v2681_v55  ;;  %v556_v24 = vadd.f32 %v6710_v34, %v6709_v8  ;;  %v2714_v62 = vand.u32 2147483648, %v2671_v21 }
 0x4f4   :  { %v2624_v61 = vadd.f32 %v2623_v2, %v2610_v10  ;;  %v2691_v35 = vmul.f32 %v4247_v18, %v2690_v36  ;;  %v2700_v2 = vor.u32 1.1754944e-38, %v2699_v15  ;;  %v2712_v43 = vand.u32 2147483647, %v2671_v21 }
 0x4f5   :  { %v2612_v60 = vpop.f32.mrf.mxu0  ;;  %vm2708_vm3 = vweird.f32 %v2671_v21  ;;  %v2715_v15 = vor.u32 1.1754944e-38, %v2714_v62 }
 0x4f6   :  { %v4251_v3 = vpop.eup %4250  ;;  %v2733_v0 = vadd.f32 %v2624_v61, %v6708_v22  ;;  %v2692_v53 = vadd.f32 %v4247_v18, %v2691_v35  ;;  %vm2713_vm7 = vcmp.eq.f32.partialorder %v2712_v43, 8.507059e+37 }
 0x4f7   :  { %v2672_v52 = vadd.f32 1.0, %v4251_v3 }
 0x4f8   :  { %v2735_v33 = vmul.f32 %v2733_v0, %v2686_v38  ;;  %v2696_v36 = vsel %vm2695_vm15, %v4247_v18, %v2692_v53 }
 0x4f9   :  { %v4253_v10 = vpop.eup %4252  ;;  %4254 = vrcp.f32 %v2672_v52  ;;  %v2649_v45 = vpop.f32.mrf.mxu3  ;;  %v2701_v3 = vsel %vm2698_vm0, %v2700_v2, %v2696_v36  ;;  %v2727_v36 = vand.u32 2147483647, %v2672_v52  ;;  %vm2723_vm9 = vweird.f32 %v2672_v52 }
 0x4fa   :  { %v2704_v48 = vmul.f32 %v4253_v10, %v2671_v21  ;;  %v2737_v9 = vadd.f32 %v2735_v33, %v556_v24  ;;  %v2650_v59 = vadd.f32 %v2649_v45, %v2636_v27  ;;  %vm2709_vm2 = vweird.f32 %v4253_v10  ;;  %v6711_v24 = vld [vmem:[#allocation142_spill] sm:$0xff] }
 0x4fb   :  { %v2625_v61 = vpop.f32.mrf.mxu1  ;;  %v2638_v35 = vpop.f32.mrf.mxu2  ;;  %vm2710_vm6 = vmor %vm2708_vm3, %vm2709_vm2  ;;  %v2729_v45 = vand.u32 2147483648, %v2672_v52  ;;  %vm2728_vm14 = vcmp.eq.f32.partialorder %v2727_v36, 8.507059e+37  ;;  %v6716_v36 = vld [vmem:[#allocation101_spill] sm:$0xff] }
 0x4fc   :  { %v2705_v60 = vsub.f32 1.0, %v2704_v48  ;;  %v2734_v55 = vadd.f32 %v2650_v59, %v5067_v23  ;;  %4256 = vtanh.f32 %v2737_v9 }
 0x4fe   :  { %v2706_v0 = vmul.f32 %v4253_v10, %v2705_v60  ;;  %v2736_v38 = vmul.f32 %v2734_v55, %v2701_v3  ;;  %v2730_v60 = vor.u32 1.1754944e-38, %v2729_v45 }
 0x4ff   :  { %v4255_v34 = vpop.eup %4254 }
 0x500   :  { %v2707_v8 = vadd.f32 %v4253_v10, %v2706_v0  ;;  %v2719_v33 = vmul.f32 %v4255_v34, %v2672_v52  ;;  %v2738_v53 = vadd.f32 %v2736_v38, %v6711_v24  ;;  %vm2724_vm8 = vweird.f32 %v4255_v34 }
 0x501   :  { %v2651_v18 = vpop.f32.mrf.mxu3  ;;  %vm2725_vm13 = vmor %vm2723_vm9, %vm2724_vm8 }
 0x502   :  { %v2720_v44 = vsub.f32 1.0, %v2719_v33  ;;  %v2711_v27 = vsel %vm2710_vm6, %v4253_v10, %v2707_v8  ;;  %v4257_v61 = vpop.eup %4256  ;;  %4258 = vtanh.f32 %v2738_v53  ;;  %v6712_v8 = vld [vmem:[#allocation86_spill] sm:$0xff]  ;;  %v6713_v18 = vld [vmem:[#allocation93_spill] sm:$0xff] }
 0x503   :  { %v2716_v48 = vsel %vm2713_vm7, %v2715_v15, %v2711_v27  ;;  %v1970_v10 = vsel %vm3947_vm11, %v6712_v8, 0.0  ;;  %v6728_v8 = vld [vmem:[#allocation25_spill] sm:$0xff] }
 0x504   :  { %v2721_v59 = vmul.f32 %v4255_v34, %v2720_v44  ;;  %v2741_v2 = vsub.f32 1.0, %v2716_v48  ;;  %v2745_v35 = vmul.f32 %v2716_v48, %v5621_v31 }
 0x506   :  { %v2722_v9 = vadd.f32 %v4255_v34, %v2721_v59  ;;  %v2743_v21 = vmul.f32 %v4257_v61, %v2741_v2  ;;  %v6715_v59 = vld [vmem:[#allocation35_spill] sm:$0xff]  ;;  %v6718_v61 = vld [vmem:[#allocation18_spill] sm:$0xff] }
 0x507   :  { %v6717_v2 = vld [vmem:[#allocation103_spill] sm:$0xff] }
 0x508   :  { %v2747_v55 = vadd.f32 %v2745_v35, %v2743_v21  ;;  %v2726_v62 = vsel %vm2725_vm13, %v4255_v34, %v2722_v9  ;;  %v4259_v38 = vpop.eup %4258  ;;  %v6719_v9 = vld [vmem:[#allocation34_spill] sm:$0xff]  ;;  %v6722_v21 = vld [vmem:[#allocation20_spill] sm:$0xff] }
 0x509   :  { %v2731_v3 = vsel %vm2728_vm14, %v2730_v60, %v2726_v62  ;;  %v6723_v35 = vld [vmem:[#allocation36_spill] sm:$0xff]  ;;  %v6724_v60 = vld [vmem:[#allocation23_spill] sm:$0xff]  ;;  %v6726_v62 = vld [vmem:[#allocation22_spill] sm:$0xff] }
 0x50a   :  { %v2755_v0 = vsel %vm3947_vm11, %v2747_v55, 0.0  ;;  %v2742_v43 = vsub.f32 1.0, %v2731_v3  ;;  %v5754_v52 = vsel %vm3947_vm11, %v2747_v55, %v5621_v31  ;;  %v2746_v53 = vmul.f32 %v2731_v3, %v5636_v7  ;;  %v6725_v55 = vld [vmem:[#allocation41_spill] sm:$0xff]  ;;  %v6727_v3 = vld [vmem:[#allocation39_spill] sm:$0xff] }
 0x50b   :  { %v3286_v33 = vadd.f32 %v2755_v0, %v1970_v10  ;;  %v2757_v24 = vpack.c.bf16 %v5754_v52, %v5754_v52  ;;  %v1969_v31 = vsel %vm3946_vm10, %v6713_v18, 0.0  ;;  %v6729_v10 = vld [vmem:[#allocation45_spill] sm:$0xff]  ;;  %v6730_v0 = vld [vmem:[#allocation24_spill] sm:$0xff] }
 0x50c   :  { %v2744_v34 = vmul.f32 %v4259_v38, %v2742_v43  ;;  %v6731_v43 = vld [vmem:[#allocation42_spill] sm:$0xff]  ;;  %v6732_v38 = vld [vmem:[#allocation27_spill] sm:$0xff]  ;;  %v6738_v18 = vld [vmem:[#allocation28_spill] sm:$0xff] }
 0x50d   :  { %3294 = vst [vmem:[#allocation10 + $0x28] sm:$0xff] %v3286_v33  ;;  %2767 = vmatmul.bf16.vlgmr.msrb.gmra.mxu0 %v2757_v24  ;;  %2793 = vmatmul.bf16.vlgmr.msra.gmra.mxu2 %v2757_v24  ;;  %v6733_v33 = vld [vmem:[#allocation47_spill] sm:$0xff] }
 0x50e   :  { %v2748_v15 = vadd.f32 %v2746_v53, %v2744_v34  ;;  %2863 = vmatpush.bf16.msrb.mxu0 %v6343_v6  ;;  %2889 = vmatpush.bf16.msra.mxu2 %v6344_v19  ;;  %v6735_v34 = vld [vmem:[#allocation46_spill] sm:$0xff]  ;;  %v6736_v53 = vld [vmem:[#allocation29_spill] sm:$0xff] }
 0x510   :  { %v2756_v44 = vsel %vm3946_vm10, %v2748_v15, 0.0  ;;  %v5769_v27 = vsel %vm3946_vm10, %v2748_v15, %v5636_v7  ;;  %v6714_v7 = vld [vmem:[#allocation19_spill] sm:$0xff]  ;;  %v6737_v15 = vld [vmem:[#allocation49_spill] sm:$0xff] }
 0x511   :  { %v3283_v45 = vadd.f32 %v2756_v44, %v1969_v31  ;;  %v2758_v48 = vpack.c.bf16 %v5769_v27, %v5769_v27  ;;  %v6739_v31 = vld [vmem:[#allocation48_spill] sm:$0xff]  ;;  %v6740_v44 = vld [vmem:[#allocation31_spill] sm:$0xff] }
 0x512   :  { %2864 = vmatpush.bf16.msrb.mxu0 %v6345_v11  ;;  %2890 = vmatpush.bf16.msra.mxu2 %v6346_v49 }
 0x513   :  { %3291 = vst [vmem:[#allocation10 + $0x10] sm:$0xff] %v3283_v45  ;;  %2780 = vmatmul.bf16.vlgmr.msrb.gmra.mxu1 %v2758_v48  ;;  %2806 = vmatmul.bf16.vlgmr.msra.gmra.mxu3 %v2758_v48  ;;  %v6741_v45 = vld [vmem:[#allocation53_spill] sm:$0xff] }
 0x514   :  { %2876 = vmatpush.bf16.msrb.mxu1 %v6334_v54  ;;  %2902 = vmatpush.bf16.msra.mxu3 %v6335_v4 }
 0x516   :  { %2865 = vmatpush.bf16.msrb.mxu0 %v6347_v32  ;;  %2891 = vmatpush.bf16.msra.mxu2 %v6348_v12 }
 0x518   :  { %2877 = vmatpush.bf16.msrb.mxu1 %v6336_v56  ;;  %2903 = vmatpush.bf16.msra.mxu3 %v6337_v25 }
 0x51a   :  { %2866 = vmatpush.bf16.msrb.mxu0 %v6349_v46  ;;  %2892 = vmatpush.bf16.msra.mxu2 %v4800_v51 }
 0x51c   :  { %2878 = vmatpush.bf16.msrb.mxu1 %v6338_v41  ;;  %2904 = vmatpush.bf16.msra.mxu3 %v6339_v58 }
 0x51d   :  { %2819 = vmatmul.bf16.vlgmr.msra.gmra.mxu0 %v2757_v24  ;;  %2845 = vmatmul.bf16.vlgmr.msrb.gmra.mxu2 %v2757_v24 }
 0x51e   :  { %2867 = vmatpush.bf16.msrb.mxu0 %v6350_v14  ;;  %2893 = vmatpush.bf16.msra.mxu2 %v4812_v40 }
 0x520   :  { %2879 = vmatpush.bf16.msrb.mxu1 %v6341_v50  ;;  %2905 = vmatpush.bf16.msra.mxu3 %v4806_v30 }
 0x522   :  { %2868 = vmatpush.bf16.msrb.mxu0 %v6351_v26  ;;  %2894 = vmatpush.bf16.msra.mxu2 %v4824_v63 }
 0x523   :  { %2832 = vmatmul.bf16.vlgmr.msra.gmra.mxu1 %v2758_v48  ;;  %2858 = vmatmul.bf16.vlgmr.msrb.gmra.mxu3 %v2758_v48 }
 0x524   :  { %2880 = vmatpush.bf16.msrb.mxu1 %v6342_v16  ;;  %2906 = vmatpush.bf16.msra.mxu3 %v4818_v39 }
 0x526   :  { %2869 = vmatpush.bf16.msrb.mxu0 %v4809_v29  ;;  %2895 = vmatpush.bf16.msra.mxu2 %v4836_v37 }
 0x528   :  { %2881 = vmatpush.bf16.msrb.mxu1 %v4803_v5  ;;  %2907 = vmatpush.bf16.msra.mxu3 %v4831_v57 }
 0x52a   :  { %2870 = vmatpush.bf16.msrb.mxu0 %v6352_v28  ;;  %2896 = vmatpush.bf16.msra.mxu2 %v4843_v1 }
 0x52c   :  { %2882 = vmatpush.bf16.msrb.mxu1 %v6636_v20  ;;  %2908 = vmatpush.bf16.msra.mxu3 %v6637_v13 }
 0x52d   :  { %2871 = vmatmul.bf16.vlgmr.msrb.gmra.mxu0 %v2757_v24  ;;  %2897 = vmatmul.bf16.vlgmr.msra.gmra.mxu2 %v2757_v24  ;;  %v6734_v24 = vld [vmem:[#allocation26_spill] sm:$0xff] }
 0x52e   :  { %3021 = vmatpush.bf16.msra.mxu0 %v4518_v47  ;;  %3047 = vmatpush.bf16.msrb.mxu2 %v6635_v17  ;;  %v6720_v47 = vld [vmem:[#allocation21_spill] sm:$0xff] }
 0x52f   :  { %v6721_v17 = vld [vmem:[#allocation37_spill] sm:$0xff] }
 0x530   :  { %2883 = vmatpush.bf16.msrb.mxu1 %v6716_v36  ;;  %2909 = vmatpush.bf16.msra.mxu3 %v6717_v2 }
 0x532   :  { %3022 = vmatpush.bf16.msra.mxu0 %v6714_v7  ;;  %3048 = vmatpush.bf16.msrb.mxu2 %v6715_v59  ;;  %v6743_v7 = vld [vmem:[#allocation58_spill] sm:$0xff] }
 0x533   :  { %2884 = vmatmul.bf16.vlgmr.msrb.gmra.mxu1 %v2758_v48  ;;  %2910 = vmatmul.bf16.vlgmr.msra.gmra.mxu3 %v2758_v48  ;;  %v6742_v48 = vld [vmem:[#allocation38_spill] sm:$0xff] }
 0x534   :  { %3034 = vmatpush.bf16.msra.mxu1 %v6718_v61  ;;  %3060 = vmatpush.bf16.msrb.mxu3 %v6719_v9  ;;  %v6744_v59 = vld [vmem:[#allocation30_spill] sm:$0xff]  ;;  %v6745_v61 = vld [vmem:[#allocation51_spill] sm:$0xff] }
 0x535   :  { %v6746_v9 = vld [vmem:[#allocation43_spill] sm:$0xff] }
 0x536   :  { %3023 = vmatpush.bf16.msra.mxu0 %v6720_v47  ;;  %3049 = vmatpush.bf16.msrb.mxu2 %v6721_v17  ;;  %v6747_v47 = vld [vmem:[#allocation60_spill] sm:$0xff] }
 0x537   :  { %v6748_v17 = vld [vmem:[#allocation32_spill] sm:$0xff] }
 0x538   :  { %3035 = vmatpush.bf16.msra.mxu1 %v6722_v21  ;;  %3061 = vmatpush.bf16.msrb.mxu3 %v6723_v35  ;;  %v6749_v21 = vld [vmem:[#allocation54_spill] sm:$0xff]  ;;  %v6750_v35 = vld [vmem:[#allocation40_spill] sm:$0xff] }
 0x53a   :  { %3024 = vmatpush.bf16.msra.mxu0 %v6724_v60  ;;  %3050 = vmatpush.bf16.msrb.mxu2 %v6725_v55  ;;  %v6751_v60 = vld [vmem:[#allocation59_spill] sm:$0xff]  ;;  %v6752_v55 = vld [vmem:[#allocation50_spill] sm:$0xff] }
 0x53c   :  { %3036 = vmatpush.bf16.msra.mxu1 %v6726_v62  ;;  %3062 = vmatpush.bf16.msrb.mxu3 %v6727_v3  ;;  %v6753_v62 = vld [vmem:[#allocation64_spill] sm:$0xff] }
 0x53d   :  { %v6754_v3 = vld [vmem:[#allocation44_spill] sm:$0xff] }
 0x53e   :  { %3025 = vmatpush.bf16.msra.mxu0 %v6728_v8  ;;  %3051 = vmatpush.bf16.msrb.mxu2 %v6729_v10  ;;  %v6755_v8 = vld [vmem:[#allocation62_spill] sm:$0xff]  ;;  %v6756_v10 = vld [vmem:[#allocation55_spill] sm:$0xff] }
 0x540   :  { %3037 = vmatpush.bf16.msra.mxu1 %v6730_v0  ;;  %3063 = vmatpush.bf16.msrb.mxu3 %v6731_v43  ;;  %v6757_v0 = vld [vmem:[#allocation67_spill] sm:$0xff]  ;;  %v6758_v43 = vld [vmem:[#allocation52_spill] sm:$0xff] }
 0x542   :  { %3026 = vmatpush.bf16.msra.mxu0 %v6732_v38  ;;  %3052 = vmatpush.bf16.msrb.mxu2 %v6733_v33  ;;  %v6759_v38 = vld [vmem:[#allocation65_spill] sm:$0xff] }
 0x543   :  { %v6760_v33 = vld [vmem:[#allocation61_spill] sm:$0xff] }
 0x544   :  { %3038 = vmatpush.bf16.msra.mxu1 %v6734_v24  ;;  %3064 = vmatpush.bf16.msrb.mxu3 %v6735_v34  ;;  %v6761_v24 = vld [vmem:[#allocation71_spill] sm:$0xff]  ;;  %v6762_v34 = vld [vmem:[#allocation56_spill] sm:$0xff] }
 0x546   :  { %3027 = vmatpush.bf16.msra.mxu0 %v6736_v53  ;;  %3053 = vmatpush.bf16.msrb.mxu2 %v6737_v15  ;;  %v6763_v53 = vld [vmem:[#allocation69_spill] sm:$0xff]  ;;  %v6764_v15 = vld [vmem:[#allocation66_spill] sm:$0xff] }
 0x548   :  { %3039 = vmatpush.bf16.msra.mxu1 %v6738_v18  ;;  %3065 = vmatpush.bf16.msrb.mxu3 %v6739_v31  ;;  %v6765_v18 = vld [vmem:[#allocation75_spill] sm:$0xff] }
 0x549   :  { %v6766_v31 = vld [vmem:[#allocation63_spill] sm:$0xff] }
 0x54a   :  { %3028 = vmatpush.bf16.msra.mxu0 %v6740_v44  ;;  %3054 = vmatpush.bf16.msrb.mxu2 %v6741_v45  ;;  %v6767_v44 = vld [vmem:[#allocation73_spill] sm:$0xff]  ;;  %v6768_v45 = vld [vmem:[#allocation70_spill] sm:$0xff] }
 0x54c   :  { %3040 = vmatpush.bf16.msra.mxu1 %v6744_v59  ;;  %3066 = vmatpush.bf16.msrb.mxu3 %v6745_v61  ;;  %v6771_v59 = vld [vmem:[#allocation78_spill] sm:$0xff] }
 0x54d   :  { %v6772_v61 = vld [vmem:[#allocation74_spill] sm:$0xff] }
 0x54e   :  { %3073 = vmatpush.bf16.msrb.mxu0 %v6742_v48  ;;  %3099 = vmatpush.bf16.msra.mxu2 %v6743_v7  ;;  %v6769_v48 = vld [vmem:[#allocation81_spill] sm:$0xff]  ;;  %v6770_v7 = vld [vmem:[#allocation68_spill] sm:$0xff] }
 0x550   :  { %3041 = vmatpush.bf16.msra.mxu1 %v6748_v17  ;;  %3067 = vmatpush.bf16.msrb.mxu3 %v6749_v21  ;;  %v6775_v17 = vld [vmem:[#allocation83_spill] sm:$0xff]  ;;  %v6776_v21 = vld [vmem:[#allocation76_spill] sm:$0xff] }
 0x552   :  { %3074 = vmatpush.bf16.msrb.mxu0 %v6746_v9  ;;  %3100 = vmatpush.bf16.msra.mxu2 %v6747_v47  ;;  %v6773_v9 = vld [vmem:[#allocation85_spill] sm:$0xff]  ;;  %v6774_v47 = vld [vmem:[#allocation72_spill] sm:$0xff] }
 0x554   :  { %3086 = vmatpush.bf16.msrb.mxu1 %v6750_v35  ;;  %3112 = vmatpush.bf16.msra.mxu3 %v6751_v60  ;;  %v6777_v35 = vld [vmem:[#allocation87_spill] sm:$0xff] }
 0x556   :  { %3075 = vmatpush.bf16.msrb.mxu0 %v6752_v55  ;;  %3101 = vmatpush.bf16.msra.mxu2 %v6753_v62 }
 0x558   :  { %3087 = vmatpush.bf16.msrb.mxu1 %v6754_v3  ;;  %3113 = vmatpush.bf16.msra.mxu3 %v6755_v8 }
 0x55a   :  { %3076 = vmatpush.bf16.msrb.mxu0 %v6756_v10  ;;  %3102 = vmatpush.bf16.msra.mxu2 %v6757_v0  ;;  %v6778_v10 = vld [vmem:[#allocation130_spill] sm:$0xff] }
 0x55c   :  { %3088 = vmatpush.bf16.msrb.mxu1 %v6758_v43  ;;  %3114 = vmatpush.bf16.msra.mxu3 %v6759_v38 }
 0x55e   :  { %3077 = vmatpush.bf16.msrb.mxu0 %v6760_v33  ;;  %3103 = vmatpush.bf16.msra.mxu2 %v6761_v24  ;;  %v6779_v33 = vld [vmem:[#allocation104_spill] sm:$0xff]  ;;  %v6780_v24 = vld [vmem:[#allocation109_spill] sm:$0xff] }
 0x560   :  { %3089 = vmatpush.bf16.msrb.mxu1 %v6762_v34  ;;  %3115 = vmatpush.bf16.msra.mxu3 %v6763_v53  ;;  %v459_v34 = vadd.f32 %v6780_v24, %v6779_v33 }
 0x562   :  { %3078 = vmatpush.bf16.msrb.mxu0 %v6764_v15  ;;  %3104 = vmatpush.bf16.msra.mxu2 %v6765_v18 }
 0x564   :  { %3090 = vmatpush.bf16.msrb.mxu1 %v6766_v31  ;;  %3116 = vmatpush.bf16.msra.mxu3 %v6767_v44 }
 0x566   :  { %3079 = vmatpush.bf16.msrb.mxu0 %v6768_v45  ;;  %3105 = vmatpush.bf16.msra.mxu2 %v6769_v48 }
 0x568   :  { %3091 = vmatpush.bf16.msrb.mxu1 %v6770_v7  ;;  %3117 = vmatpush.bf16.msra.mxu3 %v6771_v59 }
 0x56a   :  { %3080 = vmatpush.bf16.msrb.mxu0 %v6772_v61  ;;  %3106 = vmatpush.bf16.msra.mxu2 %v6773_v9 }
 0x56c   :  { %3092 = vmatpush.bf16.msrb.mxu1 %v6774_v47  ;;  %3118 = vmatpush.bf16.msra.mxu3 %v6775_v17 }
 0x570   :  { %3093 = vmatpush.bf16.msrb.mxu1 %v6776_v21  ;;  %3119 = vmatpush.bf16.msra.mxu3 %v6777_v35  ;;  %v6781_v35 = vld [vmem:[#allocation132_spill] sm:$0xff] }
 0x58a   :  { %v2768_v60 = vpop.f32.mrf.mxu0 }
 0x590   :  { %v2781_v55 = vpop.f32.mrf.mxu1  ;;  %v2794_v62 = vpop.f32.mrf.mxu2 }
 0x591   :  { %v2782_v3 = vadd.f32 %v2781_v55, %v2768_v60 }
 0x592   :  { %v2770_v8 = vpop.f32.mrf.mxu0 }
 0x593   :  { %v2915_v0 = vadd.f32 %v2782_v3, %v6778_v10  ;;  %v6782_v10 = vld [vmem:[#allocation106_spill] sm:$0xff] }
 0x595   :  { %v3966_v43 = vmul.f32 -1.442695, %v2915_v0  ;;  %v6783_v0 = vld [vmem:[#allocation112_spill] sm:$0xff] }
 0x596   :  { %v2807_v38 = vpop.f32.mrf.mxu3 }
 0x597   :  { %4260 = vpow2.f32 %v3966_v43  ;;  %v2808_v53 = vadd.f32 %v2807_v38, %v2794_v62  ;;  %v517_v43 = vadd.f32 %v6783_v0, %v6782_v10 }
 0x598   :  { %v2783_v15 = vpop.f32.mrf.mxu1  ;;  %v2796_v18 = vpop.f32.mrf.mxu2 }
 0x599   :  { %v2916_v31 = vadd.f32 %v2808_v53, %v459_v34 }
 0x59a   :  { %v2820_v44 = vpop.f32.mrf.mxu0 }
 0x59b   :  { %v3967_v45 = vmul.f32 -1.442695, %v2916_v31 }
 0x59d   :  { %v4261_v48 = vpop.eup %4260  ;;  %4262 = vpow2.f32 %v3967_v45 }
 0x59e   :  { %v2931_v7 = vadd.f32 1.0, %v4261_v48  ;;  %v2809_v59 = vpop.f32.mrf.mxu3 }
 0x5a0   :  { %4264 = vrcp.f32 %v2931_v7  ;;  %v2833_v61 = vpop.f32.mrf.mxu1  ;;  %v2846_v9 = vpop.f32.mrf.mxu2  ;;  %vm2940_vm11 = vweird.f32 %v2931_v7 }
 0x5a1   :  { %v2834_v47 = vadd.f32 %v2833_v61, %v2820_v44 }
 0x5a2   :  { %v2822_v17 = vpop.f32.mrf.mxu0 }
 0x5a3   :  { %v4263_v21 = vpop.eup %4262  ;;  %v2917_v60 = vadd.f32 %v2834_v47, %v6781_v35  ;;  %v2944_v35 = vand.u32 2147483647, %v2931_v7 }
 0x5a4   :  { %v2932_v55 = vadd.f32 1.0, %v4263_v21  ;;  %v2946_v21 = vand.u32 2147483648, %v2931_v7 }
 0x5a5   :  { %v3968_v3 = vmul.f32 -1.442695, %v2917_v60  ;;  %vm2945_vm0 = vcmp.eq.f32.partialorder %v2944_v35, 8.507059e+37 }
 0x5a6   :  { %v4265_v62 = vpop.eup %4264  ;;  %4266 = vrcp.f32 %v2932_v55  ;;  %v2859_v8 = vpop.f32.mrf.mxu3  ;;  %vm2955_vm3 = vweird.f32 %v2932_v55 }
 0x5a7   :  { %4268 = vpow2.f32 %v3968_v3  ;;  %v2860_v38 = vadd.f32 %v2859_v8, %v2846_v9  ;;  %v2936_v33 = vmul.f32 %v4265_v62, %v2931_v7  ;;  %vm2941_vm10 = vweird.f32 %v4265_v62 }
 0x5a8   :  { %v2835_v24 = vpop.f32.mrf.mxu1  ;;  %v2848_v34 = vpop.f32.mrf.mxu2  ;;  %vm2942_vm15 = vmor %vm2940_vm11, %vm2941_vm10 }
 0x5a9   :  { %v2918_v53 = vadd.f32 %v2860_v38, %v517_v43  ;;  %v2937_v15 = vsub.f32 1.0, %v2936_v33  ;;  %v2947_v43 = vor.u32 1.1754944e-38, %v2946_v21 }
 0x5aa   :  { %v2872_v18 = vpop.f32.mrf.mxu0 }
 0x5ab   :  { %v3969_v31 = vmul.f32 -1.442695, %v2918_v53  ;;  %v2938_v44 = vmul.f32 %v4265_v62, %v2937_v15 }
 0x5ac   :  { %v4267_v45 = vpop.eup %4266 }
 0x5ad   :  { %v4269_v48 = vpop.eup %4268  ;;  %4270 = vpow2.f32 %v3969_v31  ;;  %v2939_v59 = vadd.f32 %v4265_v62, %v2938_v44  ;;  %v2951_v61 = vmul.f32 %v4267_v45, %v2932_v55  ;;  %vm2956_vm2 = vweird.f32 %v4267_v45 }
 0x5ae   :  { %v2933_v47 = vadd.f32 1.0, %v4269_v48  ;;  %v2861_v17 = vpop.f32.mrf.mxu3  ;;  %v2961_v31 = vand.u32 2147483648, %v2932_v55  ;;  %v2959_v44 = vand.u32 2147483647, %v2932_v55  ;;  %vm2957_vm6 = vmor %vm2955_vm3, %vm2956_vm2 }
 0x5af   :  { %v2952_v9 = vsub.f32 1.0, %v2951_v61  ;;  %v2943_v10 = vsel %vm2942_vm15, %v4265_v62, %v2939_v59 }
 0x5b0   :  { %4272 = vrcp.f32 %v2933_v47  ;;  %v2885_v60 = vpop.f32.mrf.mxu1  ;;  %v2898_v3 = vpop.f32.mrf.mxu2  ;;  %v2948_v15 = vsel %vm2945_vm0, %v2947_v43, %v2943_v10  ;;  %v2962_v35 = vor.u32 1.1754944e-38, %v2961_v31  ;;  %vm2960_vm7 = vcmp.eq.f32.partialorder %v2959_v44, 8.507059e+37  ;;  %v6786_v43 = vld [vmem:[#allocation139_spill] sm:$0xff] }
 0x5b1   :  { %v2886_v8 = vadd.f32 %v2885_v60, %v2872_v18  ;;  %v2953_v0 = vmul.f32 %v4267_v45, %v2952_v9  ;;  %v6784_v18 = vld [vmem:[#allocation149_spill] sm:$0xff]  ;;  %v2976_v55 = vand.u32 2147483648, %v2933_v47  ;;  %vm2970_vm9 = vweird.f32 %v2933_v47 }
 0x5b2   :  { %v2874_v38 = vpop.f32.mrf.mxu0 }
 0x5b3   :  { %v4271_v33 = vpop.eup %4270  ;;  %v2995_v24 = vadd.f32 %v2886_v8, %v6708_v22  ;;  %v2954_v34 = vadd.f32 %v4267_v45, %v2953_v0  ;;  %v6785_v0 = vld [vmem:[#allocation135_spill] sm:$0xff]  ;;  %v2977_v31 = vor.u32 1.1754944e-38, %v2976_v55 }
 0x5b4   :  { %v2934_v53 = vadd.f32 1.0, %v4271_v33  ;;  %v575_v38 = vadd.f32 %v6786_v43, %v6785_v0 }
 0x5b5   :  { %v2997_v7 = vmul.f32 %v2995_v24, %v2948_v15  ;;  %v2958_v21 = vsel %vm2957_vm6, %v4267_v45, %v2954_v34  ;;  %v2974_v15 = vand.u32 2147483647, %v2933_v47 }
 0x5b6   :  { %v4273_v48 = vpop.eup %4272  ;;  %4274 = vrcp.f32 %v2934_v53  ;;  %v2911_v61 = vpop.f32.mrf.mxu3  ;;  %v2963_v33 = vsel %vm2960_vm7, %v2962_v35, %v2958_v21  ;;  %v2989_v21 = vand.u32 2147483647, %v2934_v53  ;;  %vm2985_vm11 = vweird.f32 %v2934_v53 }
 0x5b7   :  { %v2966_v62 = vmul.f32 %v4273_v48, %v2933_v47  ;;  %v2999_v59 = vadd.f32 %v2997_v7, %v6784_v18  ;;  %v2912_v17 = vadd.f32 %v2911_v61, %v2898_v3  ;;  %vm2971_vm8 = vweird.f32 %v4273_v48 }
 0x5b8   :  { %v2887_v9 = vpop.f32.mrf.mxu1  ;;  %v2900_v60 = vpop.f32.mrf.mxu2  ;;  %vm2972_vm13 = vmor %vm2970_vm9, %vm2971_vm8  ;;  %vm2975_vm14 = vcmp.eq.f32.partialorder %v2974_v15, 8.507059e+37  ;;  %vm2990_vm0 = vcmp.eq.f32.partialorder %v2989_v21, 8.507059e+37 }
 0x5b9   :  { %v2967_v8 = vsub.f32 1.0, %v2966_v62  ;;  %v2996_v10 = vadd.f32 %v2912_v17, %v5067_v23  ;;  %4276 = vtanh.f32 %v2999_v59  ;;  %v2991_v62 = vand.u32 2147483648, %v2934_v53 }
 0x5bb   :  { %v2968_v24 = vmul.f32 %v4273_v48, %v2967_v8  ;;  %v2998_v22 = vmul.f32 %v2996_v10, %v2963_v33 }
 0x5bc   :  { %v4275_v2 = vpop.eup %4274 }
 0x5bd   :  { %v2969_v3 = vadd.f32 %v4273_v48, %v2968_v24  ;;  %v2981_v45 = vmul.f32 %v4275_v2, %v2934_v53  ;;  %v3000_v34 = vadd.f32 %v2998_v22, %v575_v38  ;;  %vm2986_vm10 = vweird.f32 %v4275_v2 }
 0x5be   :  { %v2913_v7 = vpop.f32.mrf.mxu3  ;;  %vm2987_vm15 = vmor %vm2985_vm11, %vm2986_vm10  ;;  %v2992_v22 = vor.u32 1.1754944e-38, %v2991_v62 }
 0x5bf   :  { %v2982_v44 = vsub.f32 1.0, %v2981_v45  ;;  %v2973_v61 = vsel %vm2972_vm13, %v4273_v48, %v2969_v3  ;;  %v4277_v9 = vpop.eup %4276  ;;  %4278 = vtanh.f32 %v3000_v34  ;;  %v6787_v48 = vld [vmem:[#allocation82_spill] sm:$0xff]  ;;  %v6788_v34 = vld [vmem:[#allocation89_spill] sm:$0xff] }
 0x5c0   :  { %v2978_v18 = vsel %vm2975_vm14, %v2977_v31, %v2973_v61  ;;  %v1708_v43 = vsel %vm3941_vm5, %v6787_v48, 0.0 }
 0x5c1   :  { %v2983_v17 = vmul.f32 %v4275_v2, %v2982_v44  ;;  %v3003_v35 = vsub.f32 1.0, %v2978_v18  ;;  %v3007_v47 = vmul.f32 %v2978_v18, %v5754_v52 }
 0x5c3   :  { %v2984_v60 = vadd.f32 %v4275_v2, %v2983_v17  ;;  %v3005_v59 = vmul.f32 %v4277_v9, %v3003_v35 }
 0x5c5   :  { %v3009_v8 = vadd.f32 %v3007_v47, %v3005_v59  ;;  %v2988_v10 = vsel %vm2987_vm15, %v4275_v2, %v2984_v60  ;;  %v4279_v33 = vpop.eup %4278  ;;  %v6795_v59 = vld [vmem:[#allocation108_spill] sm:$0xff] }
 0x5c6   :  { %v2993_v0 = vsel %vm2990_vm0, %v2992_v22, %v2988_v10 }
 0x5c7   :  { %v3017_v38 = vsel %vm3941_vm5, %v3009_v8, 0.0  ;;  %v3004_v55 = vsub.f32 1.0, %v2993_v0  ;;  %v5887_v53 = vsel %vm3941_vm5, %v3009_v8, %v5754_v52  ;;  %v3008_v3 = vmul.f32 %v2993_v0, %v5769_v27 }
 0x5c8   :  { %v3287_v24 = vadd.f32 %v3017_v38, %v1708_v43  ;;  %v3019_v15 = vpack.c.bf16 %v5887_v53, %v5887_v53  ;;  %v1707_v52 = vsel %vm3940_vm4, %v6788_v34, 0.0 }
 0x5c9   :  { %v3006_v2 = vmul.f32 %v4279_v33, %v3004_v55 }
 0x5ca   :  { %3295 = vst [vmem:[#allocation10 + $0x30] sm:$0xff] %v3287_v24  ;;  %3029 = vmatmul.bf16.vlgmr.msra.gmra.mxu0 %v3019_v15  ;;  %3055 = vmatmul.bf16.vlgmr.msrb.gmra.mxu2 %v3019_v15 }
 0x5cb   :  { %v3010_v45 = vadd.f32 %v3008_v3, %v3006_v2  ;;  %3125 = vmatpush.bf16.msra.mxu0 %v6343_v6  ;;  %3151 = vmatpush.bf16.msrb.mxu2 %v6344_v19 }
 0x5cd   :  { %v3018_v31 = vsel %vm3940_vm4, %v3010_v45, 0.0  ;;  %v5902_v7 = vsel %vm3940_vm4, %v3010_v45, %v5769_v27 }
 0x5ce   :  { %v3282_v44 = vadd.f32 %v3018_v31, %v1707_v52  ;;  %v3020_v61 = vpack.c.bf16 %v5902_v7, %v5902_v7 }
 0x5cf   :  { %3126 = vmatpush.bf16.msra.mxu0 %v6345_v11  ;;  %3152 = vmatpush.bf16.msrb.mxu2 %v6346_v49 }
 0x5d0   :  { %3290 = vst [vmem:[#allocation10 + $0x8] sm:$0xff] %v3282_v44  ;;  %3042 = vmatmul.bf16.vlgmr.msra.gmra.mxu1 %v3020_v61  ;;  %3068 = vmatmul.bf16.vlgmr.msrb.gmra.mxu3 %v3020_v61 }
 0x5d1   :  { %3138 = vmatpush.bf16.msra.mxu1 %v6334_v54  ;;  %3164 = vmatpush.bf16.msrb.mxu3 %v6335_v4 }
 0x5d3   :  { %3127 = vmatpush.bf16.msra.mxu0 %v6347_v32  ;;  %3153 = vmatpush.bf16.msrb.mxu2 %v6348_v12 }
 0x5d5   :  { %3139 = vmatpush.bf16.msra.mxu1 %v6336_v56  ;;  %3165 = vmatpush.bf16.msrb.mxu3 %v6337_v25 }
 0x5d7   :  { %3128 = vmatpush.bf16.msra.mxu0 %v6349_v46  ;;  %3154 = vmatpush.bf16.msrb.mxu2 %v4800_v51  ;;  %v6793_v46 = vld [vmem:[#allocation115_spill] sm:$0xff] }
 0x5d9   :  { %3140 = vmatpush.bf16.msra.mxu1 %v6338_v41  ;;  %3166 = vmatpush.bf16.msrb.mxu3 %v6339_v58  ;;  %v6792_v58 = vld [vmem:[#allocation105_spill] sm:$0xff] }
 0x5da   :  { %3081 = vmatmul.bf16.vlgmr.msrb.gmra.mxu0 %v3019_v15  ;;  %3107 = vmatmul.bf16.vlgmr.msra.gmra.mxu2 %v3019_v15 }
 0x5db   :  { %3129 = vmatpush.bf16.msra.mxu0 %v6350_v14  ;;  %3155 = vmatpush.bf16.msrb.mxu2 %v4812_v40  ;;  %v6790_v40 = vld [vmem:[#allocation110_spill] sm:$0xff]  ;;  %v6794_v14 = vld [vmem:[#allocation136_spill] sm:$0xff] }
 0x5dd   :  { %3141 = vmatpush.bf16.msra.mxu1 %v6341_v50  ;;  %3167 = vmatpush.bf16.msrb.mxu3 %v4806_v30  ;;  %v6789_v30 = vld [vmem:[#allocation103_spill] sm:$0xff] }
 0x5df   :  { %3130 = vmatpush.bf16.msra.mxu0 %v6351_v26  ;;  %3156 = vmatpush.bf16.msrb.mxu2 %v4824_v63  ;;  %v503_v26 = vadd.f32 %v6794_v14, %v6793_v46 }
 0x5e0   :  { %3094 = vmatmul.bf16.vlgmr.msrb.gmra.mxu1 %v3020_v61  ;;  %3120 = vmatmul.bf16.vlgmr.msra.gmra.mxu3 %v3020_v61 }
 0x5e1   :  { %3142 = vmatpush.bf16.msra.mxu1 %v6342_v16  ;;  %3168 = vmatpush.bf16.msrb.mxu3 %v4818_v39  ;;  %v6791_v39 = vld [vmem:[#allocation133_spill] sm:$0xff] }
 0x5e2   :  { %v445_v63 = vadd.f32 %v6791_v39, %v6790_v40 }
 0x5e3   :  { %3131 = vmatpush.bf16.msra.mxu0 %v4809_v29  ;;  %3157 = vmatpush.bf16.msrb.mxu2 %v4836_v37 }
 0x5e5   :  { %3143 = vmatpush.bf16.msra.mxu1 %v4803_v5  ;;  %3169 = vmatpush.bf16.msrb.mxu3 %v4831_v57 }
 0x5e7   :  { %3132 = vmatpush.bf16.msra.mxu0 %v6352_v28  ;;  %3158 = vmatpush.bf16.msrb.mxu2 %v4843_v1 }
 0x5e9   :  { %3144 = vmatpush.bf16.msra.mxu1 %v6636_v20  ;;  %3170 = vmatpush.bf16.msrb.mxu3 %v6637_v13 }
 0x5ea   :  { %3133 = vmatmul.bf16.vlgmr.msra.gmra.mxu0 %v3019_v15  ;;  %3159 = vmatmul.bf16.vlgmr.msrb.gmra.mxu2 %v3019_v15 }
 0x5ed   :  { %3145 = vmatpush.bf16.msra.mxu1 %v6716_v36  ;;  %3171 = vmatpush.bf16.msrb.mxu3 %v6789_v30 }
 0x5f0   :  { %3146 = vmatmul.bf16.vlgmr.msra.gmra.mxu1 %v3020_v61  ;;  %3172 = vmatmul.bf16.vlgmr.msrb.gmra.mxu3 %v3020_v61 }
 0x647   :  { %v3030_v51 = vpop.f32.mrf.mxu0 }
 0x64d   :  { %v3043_v5 = vpop.f32.mrf.mxu1  ;;  %v3056_v29 = vpop.f32.mrf.mxu2 }
 0x64e   :  { %v3044_v57 = vadd.f32 %v3043_v5, %v3030_v51  ;;  %v6796_v5 = vld [vmem:[#allocation152_spill] sm:$0xff] }
 0x64f   :  { %v3032_v37 = vpop.f32.mrf.mxu0 }
 0x650   :  { %v3177_v1 = vadd.f32 %v3044_v57, %v445_v63  ;;  %v6797_v37 = vld [vmem:[#allocation140_spill] sm:$0xff] }
 0x652   :  { %v3972_v54 = vmul.f32 -1.442695, %v3177_v1  ;;  %v6798_v1 = vld [vmem:[#allocation151_spill] sm:$0xff] }
 0x653   :  { %v3069_v4 = vpop.f32.mrf.mxu3 }
 0x654   :  { %4280 = vpow2.f32 %v3972_v54  ;;  %v3070_v56 = vadd.f32 %v3069_v4, %v3056_v29  ;;  %v561_v54 = vadd.f32 %v6798_v1, %v6797_v37 }
 0x655   :  { %v3045_v25 = vpop.f32.mrf.mxu1  ;;  %v3058_v41 = vpop.f32.mrf.mxu2 }
 0x656   :  { %v3178_v50 = vadd.f32 %v3070_v56, %v6792_v58 }
 0x657   :  { %v3082_v16 = vpop.f32.mrf.mxu0 }
 0x658   :  { %v3973_v6 = vmul.f32 -1.442695, %v3178_v50 }
 0x65a   :  { %v4281_v19 = vpop.eup %4280  ;;  %4282 = vpow2.f32 %v3973_v6 }
 0x65b   :  { %v3193_v11 = vadd.f32 1.0, %v4281_v19  ;;  %v3071_v49 = vpop.f32.mrf.mxu3 }
 0x65d   :  { %4284 = vrcp.f32 %v3193_v11  ;;  %v3095_v32 = vpop.f32.mrf.mxu1  ;;  %v3108_v12 = vpop.f32.mrf.mxu2  ;;  %v3208_v15 = vand.u32 2147483648, %v3193_v11  ;;  %vm3202_vm5 = vweird.f32 %v3193_v11  ;;  %v3206_v2 = vand.u32 2147483647, %v3193_v11 }
 0x65e   :  { %v3096_v28 = vadd.f32 %v3095_v32, %v3082_v16 }
 0x65f   :  { %v3084_v20 = vpop.f32.mrf.mxu0  ;;  %v3209_v61 = vor.u32 1.1754944e-38, %v3208_v15  ;;  %vm3207_vm3 = vcmp.eq.f32.partialorder %v3206_v2, 8.507059e+37 }
 0x660   :  { %v4283_v13 = vpop.eup %4282  ;;  %v3179_v27 = vadd.f32 %v3096_v28, %v503_v26 }
 0x661   :  { %v3194_v36 = vadd.f32 1.0, %v4283_v13 }
 0x662   :  { %v3974_v62 = vmul.f32 -1.442695, %v3179_v27 }
 0x663   :  { %v4285_v18 = vpop.eup %4284  ;;  %4286 = vrcp.f32 %v3194_v36  ;;  %v3121_v17 = vpop.f32.mrf.mxu3  ;;  %v3223_v57 = vand.u32 2147483648, %v3194_v36  ;;  %vm3217_vm7 = vweird.f32 %v3194_v36  ;;  %v3221_v56 = vand.u32 2147483647, %v3194_v36 }
 0x664   :  { %4288 = vpow2.f32 %v3974_v62  ;;  %v3122_v21 = vadd.f32 %v3121_v17, %v3108_v12  ;;  %v3198_v35 = vmul.f32 %v4285_v18, %v3193_v11  ;;  %vm3203_vm4 = vweird.f32 %v4285_v18  ;;  %v6799_v62 = vld [vmem:[#allocation137_spill] sm:$0xff] }
 0x665   :  { %v3097_v9 = vpop.f32.mrf.mxu1  ;;  %v3110_v60 = vpop.f32.mrf.mxu2  ;;  %vm3204_vm2 = vmor %vm3202_vm5, %vm3203_vm4  ;;  %v3224_v19 = vor.u32 1.1754944e-38, %v3223_v57  ;;  %vm3222_vm9 = vcmp.eq.f32.partialorder %v3221_v56, 8.507059e+37 }
 0x666   :  { %v3180_v47 = vadd.f32 %v3122_v21, %v6795_v59  ;;  %v3199_v22 = vsub.f32 1.0, %v3198_v35 }
 0x667   :  { %v3134_v8 = vpop.f32.mrf.mxu0 }
 0x668   :  { %v3975_v10 = vmul.f32 -1.442695, %v3180_v47  ;;  %v3200_v0 = vmul.f32 %v4285_v18, %v3199_v22 }
 0x669   :  { %v4287_v48 = vpop.eup %4286 }
 0x66a   :  { %v4289_v43 = vpop.eup %4288  ;;  %4290 = vpow2.f32 %v3975_v10  ;;  %v3201_v38 = vadd.f32 %v4285_v18, %v3200_v0  ;;  %v3213_v55 = vmul.f32 %v4287_v48, %v3194_v36  ;;  %vm3218_vm6 = vweird.f32 %v4287_v48 }
 0x66b   :  { %v3195_v33 = vadd.f32 1.0, %v4289_v43  ;;  %v3123_v24 = vpop.f32.mrf.mxu3  ;;  %vm3219_vm8 = vmor %vm3217_vm7, %vm3218_vm6 }
 0x66c   :  { %v3214_v3 = vsub.f32 1.0, %v3213_v55  ;;  %v3205_v31 = vsel %vm3204_vm2, %v4285_v18, %v3201_v38  ;;  %v6800_v24 = vld [vmem:[#allocation57_spill] sm:$0xff] }
 0x66d   :  { %4292 = vrcp.f32 %v3195_v33  ;;  %v3147_v45 = vpop.f32.mrf.mxu1  ;;  %v3160_v34 = vpop.f32.mrf.mxu2  ;;  %v3210_v63 = vsel %vm3207_vm3, %v3209_v61, %v3205_v31  ;;  %v3238_v46 = vand.u32 2147483648, %v3195_v33  ;;  %v3236_v28 = vand.u32 2147483647, %v3195_v33  ;;  %v6801_v61 = vld [vmem:[#allocation79_spill] sm:$0xff] }
 0x66e   :  { %v3148_v52 = vadd.f32 %v3147_v45, %v3134_v8  ;;  %v3215_v44 = vmul.f32 %v4287_v48, %v3214_v3  ;;  %vm3232_vm14 = vweird.f32 %v3195_v33  ;;  %v1446_v15 = vsel %vm3935_vm12, %v6800_v24, 0.0 }
 0x66f   :  { %v3136_v30 = vpop.f32.mrf.mxu0  ;;  %v3239_v17 = vor.u32 1.1754944e-38, %v3238_v46  ;;  %vm3237_vm11 = vcmp.eq.f32.partialorder %v3236_v28, 8.507059e+37 }
 0x670   :  { %v4291_v51 = vpop.eup %4290  ;;  %v3257_v29 = vadd.f32 %v3148_v52, %v6796_v5  ;;  %v3216_v40 = vadd.f32 %v4287_v48, %v3215_v44  ;;  %v1445_v30 = vsel %vm3934_vm1, %v6801_v61, 0.0 }
 0x671   :  { %v3196_v39 = vadd.f32 1.0, %v4291_v51 }
 0x672   :  { %v3259_v4 = vmul.f32 %v3257_v29, %v3210_v63  ;;  %v3220_v6 = vsel %vm3219_vm8, %v4287_v48, %v3216_v40 }
 0x673   :  { %v4293_v25 = vpop.eup %4292  ;;  %4294 = vrcp.f32 %v3196_v39  ;;  %v3173_v41 = vpop.f32.mrf.mxu3  ;;  %v3225_v14 = vsel %vm3222_vm9, %v3224_v19, %v3220_v6  ;;  %v3251_v47 = vand.u32 2147483647, %v3196_v39  ;;  %vm3247_vm0 = vweird.f32 %v3196_v39 }
 0x674   :  { %v3228_v58 = vmul.f32 %v4293_v25, %v3195_v33  ;;  %v3261_v50 = vadd.f32 %v3259_v4, %v561_v54  ;;  %v3174_v16 = vadd.f32 %v3173_v41, %v3160_v34  ;;  %vm3233_vm13 = vweird.f32 %v4293_v25 }
 0x675   :  { %v3149_v11 = vpop.f32.mrf.mxu1  ;;  %v3162_v49 = vpop.f32.mrf.mxu2  ;;  %vm3234_vm10 = vmor %vm3232_vm14, %vm3233_vm13  ;;  %vm3252_vm5 = vcmp.eq.f32.partialorder %v3251_v47, 8.507059e+37 }
 0x676   :  { %v3229_v32 = vsub.f32 1.0, %v3228_v58  ;;  %v3258_v12 = vadd.f32 %v3174_v16, %v5067_v23  ;;  %4296 = vtanh.f32 %v3261_v50  ;;  %v3253_v23 = vand.u32 2147483648, %v3196_v39 }
 0x678   :  { %v3230_v26 = vmul.f32 %v4293_v25, %v3229_v32  ;;  %v3260_v20 = vmul.f32 %v3258_v12, %v3225_v14  ;;  %v3254_v43 = vor.u32 1.1754944e-38, %v3253_v23 }
 0x679   :  { %v4295_v13 = vpop.eup %4294 }
 0x67a   :  { %v3231_v27 = vadd.f32 %v4293_v25, %v3230_v26  ;;  %v3243_v36 = vmul.f32 %v4295_v13, %v3196_v39  ;;  %v3262_v18 = vadd.f32 %v3260_v20, %v6799_v62  ;;  %vm3248_vm15 = vweird.f32 %v4295_v13 }
 0x67b   :  { %v3175_v21 = vpop.f32.mrf.mxu3  ;;  %vm3249_vm4 = vmor %vm3247_vm0, %vm3248_vm15 }
 0x67c   :  { %v3244_v35 = vsub.f32 1.0, %v3243_v36  ;;  %v3235_v9 = vsel %vm3234_vm10, %v4293_v25, %v3231_v27  ;;  %v4297_v8 = vpop.eup %4296  ;;  %4298 = vtanh.f32 %v3262_v18 }
 0x67d   :  { %v3240_v60 = vsel %vm3237_vm11, %v3239_v17, %v3235_v9 }
 0x67e   :  { %v3245_v59 = vmul.f32 %v4295_v13, %v3244_v35  ;;  %v3265_v22 = vsub.f32 1.0, %v3240_v60  ;;  %v3269_v48 = vmul.f32 %v3240_v60, %v5887_v53 }
 0x680   :  { %v3246_v10 = vadd.f32 %v4295_v13, %v3245_v59  ;;  %v3267_v0 = vmul.f32 %v4297_v8, %v3265_v22 }
 0x682   :  { %v3271_v38 = vadd.f32 %v3269_v48, %v3267_v0  ;;  %v3250_v55 = vsel %vm3249_vm4, %v4295_v13, %v3246_v10  ;;  %v4299_v34 = vpop.eup %4298 }
 0x683   :  { %v3255_v33 = vsel %vm3252_vm5, %v3254_v43, %v3250_v55 }
 0x684   :  { %v3279_v2 = vsel %vm3935_vm12, %v3271_v38, 0.0  ;;  %v3266_v3 = vsub.f32 1.0, %v3255_v33  ;;  %v3277_v45 = vsel %vm3935_vm12, %v3271_v38, %v5887_v53  ;;  %v3270_v44 = vmul.f32 %v3255_v33, %v5902_v7 }
 0x685   :  { %v3288_v52 = vadd.f32 %v3279_v2, %v1446_v15  ;;  %3297 = vst [vmem:[#allocation11] sm:$0xff] %v3277_v45 }
 0x686   :  { %v3268_v31 = vmul.f32 %v4299_v34, %v3266_v3 }
 0x687   :  { %3296 = vst [vmem:[#allocation10 + $0x38] sm:$0xff] %v3288_v52 }
 0x688   :  { %v3272_v53 = vadd.f32 %v3270_v44, %v3268_v31 }
 0x68a   :  { %v3280_v51 = vsel %vm3934_vm1, %v3272_v53, 0.0  ;;  %v3278_v5 = vsel %vm3934_vm1, %v3272_v53, %v5902_v7 }
 0x68b   :  { %v3281_v29 = vadd.f32 %v3280_v51, %v1445_v30  ;;  %3298 = vst [vmem:[#allocation11 + $0x8] sm:$0xff] %v3278_v5 }
 0x68c   :  { %3324 = dma.vmem_to_hbm [thread:$0]  %s3317_s19, 256, %s3319_s22, [#allocation12], %s4467_s6, %s4467_s6, %s4468_s5  }
 0x68d   :  { %3289 = vst [vmem:[#allocation10] sm:$0xff] %v3281_v29 }
 0x68e   :  { %3311 = dma.vmem_to_hbm [thread:$0]  %s3304_s24, 1024, %s3306_s27, [#allocation4], %s4467_s6, %s4467_s6, %s4468_s5  }
 0x68f   :  { %4452 = dma.done.wait [#allocation4], 1024  }
 0x690   :  { %4453 = vsyncadd [#allocation4], 4294966272 }
 0x691   :  { %4454 = dma.done.wait [#allocation12], 256  }
 0x692   :  { %4455 = vsyncadd [#allocation12], 4294967040 }
 0x693   :  { %3333 = vsyncpa [#allocation3], 1 }
 0x694   :  { %3334 = vsyncpa [#allocation6], 1 }
 0x695   :  { %3335 = vsyncpa [#allocation9], 1 }
 0x696   :  { %3336 = vsyncpa [#allocation4], 1 }
 0x697   :  { %3337 = vsyncpa [#allocation12], 1 }

</bundles_post_ra>
